<compile_context>
chip_gen: v7x
topology: tpu7x:2x2x1
jax: 0.10.0
libtpu: 0.0.40
codegen_flags: <defaults>
</compile_context>

<pallas_src>
import jax
import jax.numpy as jnp
from jax.experimental import pallas as pl
from jax.experimental.pallas import tpu as pltpu


_MAT_NAMES = ("wq", "wkv", "wo", "w1", "w2")                # bf16 MXU operands
_BLOCK_PARAM_ORDER = ("wq", "wkv", "wo", "w1", "w2", "wbias", "vec")


def _layer_norm(h, g, b, eps=1e-5):
    mu = jnp.mean(h, axis=-1, keepdims=True)
    var = jnp.mean((h - mu) * (h - mu), axis=-1, keepdims=True)
    return (h - mu) * jax.lax.rsqrt(var + eps) * g + b


def _aft_block(xq, xkv, batch, tkv,
               wq_ref, wkv_ref, wo_ref, w1_ref, w2_ref, wb_ref, vec_ref):
    """One AFT block on folded-batch token rows.

    xq : (batch*Tq, D)  f32 query-side residual stream
    xkv: (batch*Tkv, D) f32 key/value tokens
    """
    d = xq.shape[-1]
    dff = w1_ref.shape[-1]

    # Packed bias / gain slab: rows = bq, bk, bv, bo, b1, b2, g1, be1, g2, be2
    vec = vec_ref[...].astype(jnp.float32)                          # (10, dff)
    bq, bk, bv, bo = vec[0:1, :d], vec[1:2, :d], vec[2:3, :d], vec[3:4, :d]
    b1 = vec[4:5, :dff]
    b2 = vec[5:6, :d]
    g1, be1 = vec[6:7, :d], vec[7:8, :d]
    g2, be2 = vec[8:9, :d], vec[9:10, :d]

    # ---- q / k / v projections (bf16 operands, f32 accumulation) -----------
    q = jnp.dot(xq.astype(jnp.bfloat16), wq_ref[...],
                preferred_element_type=jnp.float32) + bq            # (B*Tq, D)
    kv = jnp.dot(xkv.astype(jnp.bfloat16), wkv_ref[...],
                 preferred_element_type=jnp.float32)                # (B*Tkv, 2D)
    k = kv[:, :d] + bk
    v = kv[:, d:] + bv

    # ---- AFT-full attention, numerically stabilized, num/den fused ---------
    w = wb_ref[...].astype(jnp.float32)                             # (Tq, Tkv)
    ew = jnp.exp(w - jnp.max(w, axis=1, keepdims=True))             # (Tq, Tkv)
    ek = jnp.exp(k - jnp.max(k, axis=0, keepdims=True))             # (B*Tkv, D)
    ekv = jnp.concatenate([ek * v, ek], axis=-1)                    # (B*Tkv, 2D)

    nd_rows = []
    for b in range(batch):  # unrolled; the position bias is shared over batch
        nd_rows.append(jnp.dot(ew, ekv[b * tkv:(b + 1) * tkv, :],
                               preferred_element_type=jnp.float32))
    nd = jnp.concatenate(nd_rows, axis=0)                           # (B*Tq, 2D)
    num, den = nd[:, :d], nd[:, d:]
    y = jax.nn.sigmoid(q) * num * pl.reciprocal(den + 1e-12, approx=True)

    # ---- output projection + residual + LayerNorm ---------------------------
    h = jnp.dot(y.astype(jnp.bfloat16), wo_ref[...],
                preferred_element_type=jnp.float32) + bo
    h = _layer_norm(xq + h, g1, be1)

    # ---- FFN (ReLU) + residual + LayerNorm ----------------------------------
    f = jnp.dot(h.astype(jnp.bfloat16), w1_ref[...],
                preferred_element_type=jnp.float32) + b1
    f = jnp.maximum(f, 0.0)
    f = jnp.dot(f.astype(jnp.bfloat16), w2_ref[...],
                preferred_element_type=jnp.float32) + b2
    return _layer_norm(h + f, g2, be2)


def _decoder_kernel(z_ref, x_ref,
                    zs_wq, zs_wkv, zs_wo, zs_w1, zs_w2, zs_wb, zs_vec,
                    xs_wq, xs_wkv, xs_wo, xs_w1, xs_w2, xs_wb, xs_vec,
                    cr_wq, cr_wkv, cr_wo, cr_w1, cr_w2, cr_wb, cr_vec,
                    out_ref):
    tz = zs_wb.shape[0]
    tx = xs_wb.shape[0]
    batch = z_ref.shape[0] // tz

    z = z_ref[...].astype(jnp.float32)   # (B*Tz, D)
    x = x_ref[...].astype(jnp.float32)   # (B*Tx, D)

    # Decoder.forward: z = z_self_attn(z); x = x_self_attn(x); cross_attn(z, x)
    z = _aft_block(z, z, batch, tz,
                   zs_wq, zs_wkv, zs_wo, zs_w1, zs_w2, zs_wb, zs_vec)
    x = _aft_block(x, x, batch, tx,
                   xs_wq, xs_wkv, xs_wo, xs_w1, xs_w2, xs_wb, xs_vec)
    o = _aft_block(x, z, batch, tz,                      # search attends to template
                   cr_wq, cr_wkv, cr_wo, cr_w1, cr_w2, cr_wb, cr_vec)

    out_ref[...] = o.astype(out_ref.dtype)


@jax.jit
def decoder_forward(z, x, params):
    """Decoder forward.  z: (B, Tz, D), x: (B, Tx, D)  ->  (B, Tx, D)."""
    B, Tz, D = z.shape
    _, Tx, _ = x.shape

    flat = []
    for name in ("z_self", "x_self", "cross"):
        blk = params[name]
        for p in _BLOCK_PARAM_ORDER:
            arr = blk[p]
            if p in _MAT_NAMES:
                arr = arr.astype(jnp.bfloat16)   # MXU operand; accum stays f32
            flat.append(arr)

    vmem_spec = pl.BlockSpec(memory_space=pltpu.MemorySpace.VMEM)
    out2d = pl.pallas_call(
        _decoder_kernel,
        out_shape=jax.ShapeDtypeStruct((B * Tx, D), x.dtype),
        in_specs=[vmem_spec] * (2 + len(flat)),
        out_specs=vmem_spec,
    )(z.reshape(B * Tz, D), x.reshape(B * Tx, D), *flat)
    return out2d.reshape(B, Tx, D)


# ----------------------------------------------------------------------------
# Deterministic parameter construction
# ----------------------------------------------------------------------------
def make_block_params(key, dim, tq, tkv, dff):
    assert dff >= dim
    ks = jax.random.split(key, 6)
    s = 1.0 / jnp.sqrt(jnp.float32(dim))
    wq = jax.random.normal(ks[0], (dim, dim), jnp.float32) * s
    wk = jax.random.normal(ks[1], (dim, dim), jnp.float32) * s
    wv = jax.random.normal(ks[2], (dim, dim), jnp.float32) * s
    wo = jax.random.normal(ks[3], (dim, dim), jnp.float32) * s
    w1 = jax.random.normal(ks[4], (dim, dff), jnp.float32) * s
    w2 = (jax.random.normal(ks[5], (dff, dim), jnp.float32)
          * (1.0 / jnp.sqrt(jnp.float32(dff))))

    def row(vals):
        return jnp.pad(vals, (0, dff - vals.shape[0]))

    zeros_d = jnp.zeros((dim,), jnp.float32)
    ones_d = jnp.ones((dim,), jnp.float32)
    vec = jnp.stack([
        row(zeros_d),                     # bq
        row(zeros_d),                     # bk
        row(zeros_d),                     # bv
        row(zeros_d),                     # bo
        jnp.zeros((dff,), jnp.float32),   # b1
        row(zeros_d),                     # b2
        row(ones_d),                      # g1  (LayerNorm 1 gain)
        row(zeros_d),                     # be1
        row(ones_d),                      # g2  (LayerNorm 2 gain)
        row(zeros_d),                     # be2
    ], axis=0)

    return {
        "wq": wq,
        "wkv": jnp.concatenate([wk, wv], axis=1),          # fused K/V projection
        "wo": wo,
        "w1": w1,
        "w2": w2,
        "wbias": jnp.zeros((tq, tkv), jnp.float32),        # AFT pairwise pos bias
        "vec": vec,
    }


def make_decoder_params(key, dim, tz, tx, dff):
    kz, kx, kc = jax.random.split(key, 3)
    return {
        "z_self": make_block_params(kz, dim, tz, tz, dff),
        "x_self": make_block_params(kx, dim, tx, tx, dff),
        "cross": make_block_params(kc, dim, tx, tz, dff),  # query=x, kv=z
    }


if __name__ == "__main__":
    key = jax.random.PRNGKey(0)
    k_params, k_z, k_x = jax.random.split(key, 3)

    B = 2
    dim = 32            # hidden dim
    z_size = 4          # template feature-map side -> Tz = 16 tokens
    x_size = 8          # search feature-map side   -> Tx = 64 tokens
    dff = 64

    Tz, Tx = z_size * z_size, x_size * x_size
    params = make_decoder_params(k_params, dim, Tz, Tx, dff)

    z = jax.random.normal(k_z, (B, Tz, dim), jnp.float32)
    x = jax.random.normal(k_x, (B, Tx, dim), jnp.float32)

    hs = decoder_forward(z, x, params)
    hs = jax.block_until_ready(hs)
    assert hs.shape == (B, Tx, dim), hs.shape
    assert bool(jnp.all(jnp.isfinite(hs)))
    print("KERNEL_OK")
</pallas_src>

<mosaic_0001>
module attributes {stable_mosaic.version = 11 : i64} {
  func.func @_decoder_kernel(%arg0: memref<32x32xf32, #tpu.memory_space<vmem>>, %arg1: memref<128x32xf32, #tpu.memory_space<vmem>>, %arg2: memref<32x32xbf16, #tpu.memory_space<vmem>>, %arg3: memref<32x64xbf16, #tpu.memory_space<vmem>>, %arg4: memref<32x32xbf16, #tpu.memory_space<vmem>>, %arg5: memref<32x64xbf16, #tpu.memory_space<vmem>>, %arg6: memref<64x32xbf16, #tpu.memory_space<vmem>>, %arg7: memref<16x16xf32, #tpu.memory_space<vmem>>, %arg8: memref<10x64xf32, #tpu.memory_space<vmem>>, %arg9: memref<32x32xbf16, #tpu.memory_space<vmem>>, %arg10: memref<32x64xbf16, #tpu.memory_space<vmem>>, %arg11: memref<32x32xbf16, #tpu.memory_space<vmem>>, %arg12: memref<32x64xbf16, #tpu.memory_space<vmem>>, %arg13: memref<64x32xbf16, #tpu.memory_space<vmem>>, %arg14: memref<64x64xf32, #tpu.memory_space<vmem>>, %arg15: memref<10x64xf32, #tpu.memory_space<vmem>>, %arg16: memref<32x32xbf16, #tpu.memory_space<vmem>>, %arg17: memref<32x64xbf16, #tpu.memory_space<vmem>>, %arg18: memref<32x32xbf16, #tpu.memory_space<vmem>>, %arg19: memref<32x64xbf16, #tpu.memory_space<vmem>>, %arg20: memref<64x32xbf16, #tpu.memory_space<vmem>>, %arg21: memref<64x16xf32, #tpu.memory_space<vmem>>, %arg22: memref<10x64xf32, #tpu.memory_space<vmem>>, %arg23: memref<128x32xf32, #tpu.memory_space<vmem>>) attributes {dimension_semantics = [], scalar_prefetch = 0 : i64, scratch_operands = 0 : i64, tpu.core_type = #tpu.core_type<tc>} {
    %c0 = arith.constant 0 : index
    %c0_0 = arith.constant 0 : index
    %0 = vector.load %arg0[%c0, %c0_0] : memref<32x32xf32, #tpu.memory_space<vmem>>, vector<32x32xf32>
    %c0_1 = arith.constant 0 : index
    %c0_2 = arith.constant 0 : index
    %1 = vector.load %arg1[%c0_1, %c0_2] : memref<128x32xf32, #tpu.memory_space<vmem>>, vector<128x32xf32>
    %c0_3 = arith.constant 0 : index
    %c0_4 = arith.constant 0 : index
    %2 = vector.load %arg8[%c0_3, %c0_4] : memref<10x64xf32, #tpu.memory_space<vmem>>, vector<10x64xf32>
    %3 = vector.extract_strided_slice %2 {offsets = [0, 0], sizes = [1, 32], strides = [1, 1]} : vector<10x64xf32> to vector<1x32xf32>
    %4 = vector.extract_strided_slice %2 {offsets = [1, 0], sizes = [1, 32], strides = [1, 1]} : vector<10x64xf32> to vector<1x32xf32>
    %5 = vector.extract_strided_slice %2 {offsets = [2, 0], sizes = [1, 32], strides = [1, 1]} : vector<10x64xf32> to vector<1x32xf32>
    %6 = vector.extract_strided_slice %2 {offsets = [3, 0], sizes = [1, 32], strides = [1, 1]} : vector<10x64xf32> to vector<1x32xf32>
    %7 = vector.extract_strided_slice %2 {offsets = [4, 0], sizes = [1, 64], strides = [1, 1]} : vector<10x64xf32> to vector<1x64xf32>
    %8 = vector.extract_strided_slice %2 {offsets = [5, 0], sizes = [1, 32], strides = [1, 1]} : vector<10x64xf32> to vector<1x32xf32>
    %9 = vector.extract_strided_slice %2 {offsets = [6, 0], sizes = [1, 32], strides = [1, 1]} : vector<10x64xf32> to vector<1x32xf32>
    %10 = vector.extract_strided_slice %2 {offsets = [7, 0], sizes = [1, 32], strides = [1, 1]} : vector<10x64xf32> to vector<1x32xf32>
    %11 = vector.extract_strided_slice %2 {offsets = [8, 0], sizes = [1, 32], strides = [1, 1]} : vector<10x64xf32> to vector<1x32xf32>
    %12 = vector.extract_strided_slice %2 {offsets = [9, 0], sizes = [1, 32], strides = [1, 1]} : vector<10x64xf32> to vector<1x32xf32>
    %13 = arith.truncf %0 : vector<32x32xf32> to vector<32x32xbf16>
    %c0_5 = arith.constant 0 : index
    %c0_6 = arith.constant 0 : index
    %14 = vector.load %arg2[%c0_5, %c0_6] : memref<32x32xbf16, #tpu.memory_space<vmem>>, vector<32x32xbf16>
    %cst = arith.constant dense<0.000000e+00> : vector<32x32xf32>
    %15 = tpu.matmul %13, %14, %cst {dimension_numbers = #tpu.dot_dimension_numbers<[1], [0], [0], [1], [0, 0, 1, 1], [], []>} : vector<32x32xbf16>, vector<32x32xbf16>, vector<32x32xf32> -> vector<32x32xf32>
    %16 = vector.broadcast %3 : vector<1x32xf32> to vector<32x32xf32>
    %17 = arith.addf %15, %16 : vector<32x32xf32>
    %18 = arith.truncf %0 : vector<32x32xf32> to vector<32x32xbf16>
    %c0_7 = arith.constant 0 : index
    %c0_8 = arith.constant 0 : index
    %19 = vector.load %arg3[%c0_7, %c0_8] : memref<32x64xbf16, #tpu.memory_space<vmem>>, vector<32x64xbf16>
    %cst_9 = arith.constant dense<0.000000e+00> : vector<32x64xf32>
    %20 = tpu.matmul %18, %19, %cst_9 {dimension_numbers = #tpu.dot_dimension_numbers<[1], [0], [0], [1], [0, 0, 1, 1], [], []>} : vector<32x32xbf16>, vector<32x64xbf16>, vector<32x64xf32> -> vector<32x64xf32>
    %21 = vector.extract_strided_slice %20 {offsets = [0, 0], sizes = [32, 32], strides = [1, 1]} : vector<32x64xf32> to vector<32x32xf32>
    %22 = vector.broadcast %4 : vector<1x32xf32> to vector<32x32xf32>
    %23 = arith.addf %21, %22 : vector<32x32xf32>
    %24 = vector.extract_strided_slice %20 {offsets = [0, 32], sizes = [32, 32], strides = [1, 1]} : vector<32x64xf32> to vector<32x32xf32>
    %25 = vector.broadcast %5 : vector<1x32xf32> to vector<32x32xf32>
    %26 = arith.addf %24, %25 : vector<32x32xf32>
    %c0_10 = arith.constant 0 : index
    %c0_11 = arith.constant 0 : index
    %27 = vector.load %arg7[%c0_10, %c0_11] : memref<16x16xf32, #tpu.memory_space<vmem>>, vector<16x16xf32>
    %cst_12 = arith.constant dense<0xFF800000> : vector<16xf32>
    %28 = vector.multi_reduction <maximumf>, %27, %cst_12 [1] : vector<16x16xf32> to vector<16xf32>
    %29 = vector.shape_cast %28 : vector<16xf32> to vector<16x1xf32>
    %30 = vector.broadcast %29 : vector<16x1xf32> to vector<16x16xf32>
    %31 = arith.subf %27, %30 : vector<16x16xf32>
    %32 = math.exp %31 : vector<16x16xf32>
    %cst_13 = arith.constant dense<0xFF800000> : vector<32xf32>
    %33 = vector.multi_reduction <maximumf>, %23, %cst_13 [0] : vector<32x32xf32> to vector<32xf32>
    %34 = vector.shape_cast %33 : vector<32xf32> to vector<1x32xf32>
    %35 = vector.broadcast %34 : vector<1x32xf32> to vector<32x32xf32>
    %36 = arith.subf %23, %35 : vector<32x32xf32>
    %37 = math.exp %36 : vector<32x32xf32>
    %38 = arith.mulf %37, %26 : vector<32x32xf32>
    %39 = tpu.concatenate %38, %37 in 1 : vector<32x32xf32>, vector<32x32xf32> -> vector<32x64xf32>
    %40 = vector.extract_strided_slice %39 {offsets = [0, 0], sizes = [16, 64], strides = [1, 1]} : vector<32x64xf32> to vector<16x64xf32>
    %cst_14 = arith.constant dense<0.000000e+00> : vector<16x64xf32>
    %41 = tpu.matmul %32, %40, %cst_14 {dimension_numbers = #tpu.dot_dimension_numbers<[1], [0], [0], [1], [0, 0, 1, 1], [], []>} : vector<16x16xf32>, vector<16x64xf32>, vector<16x64xf32> -> vector<16x64xf32>
    %42 = vector.extract_strided_slice %39 {offsets = [16, 0], sizes = [16, 64], strides = [1, 1]} : vector<32x64xf32> to vector<16x64xf32>
    %cst_15 = arith.constant dense<0.000000e+00> : vector<16x64xf32>
    %43 = tpu.matmul %32, %42, %cst_15 {dimension_numbers = #tpu.dot_dimension_numbers<[1], [0], [0], [1], [0, 0, 1, 1], [], []>} : vector<16x16xf32>, vector<16x64xf32>, vector<16x64xf32> -> vector<16x64xf32>
    %44 = tpu.concatenate %41, %43 in 0 : vector<16x64xf32>, vector<16x64xf32> -> vector<32x64xf32>
    %45 = vector.extract_strided_slice %44 {offsets = [0, 0], sizes = [32, 32], strides = [1, 1]} : vector<32x64xf32> to vector<32x32xf32>
    %46 = vector.extract_strided_slice %44 {offsets = [0, 32], sizes = [32, 32], strides = [1, 1]} : vector<32x64xf32> to vector<32x32xf32>
    %47 = arith.negf %17 : vector<32x32xf32>
    %48 = math.exp %47 : vector<32x32xf32>
    %cst_16 = arith.constant 1.000000e+00 : f32
    %49 = vector.broadcast %cst_16 : f32 to vector<32x32xf32>
    %50 = arith.addf %49, %48 : vector<32x32xf32>
    %51 = arith.divf %49, %50 : vector<32x32xf32>
    %52 = arith.mulf %51, %45 : vector<32x32xf32>
    %cst_17 = arith.constant 9.99999996E-13 : f32
    %53 = vector.broadcast %cst_17 : f32 to vector<32x32xf32>
    %54 = arith.addf %46, %53 : vector<32x32xf32>
    %55 = tpu.reciprocal %54 {approx = true} : vector<32x32xf32> -> vector<32x32xf32>
    %56 = arith.mulf %52, %55 : vector<32x32xf32>
    %57 = arith.truncf %56 : vector<32x32xf32> to vector<32x32xbf16>
    %c0_18 = arith.constant 0 : index
    %c0_19 = arith.constant 0 : index
    %58 = vector.load %arg4[%c0_18, %c0_19] : memref<32x32xbf16, #tpu.memory_space<vmem>>, vector<32x32xbf16>
    %cst_20 = arith.constant dense<0.000000e+00> : vector<32x32xf32>
    %59 = tpu.matmul %57, %58, %cst_20 {dimension_numbers = #tpu.dot_dimension_numbers<[1], [0], [0], [1], [0, 0, 1, 1], [], []>} : vector<32x32xbf16>, vector<32x32xbf16>, vector<32x32xf32> -> vector<32x32xf32>
    %60 = vector.broadcast %6 : vector<1x32xf32> to vector<32x32xf32>
    %61 = arith.addf %59, %60 : vector<32x32xf32>
    %62 = arith.addf %0, %61 : vector<32x32xf32>
    %cst_21 = arith.constant dense<0.000000e+00> : vector<32xf32>
    %63 = vector.multi_reduction <add>, %62, %cst_21 [1] : vector<32x32xf32> to vector<32xf32>
    %64 = vector.shape_cast %63 : vector<32xf32> to vector<32x1xf32>
    %cst_22 = arith.constant 3.200000e+01 : f32
    %65 = vector.broadcast %cst_22 : f32 to vector<32x1xf32>
    %66 = arith.divf %64, %65 : vector<32x1xf32>
    %67 = vector.broadcast %66 : vector<32x1xf32> to vector<32x32xf32>
    %68 = arith.subf %62, %67 : vector<32x32xf32>
    %69 = vector.broadcast %66 : vector<32x1xf32> to vector<32x32xf32>
    %70 = arith.subf %62, %69 : vector<32x32xf32>
    %71 = arith.mulf %68, %70 : vector<32x32xf32>
    %cst_23 = arith.constant dense<0.000000e+00> : vector<32xf32>
    %72 = vector.multi_reduction <add>, %71, %cst_23 [1] : vector<32x32xf32> to vector<32xf32>
    %73 = vector.shape_cast %72 : vector<32xf32> to vector<32x1xf32>
    %cst_24 = arith.constant 3.200000e+01 : f32
    %74 = vector.broadcast %cst_24 : f32 to vector<32x1xf32>
    %75 = arith.divf %73, %74 : vector<32x1xf32>
    %76 = vector.broadcast %66 : vector<32x1xf32> to vector<32x32xf32>
    %77 = arith.subf %62, %76 : vector<32x32xf32>
    %cst_25 = arith.constant 9.99999974E-6 : f32
    %78 = vector.broadcast %cst_25 : f32 to vector<32x1xf32>
    %79 = arith.addf %75, %78 : vector<32x1xf32>
    %80 = math.rsqrt %79 : vector<32x1xf32>
    %81 = vector.broadcast %80 : vector<32x1xf32> to vector<32x32xf32>
    %82 = arith.mulf %77, %81 : vector<32x32xf32>
    %83 = vector.broadcast %9 : vector<1x32xf32> to vector<32x32xf32>
    %84 = arith.mulf %82, %83 : vector<32x32xf32>
    %85 = vector.broadcast %10 : vector<1x32xf32> to vector<32x32xf32>
    %86 = arith.addf %84, %85 : vector<32x32xf32>
    %87 = arith.truncf %86 : vector<32x32xf32> to vector<32x32xbf16>
    %c0_26 = arith.constant 0 : index
    %c0_27 = arith.constant 0 : index
    %88 = vector.load %arg5[%c0_26, %c0_27] : memref<32x64xbf16, #tpu.memory_space<vmem>>, vector<32x64xbf16>
    %cst_28 = arith.constant dense<0.000000e+00> : vector<32x64xf32>
    %89 = tpu.matmul %87, %88, %cst_28 {dimension_numbers = #tpu.dot_dimension_numbers<[1], [0], [0], [1], [0, 0, 1, 1], [], []>} : vector<32x32xbf16>, vector<32x64xbf16>, vector<32x64xf32> -> vector<32x64xf32>
    %90 = vector.broadcast %7 : vector<1x64xf32> to vector<32x64xf32>
    %91 = arith.addf %89, %90 : vector<32x64xf32>
    %cst_29 = arith.constant 0.000000e+00 : f32
    %92 = vector.broadcast %cst_29 : f32 to vector<32x64xf32>
    %93 = arith.maximumf %91, %92 : vector<32x64xf32>
    %94 = arith.truncf %93 : vector<32x64xf32> to vector<32x64xbf16>
    %c0_30 = arith.constant 0 : index
    %c0_31 = arith.constant 0 : index
    %95 = vector.load %arg6[%c0_30, %c0_31] : memref<64x32xbf16, #tpu.memory_space<vmem>>, vector<64x32xbf16>
    %cst_32 = arith.constant dense<0.000000e+00> : vector<32x32xf32>
    %96 = tpu.matmul %94, %95, %cst_32 {dimension_numbers = #tpu.dot_dimension_numbers<[1], [0], [0], [1], [0, 0, 1, 1], [], []>} : vector<32x64xbf16>, vector<64x32xbf16>, vector<32x32xf32> -> vector<32x32xf32>
    %97 = vector.broadcast %8 : vector<1x32xf32> to vector<32x32xf32>
    %98 = arith.addf %96, %97 : vector<32x32xf32>
    %99 = arith.addf %86, %98 : vector<32x32xf32>
    %cst_33 = arith.constant dense<0.000000e+00> : vector<32xf32>
    %100 = vector.multi_reduction <add>, %99, %cst_33 [1] : vector<32x32xf32> to vector<32xf32>
    %101 = vector.shape_cast %100 : vector<32xf32> to vector<32x1xf32>
    %cst_34 = arith.constant 3.200000e+01 : f32
    %102 = vector.broadcast %cst_34 : f32 to vector<32x1xf32>
    %103 = arith.divf %101, %102 : vector<32x1xf32>
    %104 = vector.broadcast %103 : vector<32x1xf32> to vector<32x32xf32>
    %105 = arith.subf %99, %104 : vector<32x32xf32>
    %106 = vector.broadcast %103 : vector<32x1xf32> to vector<32x32xf32>
    %107 = arith.subf %99, %106 : vector<32x32xf32>
    %108 = arith.mulf %105, %107 : vector<32x32xf32>
    %cst_35 = arith.constant dense<0.000000e+00> : vector<32xf32>
    %109 = vector.multi_reduction <add>, %108, %cst_35 [1] : vector<32x32xf32> to vector<32xf32>
    %110 = vector.shape_cast %109 : vector<32xf32> to vector<32x1xf32>
    %cst_36 = arith.constant 3.200000e+01 : f32
    %111 = vector.broadcast %cst_36 : f32 to vector<32x1xf32>
    %112 = arith.divf %110, %111 : vector<32x1xf32>
    %113 = vector.broadcast %103 : vector<32x1xf32> to vector<32x32xf32>
    %114 = arith.subf %99, %113 : vector<32x32xf32>
    %cst_37 = arith.constant 9.99999974E-6 : f32
    %115 = vector.broadcast %cst_37 : f32 to vector<32x1xf32>
    %116 = arith.addf %112, %115 : vector<32x1xf32>
    %117 = math.rsqrt %116 : vector<32x1xf32>
    %118 = vector.broadcast %117 : vector<32x1xf32> to vector<32x32xf32>
    %119 = arith.mulf %114, %118 : vector<32x32xf32>
    %120 = vector.broadcast %11 : vector<1x32xf32> to vector<32x32xf32>
    %121 = arith.mulf %119, %120 : vector<32x32xf32>
    %122 = vector.broadcast %12 : vector<1x32xf32> to vector<32x32xf32>
    %123 = arith.addf %121, %122 : vector<32x32xf32>
    %c0_38 = arith.constant 0 : index
    %c0_39 = arith.constant 0 : index
    %124 = vector.load %arg15[%c0_38, %c0_39] : memref<10x64xf32, #tpu.memory_space<vmem>>, vector<10x64xf32>
    %125 = vector.extract_strided_slice %124 {offsets = [0, 0], sizes = [1, 32], strides = [1, 1]} : vector<10x64xf32> to vector<1x32xf32>
    %126 = vector.extract_strided_slice %124 {offsets = [1, 0], sizes = [1, 32], strides = [1, 1]} : vector<10x64xf32> to vector<1x32xf32>
    %127 = vector.extract_strided_slice %124 {offsets = [2, 0], sizes = [1, 32], strides = [1, 1]} : vector<10x64xf32> to vector<1x32xf32>
    %128 = vector.extract_strided_slice %124 {offsets = [3, 0], sizes = [1, 32], strides = [1, 1]} : vector<10x64xf32> to vector<1x32xf32>
    %129 = vector.extract_strided_slice %124 {offsets = [4, 0], sizes = [1, 64], strides = [1, 1]} : vector<10x64xf32> to vector<1x64xf32>
    %130 = vector.extract_strided_slice %124 {offsets = [5, 0], sizes = [1, 32], strides = [1, 1]} : vector<10x64xf32> to vector<1x32xf32>
    %131 = vector.extract_strided_slice %124 {offsets = [6, 0], sizes = [1, 32], strides = [1, 1]} : vector<10x64xf32> to vector<1x32xf32>
    %132 = vector.extract_strided_slice %124 {offsets = [7, 0], sizes = [1, 32], strides = [1, 1]} : vector<10x64xf32> to vector<1x32xf32>
    %133 = vector.extract_strided_slice %124 {offsets = [8, 0], sizes = [1, 32], strides = [1, 1]} : vector<10x64xf32> to vector<1x32xf32>
    %134 = vector.extract_strided_slice %124 {offsets = [9, 0], sizes = [1, 32], strides = [1, 1]} : vector<10x64xf32> to vector<1x32xf32>
    %135 = arith.truncf %1 : vector<128x32xf32> to vector<128x32xbf16>
    %c0_40 = arith.constant 0 : index
    %c0_41 = arith.constant 0 : index
    %136 = vector.load %arg9[%c0_40, %c0_41] : memref<32x32xbf16, #tpu.memory_space<vmem>>, vector<32x32xbf16>
    %cst_42 = arith.constant dense<0.000000e+00> : vector<128x32xf32>
    %137 = tpu.matmul %135, %136, %cst_42 {dimension_numbers = #tpu.dot_dimension_numbers<[1], [0], [0], [1], [0, 0, 1, 1], [], []>} : vector<128x32xbf16>, vector<32x32xbf16>, vector<128x32xf32> -> vector<128x32xf32>
    %138 = vector.broadcast %125 : vector<1x32xf32> to vector<128x32xf32>
    %139 = arith.addf %137, %138 : vector<128x32xf32>
    %140 = arith.truncf %1 : vector<128x32xf32> to vector<128x32xbf16>
    %c0_43 = arith.constant 0 : index
    %c0_44 = arith.constant 0 : index
    %141 = vector.load %arg10[%c0_43, %c0_44] : memref<32x64xbf16, #tpu.memory_space<vmem>>, vector<32x64xbf16>
    %cst_45 = arith.constant dense<0.000000e+00> : vector<128x64xf32>
    %142 = tpu.matmul %140, %141, %cst_45 {dimension_numbers = #tpu.dot_dimension_numbers<[1], [0], [0], [1], [0, 0, 1, 1], [], []>} : vector<128x32xbf16>, vector<32x64xbf16>, vector<128x64xf32> -> vector<128x64xf32>
    %143 = vector.extract_strided_slice %142 {offsets = [0, 0], sizes = [128, 32], strides = [1, 1]} : vector<128x64xf32> to vector<128x32xf32>
    %144 = vector.broadcast %126 : vector<1x32xf32> to vector<128x32xf32>
    %145 = arith.addf %143, %144 : vector<128x32xf32>
    %146 = vector.extract_strided_slice %142 {offsets = [0, 32], sizes = [128, 32], strides = [1, 1]} : vector<128x64xf32> to vector<128x32xf32>
    %147 = vector.broadcast %127 : vector<1x32xf32> to vector<128x32xf32>
    %148 = arith.addf %146, %147 : vector<128x32xf32>
    %c0_46 = arith.constant 0 : index
    %c0_47 = arith.constant 0 : index
    %149 = vector.load %arg14[%c0_46, %c0_47] : memref<64x64xf32, #tpu.memory_space<vmem>>, vector<64x64xf32>
    %cst_48 = arith.constant dense<0xFF800000> : vector<64xf32>
    %150 = vector.multi_reduction <maximumf>, %149, %cst_48 [1] : vector<64x64xf32> to vector<64xf32>
    %151 = vector.shape_cast %150 : vector<64xf32> to vector<64x1xf32>
    %152 = vector.broadcast %151 : vector<64x1xf32> to vector<64x64xf32>
    %153 = arith.subf %149, %152 : vector<64x64xf32>
    %154 = math.exp %153 : vector<64x64xf32>
    %cst_49 = arith.constant dense<0xFF800000> : vector<32xf32>
    %155 = vector.multi_reduction <maximumf>, %145, %cst_49 [0] : vector<128x32xf32> to vector<32xf32>
    %156 = vector.shape_cast %155 : vector<32xf32> to vector<1x32xf32>
    %157 = vector.broadcast %156 : vector<1x32xf32> to vector<128x32xf32>
    %158 = arith.subf %145, %157 : vector<128x32xf32>
    %159 = math.exp %158 : vector<128x32xf32>
    %160 = arith.mulf %159, %148 : vector<128x32xf32>
    %161 = tpu.concatenate %160, %159 in 1 : vector<128x32xf32>, vector<128x32xf32> -> vector<128x64xf32>
    %162 = vector.extract_strided_slice %161 {offsets = [0, 0], sizes = [64, 64], strides = [1, 1]} : vector<128x64xf32> to vector<64x64xf32>
    %cst_50 = arith.constant dense<0.000000e+00> : vector<64x64xf32>
    %163 = tpu.matmul %154, %162, %cst_50 {dimension_numbers = #tpu.dot_dimension_numbers<[1], [0], [0], [1], [0, 0, 1, 1], [], []>} : vector<64x64xf32>, vector<64x64xf32>, vector<64x64xf32> -> vector<64x64xf32>
    %164 = vector.extract_strided_slice %161 {offsets = [64, 0], sizes = [64, 64], strides = [1, 1]} : vector<128x64xf32> to vector<64x64xf32>
    %cst_51 = arith.constant dense<0.000000e+00> : vector<64x64xf32>
    %165 = tpu.matmul %154, %164, %cst_51 {dimension_numbers = #tpu.dot_dimension_numbers<[1], [0], [0], [1], [0, 0, 1, 1], [], []>} : vector<64x64xf32>, vector<64x64xf32>, vector<64x64xf32> -> vector<64x64xf32>
    %166 = tpu.concatenate %163, %165 in 0 : vector<64x64xf32>, vector<64x64xf32> -> vector<128x64xf32>
    %167 = vector.extract_strided_slice %166 {offsets = [0, 0], sizes = [128, 32], strides = [1, 1]} : vector<128x64xf32> to vector<128x32xf32>
    %168 = vector.extract_strided_slice %166 {offsets = [0, 32], sizes = [128, 32], strides = [1, 1]} : vector<128x64xf32> to vector<128x32xf32>
    %169 = arith.negf %139 : vector<128x32xf32>
    %170 = math.exp %169 : vector<128x32xf32>
    %cst_52 = arith.constant 1.000000e+00 : f32
    %171 = vector.broadcast %cst_52 : f32 to vector<128x32xf32>
    %172 = arith.addf %171, %170 : vector<128x32xf32>
    %173 = arith.divf %171, %172 : vector<128x32xf32>
    %174 = arith.mulf %173, %167 : vector<128x32xf32>
    %cst_53 = arith.constant 9.99999996E-13 : f32
    %175 = vector.broadcast %cst_53 : f32 to vector<128x32xf32>
    %176 = arith.addf %168, %175 : vector<128x32xf32>
    %177 = tpu.reciprocal %176 {approx = true} : vector<128x32xf32> -> vector<128x32xf32>
    %178 = arith.mulf %174, %177 : vector<128x32xf32>
    %179 = arith.truncf %178 : vector<128x32xf32> to vector<128x32xbf16>
    %c0_54 = arith.constant 0 : index
    %c0_55 = arith.constant 0 : index
    %180 = vector.load %arg11[%c0_54, %c0_55] : memref<32x32xbf16, #tpu.memory_space<vmem>>, vector<32x32xbf16>
    %cst_56 = arith.constant dense<0.000000e+00> : vector<128x32xf32>
    %181 = tpu.matmul %179, %180, %cst_56 {dimension_numbers = #tpu.dot_dimension_numbers<[1], [0], [0], [1], [0, 0, 1, 1], [], []>} : vector<128x32xbf16>, vector<32x32xbf16>, vector<128x32xf32> -> vector<128x32xf32>
    %182 = vector.broadcast %128 : vector<1x32xf32> to vector<128x32xf32>
    %183 = arith.addf %181, %182 : vector<128x32xf32>
    %184 = arith.addf %1, %183 : vector<128x32xf32>
    %cst_57 = arith.constant dense<0.000000e+00> : vector<128xf32>
    %185 = vector.multi_reduction <add>, %184, %cst_57 [1] : vector<128x32xf32> to vector<128xf32>
    %186 = vector.shape_cast %185 : vector<128xf32> to vector<128x1xf32>
    %cst_58 = arith.constant 3.200000e+01 : f32
    %187 = vector.broadcast %cst_58 : f32 to vector<128x1xf32>
    %188 = arith.divf %186, %187 : vector<128x1xf32>
    %189 = vector.broadcast %188 : vector<128x1xf32> to vector<128x32xf32>
    %190 = arith.subf %184, %189 : vector<128x32xf32>
    %191 = vector.broadcast %188 : vector<128x1xf32> to vector<128x32xf32>
    %192 = arith.subf %184, %191 : vector<128x32xf32>
    %193 = arith.mulf %190, %192 : vector<128x32xf32>
    %cst_59 = arith.constant dense<0.000000e+00> : vector<128xf32>
    %194 = vector.multi_reduction <add>, %193, %cst_59 [1] : vector<128x32xf32> to vector<128xf32>
    %195 = vector.shape_cast %194 : vector<128xf32> to vector<128x1xf32>
    %cst_60 = arith.constant 3.200000e+01 : f32
    %196 = vector.broadcast %cst_60 : f32 to vector<128x1xf32>
    %197 = arith.divf %195, %196 : vector<128x1xf32>
    %198 = vector.broadcast %188 : vector<128x1xf32> to vector<128x32xf32>
    %199 = arith.subf %184, %198 : vector<128x32xf32>
    %cst_61 = arith.constant 9.99999974E-6 : f32
    %200 = vector.broadcast %cst_61 : f32 to vector<128x1xf32>
    %201 = arith.addf %197, %200 : vector<128x1xf32>
    %202 = math.rsqrt %201 : vector<128x1xf32>
    %203 = vector.broadcast %202 : vector<128x1xf32> to vector<128x32xf32>
    %204 = arith.mulf %199, %203 : vector<128x32xf32>
    %205 = vector.broadcast %131 : vector<1x32xf32> to vector<128x32xf32>
    %206 = arith.mulf %204, %205 : vector<128x32xf32>
    %207 = vector.broadcast %132 : vector<1x32xf32> to vector<128x32xf32>
    %208 = arith.addf %206, %207 : vector<128x32xf32>
    %209 = arith.truncf %208 : vector<128x32xf32> to vector<128x32xbf16>
    %c0_62 = arith.constant 0 : index
    %c0_63 = arith.constant 0 : index
    %210 = vector.load %arg12[%c0_62, %c0_63] : memref<32x64xbf16, #tpu.memory_space<vmem>>, vector<32x64xbf16>
    %cst_64 = arith.constant dense<0.000000e+00> : vector<128x64xf32>
    %211 = tpu.matmul %209, %210, %cst_64 {dimension_numbers = #tpu.dot_dimension_numbers<[1], [0], [0], [1], [0, 0, 1, 1], [], []>} : vector<128x32xbf16>, vector<32x64xbf16>, vector<128x64xf32> -> vector<128x64xf32>
    %212 = vector.broadcast %129 : vector<1x64xf32> to vector<128x64xf32>
    %213 = arith.addf %211, %212 : vector<128x64xf32>
    %cst_65 = arith.constant 0.000000e+00 : f32
    %214 = vector.broadcast %cst_65 : f32 to vector<128x64xf32>
    %215 = arith.maximumf %213, %214 : vector<128x64xf32>
    %216 = arith.truncf %215 : vector<128x64xf32> to vector<128x64xbf16>
    %c0_66 = arith.constant 0 : index
    %c0_67 = arith.constant 0 : index
    %217 = vector.load %arg13[%c0_66, %c0_67] : memref<64x32xbf16, #tpu.memory_space<vmem>>, vector<64x32xbf16>
    %cst_68 = arith.constant dense<0.000000e+00> : vector<128x32xf32>
    %218 = tpu.matmul %216, %217, %cst_68 {dimension_numbers = #tpu.dot_dimension_numbers<[1], [0], [0], [1], [0, 0, 1, 1], [], []>} : vector<128x64xbf16>, vector<64x32xbf16>, vector<128x32xf32> -> vector<128x32xf32>
    %219 = vector.broadcast %130 : vector<1x32xf32> to vector<128x32xf32>
    %220 = arith.addf %218, %219 : vector<128x32xf32>
    %221 = arith.addf %208, %220 : vector<128x32xf32>
    %cst_69 = arith.constant dense<0.000000e+00> : vector<128xf32>
    %222 = vector.multi_reduction <add>, %221, %cst_69 [1] : vector<128x32xf32> to vector<128xf32>
    %223 = vector.shape_cast %222 : vector<128xf32> to vector<128x1xf32>
    %cst_70 = arith.constant 3.200000e+01 : f32
    %224 = vector.broadcast %cst_70 : f32 to vector<128x1xf32>
    %225 = arith.divf %223, %224 : vector<128x1xf32>
    %226 = vector.broadcast %225 : vector<128x1xf32> to vector<128x32xf32>
    %227 = arith.subf %221, %226 : vector<128x32xf32>
    %228 = vector.broadcast %225 : vector<128x1xf32> to vector<128x32xf32>
    %229 = arith.subf %221, %228 : vector<128x32xf32>
    %230 = arith.mulf %227, %229 : vector<128x32xf32>
    %cst_71 = arith.constant dense<0.000000e+00> : vector<128xf32>
    %231 = vector.multi_reduction <add>, %230, %cst_71 [1] : vector<128x32xf32> to vector<128xf32>
    %232 = vector.shape_cast %231 : vector<128xf32> to vector<128x1xf32>
    %cst_72 = arith.constant 3.200000e+01 : f32
    %233 = vector.broadcast %cst_72 : f32 to vector<128x1xf32>
    %234 = arith.divf %232, %233 : vector<128x1xf32>
    %235 = vector.broadcast %225 : vector<128x1xf32> to vector<128x32xf32>
    %236 = arith.subf %221, %235 : vector<128x32xf32>
    %cst_73 = arith.constant 9.99999974E-6 : f32
    %237 = vector.broadcast %cst_73 : f32 to vector<128x1xf32>
    %238 = arith.addf %234, %237 : vector<128x1xf32>
    %239 = math.rsqrt %238 : vector<128x1xf32>
    %240 = vector.broadcast %239 : vector<128x1xf32> to vector<128x32xf32>
    %241 = arith.mulf %236, %240 : vector<128x32xf32>
    %242 = vector.broadcast %133 : vector<1x32xf32> to vector<128x32xf32>
    %243 = arith.mulf %241, %242 : vector<128x32xf32>
    %244 = vector.broadcast %134 : vector<1x32xf32> to vector<128x32xf32>
    %245 = arith.addf %243, %244 : vector<128x32xf32>
    %c0_74 = arith.constant 0 : index
    %c0_75 = arith.constant 0 : index
    %246 = vector.load %arg22[%c0_74, %c0_75] : memref<10x64xf32, #tpu.memory_space<vmem>>, vector<10x64xf32>
    %247 = vector.extract_strided_slice %246 {offsets = [0, 0], sizes = [1, 32], strides = [1, 1]} : vector<10x64xf32> to vector<1x32xf32>
    %248 = vector.extract_strided_slice %246 {offsets = [1, 0], sizes = [1, 32], strides = [1, 1]} : vector<10x64xf32> to vector<1x32xf32>
    %249 = vector.extract_strided_slice %246 {offsets = [2, 0], sizes = [1, 32], strides = [1, 1]} : vector<10x64xf32> to vector<1x32xf32>
    %250 = vector.extract_strided_slice %246 {offsets = [3, 0], sizes = [1, 32], strides = [1, 1]} : vector<10x64xf32> to vector<1x32xf32>
    %251 = vector.extract_strided_slice %246 {offsets = [4, 0], sizes = [1, 64], strides = [1, 1]} : vector<10x64xf32> to vector<1x64xf32>
    %252 = vector.extract_strided_slice %246 {offsets = [5, 0], sizes = [1, 32], strides = [1, 1]} : vector<10x64xf32> to vector<1x32xf32>
    %253 = vector.extract_strided_slice %246 {offsets = [6, 0], sizes = [1, 32], strides = [1, 1]} : vector<10x64xf32> to vector<1x32xf32>
    %254 = vector.extract_strided_slice %246 {offsets = [7, 0], sizes = [1, 32], strides = [1, 1]} : vector<10x64xf32> to vector<1x32xf32>
    %255 = vector.extract_strided_slice %246 {offsets = [8, 0], sizes = [1, 32], strides = [1, 1]} : vector<10x64xf32> to vector<1x32xf32>
    %256 = vector.extract_strided_slice %246 {offsets = [9, 0], sizes = [1, 32], strides = [1, 1]} : vector<10x64xf32> to vector<1x32xf32>
    %257 = arith.truncf %245 : vector<128x32xf32> to vector<128x32xbf16>
    %c0_76 = arith.constant 0 : index
    %c0_77 = arith.constant 0 : index
    %258 = vector.load %arg16[%c0_76, %c0_77] : memref<32x32xbf16, #tpu.memory_space<vmem>>, vector<32x32xbf16>
    %cst_78 = arith.constant dense<0.000000e+00> : vector<128x32xf32>
    %259 = tpu.matmul %257, %258, %cst_78 {dimension_numbers = #tpu.dot_dimension_numbers<[1], [0], [0], [1], [0, 0, 1, 1], [], []>} : vector<128x32xbf16>, vector<32x32xbf16>, vector<128x32xf32> -> vector<128x32xf32>
    %260 = vector.broadcast %247 : vector<1x32xf32> to vector<128x32xf32>
    %261 = arith.addf %259, %260 : vector<128x32xf32>
    %262 = arith.truncf %123 : vector<32x32xf32> to vector<32x32xbf16>
    %c0_79 = arith.constant 0 : index
    %c0_80 = arith.constant 0 : index
    %263 = vector.load %arg17[%c0_79, %c0_80] : memref<32x64xbf16, #tpu.memory_space<vmem>>, vector<32x64xbf16>
    %cst_81 = arith.constant dense<0.000000e+00> : vector<32x64xf32>
    %264 = tpu.matmul %262, %263, %cst_81 {dimension_numbers = #tpu.dot_dimension_numbers<[1], [0], [0], [1], [0, 0, 1, 1], [], []>} : vector<32x32xbf16>, vector<32x64xbf16>, vector<32x64xf32> -> vector<32x64xf32>
    %265 = vector.extract_strided_slice %264 {offsets = [0, 0], sizes = [32, 32], strides = [1, 1]} : vector<32x64xf32> to vector<32x32xf32>
    %266 = vector.broadcast %248 : vector<1x32xf32> to vector<32x32xf32>
    %267 = arith.addf %265, %266 : vector<32x32xf32>
    %268 = vector.extract_strided_slice %264 {offsets = [0, 32], sizes = [32, 32], strides = [1, 1]} : vector<32x64xf32> to vector<32x32xf32>
    %269 = vector.broadcast %249 : vector<1x32xf32> to vector<32x32xf32>
    %270 = arith.addf %268, %269 : vector<32x32xf32>
    %c0_82 = arith.constant 0 : index
    %c0_83 = arith.constant 0 : index
    %271 = vector.load %arg21[%c0_82, %c0_83] : memref<64x16xf32, #tpu.memory_space<vmem>>, vector<64x16xf32>
    %cst_84 = arith.constant dense<0xFF800000> : vector<64xf32>
    %272 = vector.multi_reduction <maximumf>, %271, %cst_84 [1] : vector<64x16xf32> to vector<64xf32>
    %273 = vector.shape_cast %272 : vector<64xf32> to vector<64x1xf32>
    %274 = vector.broadcast %273 : vector<64x1xf32> to vector<64x16xf32>
    %275 = arith.subf %271, %274 : vector<64x16xf32>
    %276 = math.exp %275 : vector<64x16xf32>
    %cst_85 = arith.constant dense<0xFF800000> : vector<32xf32>
    %277 = vector.multi_reduction <maximumf>, %267, %cst_85 [0] : vector<32x32xf32> to vector<32xf32>
    %278 = vector.shape_cast %277 : vector<32xf32> to vector<1x32xf32>
    %279 = vector.broadcast %278 : vector<1x32xf32> to vector<32x32xf32>
    %280 = arith.subf %267, %279 : vector<32x32xf32>
    %281 = math.exp %280 : vector<32x32xf32>
    %282 = arith.mulf %281, %270 : vector<32x32xf32>
    %283 = tpu.concatenate %282, %281 in 1 : vector<32x32xf32>, vector<32x32xf32> -> vector<32x64xf32>
    %284 = vector.extract_strided_slice %283 {offsets = [0, 0], sizes = [16, 64], strides = [1, 1]} : vector<32x64xf32> to vector<16x64xf32>
    %cst_86 = arith.constant dense<0.000000e+00> : vector<64x64xf32>
    %285 = tpu.matmul %276, %284, %cst_86 {dimension_numbers = #tpu.dot_dimension_numbers<[1], [0], [0], [1], [0, 0, 1, 1], [], []>} : vector<64x16xf32>, vector<16x64xf32>, vector<64x64xf32> -> vector<64x64xf32>
    %286 = vector.extract_strided_slice %283 {offsets = [16, 0], sizes = [16, 64], strides = [1, 1]} : vector<32x64xf32> to vector<16x64xf32>
    %cst_87 = arith.constant dense<0.000000e+00> : vector<64x64xf32>
    %287 = tpu.matmul %276, %286, %cst_87 {dimension_numbers = #tpu.dot_dimension_numbers<[1], [0], [0], [1], [0, 0, 1, 1], [], []>} : vector<64x16xf32>, vector<16x64xf32>, vector<64x64xf32> -> vector<64x64xf32>
    %288 = tpu.concatenate %285, %287 in 0 : vector<64x64xf32>, vector<64x64xf32> -> vector<128x64xf32>
    %289 = vector.extract_strided_slice %288 {offsets = [0, 0], sizes = [128, 32], strides = [1, 1]} : vector<128x64xf32> to vector<128x32xf32>
    %290 = vector.extract_strided_slice %288 {offsets = [0, 32], sizes = [128, 32], strides = [1, 1]} : vector<128x64xf32> to vector<128x32xf32>
    %291 = arith.negf %261 : vector<128x32xf32>
    %292 = math.exp %291 : vector<128x32xf32>
    %cst_88 = arith.constant 1.000000e+00 : f32
    %293 = vector.broadcast %cst_88 : f32 to vector<128x32xf32>
    %294 = arith.addf %293, %292 : vector<128x32xf32>
    %295 = arith.divf %293, %294 : vector<128x32xf32>
    %296 = arith.mulf %295, %289 : vector<128x32xf32>
    %cst_89 = arith.constant 9.99999996E-13 : f32
    %297 = vector.broadcast %cst_89 : f32 to vector<128x32xf32>
    %298 = arith.addf %290, %297 : vector<128x32xf32>
    %299 = tpu.reciprocal %298 {approx = true} : vector<128x32xf32> -> vector<128x32xf32>
    %300 = arith.mulf %296, %299 : vector<128x32xf32>
    %301 = arith.truncf %300 : vector<128x32xf32> to vector<128x32xbf16>
    %c0_90 = arith.constant 0 : index
    %c0_91 = arith.constant 0 : index
    %302 = vector.load %arg18[%c0_90, %c0_91] : memref<32x32xbf16, #tpu.memory_space<vmem>>, vector<32x32xbf16>
    %cst_92 = arith.constant dense<0.000000e+00> : vector<128x32xf32>
    %303 = tpu.matmul %301, %302, %cst_92 {dimension_numbers = #tpu.dot_dimension_numbers<[1], [0], [0], [1], [0, 0, 1, 1], [], []>} : vector<128x32xbf16>, vector<32x32xbf16>, vector<128x32xf32> -> vector<128x32xf32>
    %304 = vector.broadcast %250 : vector<1x32xf32> to vector<128x32xf32>
    %305 = arith.addf %303, %304 : vector<128x32xf32>
    %306 = arith.addf %245, %305 : vector<128x32xf32>
    %cst_93 = arith.constant dense<0.000000e+00> : vector<128xf32>
    %307 = vector.multi_reduction <add>, %306, %cst_93 [1] : vector<128x32xf32> to vector<128xf32>
    %308 = vector.shape_cast %307 : vector<128xf32> to vector<128x1xf32>
    %cst_94 = arith.constant 3.200000e+01 : f32
    %309 = vector.broadcast %cst_94 : f32 to vector<128x1xf32>
    %310 = arith.divf %308, %309 : vector<128x1xf32>
    %311 = vector.broadcast %310 : vector<128x1xf32> to vector<128x32xf32>
    %312 = arith.subf %306, %311 : vector<128x32xf32>
    %313 = vector.broadcast %310 : vector<128x1xf32> to vector<128x32xf32>
    %314 = arith.subf %306, %313 : vector<128x32xf32>
    %315 = arith.mulf %312, %314 : vector<128x32xf32>
    %cst_95 = arith.constant dense<0.000000e+00> : vector<128xf32>
    %316 = vector.multi_reduction <add>, %315, %cst_95 [1] : vector<128x32xf32> to vector<128xf32>
    %317 = vector.shape_cast %316 : vector<128xf32> to vector<128x1xf32>
    %cst_96 = arith.constant 3.200000e+01 : f32
    %318 = vector.broadcast %cst_96 : f32 to vector<128x1xf32>
    %319 = arith.divf %317, %318 : vector<128x1xf32>
    %320 = vector.broadcast %310 : vector<128x1xf32> to vector<128x32xf32>
    %321 = arith.subf %306, %320 : vector<128x32xf32>
    %cst_97 = arith.constant 9.99999974E-6 : f32
    %322 = vector.broadcast %cst_97 : f32 to vector<128x1xf32>
    %323 = arith.addf %319, %322 : vector<128x1xf32>
    %324 = math.rsqrt %323 : vector<128x1xf32>
    %325 = vector.broadcast %324 : vector<128x1xf32> to vector<128x32xf32>
    %326 = arith.mulf %321, %325 : vector<128x32xf32>
    %327 = vector.broadcast %253 : vector<1x32xf32> to vector<128x32xf32>
    %328 = arith.mulf %326, %327 : vector<128x32xf32>
    %329 = vector.broadcast %254 : vector<1x32xf32> to vector<128x32xf32>
    %330 = arith.addf %328, %329 : vector<128x32xf32>
    %331 = arith.truncf %330 : vector<128x32xf32> to vector<128x32xbf16>
    %c0_98 = arith.constant 0 : index
    %c0_99 = arith.constant 0 : index
    %332 = vector.load %arg19[%c0_98, %c0_99] : memref<32x64xbf16, #tpu.memory_space<vmem>>, vector<32x64xbf16>
    %cst_100 = arith.constant dense<0.000000e+00> : vector<128x64xf32>
    %333 = tpu.matmul %331, %332, %cst_100 {dimension_numbers = #tpu.dot_dimension_numbers<[1], [0], [0], [1], [0, 0, 1, 1], [], []>} : vector<128x32xbf16>, vector<32x64xbf16>, vector<128x64xf32> -> vector<128x64xf32>
    %334 = vector.broadcast %251 : vector<1x64xf32> to vector<128x64xf32>
    %335 = arith.addf %333, %334 : vector<128x64xf32>
    %cst_101 = arith.constant 0.000000e+00 : f32
    %336 = vector.broadcast %cst_101 : f32 to vector<128x64xf32>
    %337 = arith.maximumf %335, %336 : vector<128x64xf32>
    %338 = arith.truncf %337 : vector<128x64xf32> to vector<128x64xbf16>
    %c0_102 = arith.constant 0 : index
    %c0_103 = arith.constant 0 : index
    %339 = vector.load %arg20[%c0_102, %c0_103] : memref<64x32xbf16, #tpu.memory_space<vmem>>, vector<64x32xbf16>
    %cst_104 = arith.constant dense<0.000000e+00> : vector<128x32xf32>
    %340 = tpu.matmul %338, %339, %cst_104 {dimension_numbers = #tpu.dot_dimension_numbers<[1], [0], [0], [1], [0, 0, 1, 1], [], []>} : vector<128x64xbf16>, vector<64x32xbf16>, vector<128x32xf32> -> vector<128x32xf32>
    %341 = vector.broadcast %252 : vector<1x32xf32> to vector<128x32xf32>
    %342 = arith.addf %340, %341 : vector<128x32xf32>
    %343 = arith.addf %330, %342 : vector<128x32xf32>
    %cst_105 = arith.constant dense<0.000000e+00> : vector<128xf32>
    %344 = vector.multi_reduction <add>, %343, %cst_105 [1] : vector<128x32xf32> to vector<128xf32>
    %345 = vector.shape_cast %344 : vector<128xf32> to vector<128x1xf32>
    %cst_106 = arith.constant 3.200000e+01 : f32
    %346 = vector.broadcast %cst_106 : f32 to vector<128x1xf32>
    %347 = arith.divf %345, %346 : vector<128x1xf32>
    %348 = vector.broadcast %347 : vector<128x1xf32> to vector<128x32xf32>
    %349 = arith.subf %343, %348 : vector<128x32xf32>
    %350 = vector.broadcast %347 : vector<128x1xf32> to vector<128x32xf32>
    %351 = arith.subf %343, %350 : vector<128x32xf32>
    %352 = arith.mulf %349, %351 : vector<128x32xf32>
    %cst_107 = arith.constant dense<0.000000e+00> : vector<128xf32>
    %353 = vector.multi_reduction <add>, %352, %cst_107 [1] : vector<128x32xf32> to vector<128xf32>
    %354 = vector.shape_cast %353 : vector<128xf32> to vector<128x1xf32>
    %cst_108 = arith.constant 3.200000e+01 : f32
    %355 = vector.broadcast %cst_108 : f32 to vector<128x1xf32>
    %356 = arith.divf %354, %355 : vector<128x1xf32>
    %357 = vector.broadcast %347 : vector<128x1xf32> to vector<128x32xf32>
    %358 = arith.subf %343, %357 : vector<128x32xf32>
    %cst_109 = arith.constant 9.99999974E-6 : f32
    %359 = vector.broadcast %cst_109 : f32 to vector<128x1xf32>
    %360 = arith.addf %356, %359 : vector<128x1xf32>
    %361 = math.rsqrt %360 : vector<128x1xf32>
    %362 = vector.broadcast %361 : vector<128x1xf32> to vector<128x32xf32>
    %363 = arith.mulf %358, %362 : vector<128x32xf32>
    %364 = vector.broadcast %255 : vector<1x32xf32> to vector<128x32xf32>
    %365 = arith.mulf %363, %364 : vector<128x32xf32>
    %366 = vector.broadcast %256 : vector<1x32xf32> to vector<128x32xf32>
    %367 = arith.addf %365, %366 : vector<128x32xf32>
    %c0_110 = arith.constant 0 : index
    %c0_111 = arith.constant 0 : index
    %368 = vector.load %arg23[%c0_110, %c0_111] : memref<128x32xf32, #tpu.memory_space<vmem>>, vector<128x32xf32>
    tpu.vector_store %arg23[%c0_110, %c0_111], %367 {strides = array<i32>} : memref<128x32xf32, #tpu.memory_space<vmem>>, vector<128x32xf32>,
    return
  }
}

</mosaic_0001>

<bundles_post_ra>
// kernel: decoder_forward.1
= control target key start
LH: loop header
LB: loop body
LE: loop exit
PB: predicated region body
PF: predicated region fallthrough
CT: control target
= control target key end

     0   :  { %v103_v0 = vlaneseq  ;;  %vm119_vm0 = vcmask 261120   ;;  %vm262_vm1 = vcmask 130048   ;;  %vm821_vm2 = vcmask 523264   ;;  %s8786_s2 = inlined_call_operand.vmem [shape: bf16[32,32], index: 2, kind: input, shape index: {}]   ;;  %s8787_s0 = inlined_call_operand.vmem [shape: f32[32,32], index: 0, kind: input, shape index: {}]   ;;  %s8788_s3 = inlined_call_operand.vmem [shape: bf16[32,64], index: 3, kind: input, shape index: {}]   ;;  %s8789_s8 = inlined_call_operand.vmem [shape: f32[10,64], index: 8, kind: input, shape index: {}]   ;;  %s8790_s7 = inlined_call_operand.vmem [shape: f32[16,16], index: 7, kind: input, shape index: {}]   ;;  %s8791_s4 = inlined_call_operand.vmem [shape: bf16[32,32], index: 4, kind: input, shape index: {}]   ;;  %s8792_s5 = inlined_call_operand.vmem [shape: bf16[32,64], index: 5, kind: input, shape index: {}]   ;;  %s8793_s6 = inlined_call_operand.vmem [shape: bf16[64,32], index: 6, kind: input, shape index: {}]   ;;  %s8794_s10 = inlined_call_operand.vmem [shape: bf16[32,64], index: 10, kind: input, shape index: {}]   ;;  %s8795_s1 = inlined_call_operand.vmem [shape: f32[128,32], index: 1, kind: input, shape index: {}]   ;;  %s8796_s15 = inlined_call_operand.vmem [shape: f32[10,64], index: 15, kind: input, shape index: {}]   ;;  %s8797_s14 = inlined_call_operand.vmem [shape: f32[64,64], index: 14, kind: input, shape index: {}]   ;;  %s8798_s9 = inlined_call_operand.vmem [shape: bf16[32,32], index: 9, kind: input, shape index: {}]   ;;  %s8799_s11 = inlined_call_operand.vmem [shape: bf16[32,32], index: 11, kind: input, shape index: {}]   ;;  %s8800_s12 = inlined_call_operand.vmem [shape: bf16[32,64], index: 12, kind: input, shape index: {}]   ;;  %s8801_s13 = inlined_call_operand.vmem [shape: bf16[64,32], index: 13, kind: input, shape index: {}]   ;;  %s8802_s17 = inlined_call_operand.vmem [shape: bf16[32,64], index: 17, kind: input, shape index: {}]   ;;  %s8803_s22 = inlined_call_operand.vmem [shape: f32[10,64], index: 22, kind: input, shape index: {}]   ;;  %s8804_s21 = inlined_call_operand.vmem [shape: f32[64,16], index: 21, kind: input, shape index: {}]   ;;  %s8805_s16 = inlined_call_operand.vmem [shape: bf16[32,32], index: 16, kind: input, shape index: {}]   ;;  %s8806_s18 = inlined_call_operand.vmem [shape: bf16[32,32], index: 18, kind: input, shape index: {}]   ;;  %s8807_s19 = inlined_call_operand.vmem [shape: bf16[32,64], index: 19, kind: input, shape index: {}]   ;;  %s8808_s20 = inlined_call_operand.vmem [shape: bf16[64,32], index: 20, kind: input, shape index: {}]   ;;  %s8809_s23 = inlined_call_operand.vmem [shape: f32[128,32], index: 23, kind: output, shape index: {}]  }
   0x1   :  { %8830 = sst [smem:[#allocation11_spill]] %s8786_s2 }
   0x2   :  { %8831 = sst [smem:[#allocation12_spill]] %s8787_s0  ;;  %s8838_s24 = sld [smem:[#allocation11_spill]]  ;;  %v6326_v3 = vshrl.u32 %v103_v0, 7 }
   0x3   :  { %8832 = sst [smem:[#allocation13_spill]] %s8788_s3  ;;  %s8839_s3 = sld [smem:[#allocation12_spill]] }
   0x4   :  { %8833 = sst [smem:[#allocation14_spill]] %s8789_s8  ;;  %v6351_v9 = vsub.s32 2, %v6326_v3  ;;  %s8841_s30 = sld [smem:[#allocation13_spill]]  ;;  %v6389_v21 = vsub.s32 1, %v6326_v3 }
   0x5   :  { %8834 = sst [smem:[#allocation15_spill]] %s8790_s7  ;;  %s6199_s8 = smov 96  }
   0x6   :  { %8835 = sst [smem:[#allocation16_spill]] %s8791_s4  ;;  %8840 = vst [vmem:[#allocation2_spill] sm:$0xff] %v6351_v9  ;;  %s8842_s4 = sld [smem:[#allocation14_spill]]  ;;  %8844 = vst [vmem:[#allocation3_spill] sm:$0xff] %v6389_v21 }
   0x7   :  { %8836 = sst [smem:[#allocation17_spill]] %s8792_s5  ;;  %s8843_s5 = sld [smem:[#allocation15_spill]] }
   0x8   :  { %8837 = sst [smem:[#allocation18_spill]] %s8793_s6  ;;  %v5697_v1 = vld [vmem:[%s8838_s24] sm:$0xff]   ;;  %v5698_v2 = vld [vmem:[%s8838_s24 + $0x8] sm:$0xff]   ;;  %s6198_s6 = smov 32  }
   0x9   :  { %5245 = vmatprep.subr.bf16.mxu0 %v5697_v1  ;;  %v6331_v4 = vld [vmem:[%s8839_s3] sm:$0xff]  ;;  %v6336_v5 = vld [vmem:[%s8839_s3 + $0x8] sm:$0xff]  ;;  %v6341_v6 = vld [vmem:[%s8839_s3 + $0x10] sm:$0xff]  ;;  %s8847_s2 = sld [smem:[#allocation18_spill]] }
   0xa   :  { %5246 = vmatpush3.bf16.msra.mxu0 %v5697_v1  ;;  %v97_v7 = vpack.c.bf16 %v6336_v5, %v6331_v4  ;;  %v6348_v8 = vld [vmem:[%s8839_s3 + $0x18] sm:$0xff]  ;;  %v5699_v10 = vld [vmem:[%s8841_s30] sm:$0xff]   ;;  %v5700_v16 = vld [vmem:[%s8841_s30 + $0x8] sm:$0xff]   ;;  %s8845_s30 = sld [smem:[#allocation16_spill]] }
   0xb   :  { %5247 = vmatprep.subr.bf16.mxu0 %v5698_v2  ;;  %v98_v13 = vpack.c.bf16 %v6348_v8, %v6341_v6 }
   0xc   :  { %5249 = vmatprep.mubr.msk.bf16.mxu0 %vm119_vm0, %v97_v7  ;;  %v6360_v11 = vld [vmem:[%s8842_s4] sm:$0xff] }
   0xd   :  { %v6365_v12 = vld [vmem:[%s8843_s5 + $0x8] sm:$0xff]  ;;  %v251_v14 = vrot.slane %v6360_v11, %v6351_v9  ;;  %v260_v17 = vld [vmem:[%s8843_s5] sm:$0xff]  ;;  %v243_v24 = vrot.slane %v6360_v11, %v6389_v21  ;;  %s8846_s5 = sld [smem:[#allocation17_spill]] }
   0xe   :  { %v266_v15 = vsel %vm262_vm1, %v6365_v12, -inf  ;;  %5248 = vmatpush3.bf16.msra.mxu0 %v5698_v2  ;;  %v263_v18 = vsel %vm262_vm1, %v260_v17, -inf }
   0xf   :  { %267 = vmax.xlane.f32.xlu1 %v266_v15  ;;  %5253 = vmatprep.subr.bf16.mxu0 %v5699_v10 }
  0x10   :  { %253 = vrot.lane.b32.xlu0 %v251_v14, %s6198_s6 }
  0x11   :  { %5250 = vmatmul.mubr.msk.bf16.vlgmr.msra.gmra.mrb[0].mxu0 %vm119_vm0, %v98_v13 }
  0x12   :  { %5254 = vmatpush3.bf16.msra.mxu0 %v5699_v10  ;;  %5257 = vmatprep.mubr.msk.bf16.mxu0 %vm119_vm0, %v97_v7 }
  0x13   :  { %5255 = vmatprep.subr.bf16.mxu0 %v5700_v16 }
  0x16   :  { %5256 = vmatpush3.bf16.msra.mxu0 %v5700_v16 }
  0x19   :  { %5258 = vmatmul.mubr.msk.bf16.vlgmr.msra.gmra.mrb[4].mxu0 %vm119_vm0, %v98_v13 }
  0x2f   :  { %264 = vmax.xlane.f32.xlu0 %v263_v18 }
  0x82   :  { %v254_v25 = vpop.permute.xlu0 %253 }
  0x9c   :  { %v268_v13 = vpop.xlane.xlu1 %267 }
  0x9d   :  { %v270_v16 = vsub.f32 %v6365_v12, %v268_v13 }
  0x9f   :  { %v273_v18 = vmul.f32 1.442695, %v270_v16  ;;  %v5702_v16 = vld [vmem:[%s8845_s30 + $0x8] sm:$0xff]  }
  0xbc   :  { %v265_v50 = vpop.xlane.xlu0 %264 }
  0xbd   :  { %v269_v51 = vsub.f32 %v260_v17, %v265_v50 }
  0xbf   :  { %v271_v53 = vmul.f32 1.442695, %v269_v51 }
  0xc1   :  { %5733 = vpow2.f32 %v271_v53 }
  0xcb   :  { %v5734_v62 = vpop.eup %5733 }
  0xcc   :  { %5265 = vmatprep.mubr.msk.f32.mxu0 %vm262_vm1, %v5734_v62  ;;  %5272 = vmatprep.mubr.msk.f32.mxu1 %vm262_vm1, %v5734_v62 }
  0xe4   :  { %v6384_v19 = vpop.f32.mrb[0].mxu0 }
  0xe5   :  { %v6386_v20 = vpop.f32.mrb[1].mxu0 }
  0xe6   :  { %v6391_v22 = vpop.f32.mrb[2].mxu0 }
  0xe7   :  { %v6393_v23 = vpop.f32.mrb[3].mxu0 }
  0xec   :  { %v5259_v26 = vpop.f32.mrb[4].mxu0 }
  0xed   :  { %v246_v27 = vadd.f32 %v5259_v26, %v243_v24  ;;  %v258_v28 = vadd.f32 %v5259_v26, %v254_v25  ;;  %v225_v29 = vpop.f32.mrb[5].mxu0 }
  0xee   :  { %v244_v30 = vadd.f32 %v243_v24, %v225_v29  ;;  %v5260_v31 = vpop.f32.mrb[6].mxu0  ;;  %v256_v36 = vadd.f32 %v254_v25, %v225_v29 }
  0xef   :  { %v247_v32 = vadd.f32 %v5260_v31, %v243_v24  ;;  %308 = vrot.lane.b32.xlu1 %v258_v28, %s6199_s8  ;;  %v228_v33 = vpop.f32.mrb[7].mxu0  ;;  %v277_v35 = vsel %vm119_vm0, %v246_v27, -inf  ;;  %v259_v42 = vadd.f32 %v5260_v31, %v254_v25 }
  0xf0   :  { %v245_v34 = vadd.f32 %v243_v24, %v228_v33  ;;  %v275_v38 = vsel %vm119_vm0, %v244_v30, -inf  ;;  %v257_v45 = vadd.f32 %v254_v25, %v228_v33 }
  0xf1   :  { %v278_v37 = vsel %vm119_vm0, %v247_v32, -inf }
  0xf2   :  { %v280_v39 = vmax.f32 %v277_v35, %v278_v37  ;;  %v276_v40 = vsel %vm119_vm0, %v245_v34, -inf }
  0xf3   :  { %v279_v41 = vmax.f32 %v275_v38, %v276_v40  ;;  %304 = vrot.lane.b32.xlu1 %v256_v36, %s6199_s8 }
  0xf5   :  { %v281_v43 = vmax.f32 %v279_v41, %v280_v39  ;;  %v6417_v41 = vsub.s32 0, %v6326_v3 }
  0xf7   :  { %v282_v44 = vrot.slane %v281_v43, 4  ;;  %310 = vrot.lane.b32.xlu1 %v259_v42, %s6199_s8  ;;  %v106_v42 = vrot.slane %v6360_v11, %v6417_v41 }
  0xf9   :  { %v283_v46 = vmax.f32 %v281_v43, %v282_v44  ;;  %v169_v43 = vadd.f32 %v6384_v19, %v106_v42  ;;  %v172_v44 = vadd.f32 %v6391_v22, %v106_v42 }
  0xfb   :  { %v284_v47 = vrot.slane %v283_v46, 2  ;;  %306 = vrot.lane.b32.xlu1 %v257_v45, %s6199_s8  ;;  %v164_v45 = vadd.f32 %v6393_v23, %v106_v42 }
  0xfd   :  { %v285_v48 = vmax.f32 %v283_v46, %v284_v47  ;;  %v161_v46 = vadd.f32 %v6386_v20, %v106_v42  ;;  %v4887_v47 = vmul.f32 -1.442695, %v169_v43 }
  0xff   :  { %v286_v49 = vrot.slane %v285_v48, 1  ;;  %v4885_v50 = vmul.f32 -1.442695, %v161_v46 }
 0x101   :  { %v287_v52 = vmax.f32 %v285_v48, %v286_v49  ;;  %v4888_v48 = vmul.f32 -1.442695, %v172_v44  ;;  %v4886_v49 = vmul.f32 -1.442695, %v164_v45 }
 0x103   :  { %v289_v54 = vsub.f32 %v245_v34, %v287_v52  ;;  %v290_v55 = vsub.f32 %v246_v27, %v287_v52  ;;  %v291_v56 = vsub.f32 %v247_v32, %v287_v52  ;;  %v288_v57 = vsub.f32 %v244_v30, %v287_v52 }
 0x105   :  { %v294_v58 = vmul.f32 1.442695, %v289_v54  ;;  %v296_v59 = vmul.f32 1.442695, %v290_v55  ;;  %v298_v60 = vmul.f32 1.442695, %v291_v56 }
 0x106   :  { %v292_v61 = vmul.f32 1.442695, %v288_v57 }
 0x107   :  { %5735 = vpow2.f32 %v294_v58 }
 0x108   :  { %5737 = vpow2.f32 %v296_v59 }
 0x109   :  { %5739 = vpow2.f32 %v298_v60 }
 0x10a   :  { %5741 = vpow2.f32 %v292_v61 }
 0x10b   :  { %5743 = vpow2.f32 %v273_v18 }
 0x10c   :  { %5745 = vpow2.f32 %v4887_v47 }
 0x10d   :  { %5747 = vpow2.f32 %v4888_v48 }
 0x10e   :  { %5749 = vpow2.f32 %v4886_v49 }
 0x10f   :  { %5751 = vpow2.f32 %v4885_v50 }
 0x111   :  { %v5736_v63 = vpop.eup %5735 }
 0x112   :  { %v5738_v0 = vpop.eup %5737 }
 0x113   :  { %v5740_v1 = vpop.eup %5739 }
 0x114   :  { %v5742_v2 = vpop.eup %5741  ;;  %v5642_v7 = vpack.i.bf16 %v5740_v1, %v5738_v0 }
 0x115   :  { %v5637_v10 = vpack.i.bf16 %v5736_v63, %v5742_v2  ;;  %v5744_v40 = vpop.eup %5743 }
 0x116   :  { %5643 = vrot.lane.b32.xlu0 %v5642_v7, %s6198_s6  ;;  %v5746_v51 = vpop.eup %5745 }
 0x117   :  { %5638 = vrot.lane.b32.xlu1 %v5637_v10, %s6198_s6  ;;  %v5748_v52 = vpop.eup %5747  ;;  %v510_v55 = vadd.f32 1.0, %v5746_v51 }
 0x118   :  { %v5750_v53 = vpop.eup %5749  ;;  %v511_v19 = vadd.f32 1.0, %v5748_v52 }
 0x119   :  { %v5752_v54 = vpop.eup %5751  ;;  %v509_v56 = vadd.f32 1.0, %v5750_v53  ;;  %5753 = vrcp.f32 %v510_v55 }
 0x11a   :  { %v508_v22 = vadd.f32 1.0, %v5752_v54  ;;  %5755 = vrcp.f32 %v511_v19 }
 0x11b   :  { %5757 = vrcp.f32 %v509_v56 }
 0x11c   :  { %5759 = vrcp.f32 %v508_v22 }
 0x123   :  { %v5754_v20 = vpop.eup %5753 }
 0x124   :  { %v5756_v23 = vpop.eup %5755 }
 0x125   :  { %v5758_v58 = vpop.eup %5757 }
 0x126   :  { %v5760_v62 = vpop.eup %5759 }
 0x161   :  { %v309_v14 = vpop.permute.xlu1 %308 }
 0x162   :  { %v318_v26 = vmul.f32 %v5738_v0, %v309_v14  ;;  %v5701_v14 = vld [vmem:[%s8845_s30] sm:$0xff]  }
 0x165   :  { %v305_v15 = vpop.permute.xlu1 %304 }
 0x166   :  { %v316_v31 = vmul.f32 %v5742_v2, %v305_v15 }
 0x169   :  { %v311_v17 = vpop.permute.xlu1 %310 }
 0x16a   :  { %v319_v27 = vmul.f32 %v5740_v1, %v311_v17 }
 0x16d   :  { %v307_v24 = vpop.permute.xlu1 %306 }
 0x16e   :  { %v317_v32 = vmul.f32 %v5736_v63, %v307_v24 }
 0x188   :  { %v5644_v25 = vpop.permute.xlu0 %5643 }
 0x189   :  { %v5646_v28 = vunpack.i.h.bf16 %v5644_v25  ;;  %v5645_v29 = vunpack.i.l.bf16 %v5644_v25  ;;  %v5639_v30 = vpop.permute.xlu1 %5638 }
 0x18a   :  { %v5641_v33 = vunpack.i.h.bf16 %v5639_v30  ;;  %v5640_v34 = vunpack.i.l.bf16 %v5639_v30 }
 0x18b   :  { %v338_v35 = vsel %vm119_vm0, %v318_v26, %v5645_v29  ;;  %v339_v36 = vsel %vm119_vm0, %v319_v27, %v5646_v28 }
 0x18c   :  { %v336_v12 = vsel %vm119_vm0, %v316_v31, %v5640_v34  ;;  %v337_v37 = vsel %vm119_vm0, %v317_v32, %v5641_v33  ;;  %v5591_v38 = vpack.c.bf16 %v339_v36, %v338_v35  ;;  %v6438_v36 = vsub.s32 3, %v6326_v3 }
 0x18d   :  { %v5587_v39 = vpack.c.bf16 %v337_v37, %v336_v12 }
 0x18e   :  { %5592 = vmatprep.subr.bf16.mxu1 %v5591_v38  ;;  %v561_v12 = vrot.slane %v6360_v11, %v6438_v36 }
 0x18f   :  { %5588 = vmatprep.subr.bf16.mxu0 %v5587_v39  ;;  %5594 = vmatpush3.bf16.msra.mxu1 %v5591_v38 }
 0x190   :  { %5590 = vmatpush3.bf16.msra.mxu0 %v5587_v39 }
 0x191   :  { %5275 = vmatprep.subr.bf16.mxu0 %v5701_v14 }
 0x192   :  { %5273 = vmatmul.mubr.msk.f32.vlgmr.msra.gmra.mrb[0].mxu1 %vm262_vm1, %v5744_v40 }
 0x193   :  { %5266 = vmatmul.mubr.msk.f32.vlgmr.msra.gmra.mrb[8].mxu0 %vm262_vm1, %v5744_v40 }
 0x194   :  { %5276 = vmatpush3.bf16.msra.mxu0 %v5701_v14 }
 0x195   :  { %5277 = vmatprep.subr.bf16.mxu0 %v5702_v16 }
 0x198   :  { %5278 = vmatpush3.bf16.msra.mxu0 %v5702_v16 }
 0x265   :  { %v5274_v57 = vpop.f32.mrb[0].mxu1 }
 0x266   :  { %v5267_v59 = vpop.f32.mrb[8].mxu0  ;;  %v523_v60 = vmul.f32 %v5756_v23, %v5274_v57  ;;  %v487_v61 = vpop.f32.mrb[1].mxu1  ;;  %v527_v15 = vadd.f32 1e-12, %v5274_v57 }
 0x267   :  { %v521_v63 = vmul.f32 %v5758_v58, %v5267_v59  ;;  %v525_v0 = vadd.f32 1e-12, %v5267_v59  ;;  %v412_v1 = vpop.f32.mrb[9].mxu0  ;;  %v522_v2 = vmul.f32 %v5754_v20, %v487_v61  ;;  %v526_v13 = vadd.f32 1e-12, %v487_v61 }
 0x268   :  { %v520_v7 = vmul.f32 %v5760_v62, %v412_v1  ;;  %v524_v10 = vadd.f32 1e-12, %v412_v1 }
 0x269   :  { %5761 = vrcp.f32 %v525_v0 }
 0x26a   :  { %5763 = vrcp.f32 %v524_v10  ;;  %v5705_v10 = vld [vmem:[%s8847_s2] sm:$0xff]  }
 0x26b   :  { %5765 = vrcp.f32 %v526_v13  ;;  %v5706_v13 = vld [vmem:[%s8847_s2 + $0x8] sm:$0xff]   ;;  %5291 = vmatprep.subr.bf16.mxu0 %v5705_v10 }
 0x26c   :  { %5767 = vrcp.f32 %v527_v15 }
 0x273   :  { %v5762_v17 = vpop.eup %5761 }
 0x274   :  { %538 = vrot.lane.b32.xlu1 %v5762_v17, %s6199_s8  ;;  %v5764_v18 = vpop.eup %5763 }
 0x275   :  { %v5766_v24 = vpop.eup %5765 }
 0x276   :  { %v5768_v25 = vpop.eup %5767 }
 0x278   :  { %536 = vrot.lane.b32.xlu1 %v5764_v18, %s6199_s8 }
 0x27c   :  { %540 = vrot.lane.b32.xlu1 %v5766_v24, %s6199_s8 }
 0x280   :  { %542 = vrot.lane.b32.xlu1 %v5768_v25, %s6199_s8 }
 0x2e6   :  { %v539_v26 = vpop.permute.xlu1 %538 }
 0x2e7   :  { %v549_v28 = vmul.f32 %v539_v26, %v521_v63 }
 0x2ea   :  { %v537_v27 = vpop.permute.xlu1 %536 }
 0x2eb   :  { %v548_v29 = vmul.f32 %v537_v27, %v520_v7  ;;  %v5704_v7 = vld [vmem:[%s8846_s5 + $0x8] sm:$0xff]  }
 0x2ed   :  { %v552_v30 = vpack.c.bf16 %v549_v28, %v548_v29 }
 0x2ee   :  { %v541_v31 = vpop.permute.xlu1 %540 }
 0x2ef   :  { %5279 = vmatprep.mubr.msk.bf16.mxu0 %vm119_vm0, %v552_v30  ;;  %v550_v33 = vmul.f32 %v541_v31, %v522_v2  ;;  %v5703_v2 = vld [vmem:[%s8846_s5] sm:$0xff]   ;;  %v6467_v31 = vsub.s32 6, %v6326_v3 }
 0x2f0   :  { %5283 = vmatprep.subr.bf16.mxu1 %v5703_v2 }
 0x2f1   :  { %5284 = vmatpush3.bf16.msra.mxu1 %v5703_v2  ;;  %8848 = vst [vmem:[#allocation4_spill] sm:$0xff] %v6467_v31  ;;  %v6559_v2 = vld [vmem:[%s8797_s14 + $0x38] sm:$0xff] }
 0x2f2   :  { %v543_v32 = vpop.permute.xlu1 %542  ;;  %5285 = vmatprep.subr.bf16.mxu1 %v5704_v7 }
 0x2f3   :  { %v551_v34 = vmul.f32 %v543_v32, %v523_v60  ;;  %v689_v32 = vrot.slane %v6360_v11, %v6467_v31 }
 0x2f5   :  { %v553_v35 = vpack.c.bf16 %v551_v34, %v550_v33  ;;  %5286 = vmatpush3.bf16.msra.mxu1 %v5704_v7  ;;  %v6472_v33 = vsub.s32 7, %v6326_v3  ;;  %v1286_v7 = vsel %vm821_vm2, %v6559_v2, -inf }
 0x2f7   :  { %5280 = vmatmul.mubr.msk.bf16.vlgmr.msra.gmra.mrb[12].mxu0 %vm119_vm0, %v553_v35  ;;  %8849 = vst [vmem:[#allocation5_spill] sm:$0xff] %v6472_v33 }
 0x2f8   :  { %5292 = vmatpush3.bf16.msra.mxu0 %v5705_v10  ;;  %v6566_v10 = vld [vmem:[%s8797_s14 + $0x30] sm:$0xff] }
 0x2f9   :  { %5293 = vmatprep.subr.bf16.mxu0 %v5706_v13 }
 0x2fc   :  { %5294 = vmatpush3.bf16.msra.mxu0 %v5706_v13  ;;  %v1283_v13 = vsel %vm821_vm2, %v6566_v10, -inf }
 0x3ca   :  { %v5281_v37 = vpop.f32.mrb[12].mxu0 }
 0x3cb   :  { %v614_v38 = vpop.f32.mrb[13].mxu0  ;;  %v623_v44 = vadd.f32 %v5281_v37, %v561_v12 }
 0x3cc   :  { %v615_v39 = vadd.f32 %v614_v38, %v561_v12  ;;  %v5282_v40 = vpop.f32.mrb[14].mxu0 }
 0x3cd   :  { %v626_v42 = vadd.f32 %v5282_v40, %v561_v12  ;;  %v617_v43 = vpop.f32.mrb[15].mxu0  ;;  %v631_v51 = vadd.f32 %v623_v44, %v6341_v6 }
 0x3ce   :  { %v618_v45 = vadd.f32 %v617_v43, %v561_v12  ;;  %v629_v46 = vadd.f32 %v615_v39, %v6331_v4  ;;  %v697_v39 = vrot.slane %v6360_v11, %v6472_v33 }
 0x3cf   :  { %v632_v49 = vadd.f32 %v626_v42, %v6348_v8  ;;  %v639_v53 = vsel %vm119_vm0, %v631_v51, 0.0 }
 0x3d0   :  { %v633_v47 = vsel %vm119_vm0, %v629_v46, 0.0  ;;  %v630_v48 = vadd.f32 %v618_v45, %v6336_v5 }
 0x3d1   :  { %634 = vadd.xlane.f32.xlu1 %v633_v47  ;;  %v642_v52 = vsel %vm119_vm0, %v632_v49, 0.0 }
 0x3d2   :  { %v636_v50 = vsel %vm119_vm0, %v630_v48, 0.0 }
 0x3d3   :  { %637 = vadd.xlane.f32.xlu0 %v636_v50 }
 0x3d5   :  { %643 = vadd.xlane.f32.xlu1 %v642_v52 }
 0x3d7   :  { %640 = vadd.xlane.f32.xlu0 %v639_v53 }
 0x45e   :  { %v635_v54 = vpop.xlane.xlu1 %634 }
 0x45f   :  { %v646_v4 = vmul.f32 0.03125, %v635_v54  ;;  %v5707_v54 = vld [vmem:[%s8847_s2 + $0x10] sm:$0xff]  }
 0x460   :  { %v638_v55 = vpop.xlane.xlu0 %637  ;;  %5295 = vmatprep.subr.bf16.mxu0 %v5707_v54 }
 0x461   :  { %v650_v19 = vsub.f32 %v629_v46, %v646_v4  ;;  %v647_v56 = vmul.f32 0.03125, %v638_v55  ;;  %5296 = vmatpush3.bf16.msra.mxu0 %v5707_v54  ;;  %v5708_v4 = vld [vmem:[%s8847_s2 + $0x18] sm:$0xff]   ;;  %v5709_v55 = vld [vmem:[%s8794_s10] sm:$0xff]   ;;  %v89_v54 = vld [vmem:[%s8795_s1 + $0x50] sm:$0xff] }
 0x462   :  { %v644_v5 = vpop.xlane.xlu1 %643  ;;  %5297 = vmatprep.subr.bf16.mxu0 %v5708_v4 }
 0x463   :  { %v651_v22 = vsub.f32 %v630_v48, %v647_v56  ;;  %v649_v8 = vmul.f32 0.03125, %v644_v5  ;;  %v654_v20 = vmul.f32 %v650_v19, %v650_v19  ;;  %v80_v56 = vld [vmem:[%s8795_s1 + $0x8] sm:$0xff] }
 0x464   :  { %v641_v23 = vpop.xlane.xlu0 %640 }
 0x465   :  { %v653_v57 = vsub.f32 %v632_v49, %v649_v8  ;;  %v648_v58 = vmul.f32 0.03125, %v641_v23  ;;  %v658_v6 = vsel %vm119_vm0, %v654_v20, 0.0  ;;  %v655_v59 = vmul.f32 %v651_v22, %v651_v22  ;;  %5298 = vmatpush3.bf16.msra.mxu0 %v5708_v4  ;;  %v6516_v20 = vld [vmem:[%s8797_s14] sm:$0xff]  ;;  %v6521_v23 = vld [vmem:[%s8797_s14 + $0x8] sm:$0xff]  ;;  %v90_v4 = vld [vmem:[%s8795_s1 + $0x58] sm:$0xff] }
 0x466   :  { %659 = vadd.xlane.f32.xlu0 %v658_v6  ;;  %5323 = vmatprep.subr.bf16.mxu0 %v5709_v55  ;;  %v6531_v6 = vld [vmem:[%s8797_s14 + $0x10] sm:$0xff] }
 0x467   :  { %v652_v60 = vsub.f32 %v631_v51, %v648_v58  ;;  %v661_v61 = vsel %vm119_vm0, %v655_v59, 0.0  ;;  %v657_v62 = vmul.f32 %v653_v57, %v653_v57  ;;  %v1268_v58 = vsel %vm821_vm2, %v6521_v23, -inf }
 0x468   :  { %662 = vadd.xlane.f32.xlu1 %v661_v61  ;;  %v1271_v59 = vsel %vm821_vm2, %v6531_v6, -inf }
 0x469   :  { %v656_v63 = vmul.f32 %v652_v60, %v652_v60  ;;  %v667_v1 = vsel %vm119_vm0, %v657_v62, 0.0  ;;  %v6545_v62 = vld [vmem:[%s8797_s14 + $0x20] sm:$0xff] }
 0x46b   :  { %v664_v0 = vsel %vm119_vm0, %v656_v63, 0.0  ;;  %v1277_v63 = vsel %vm821_vm2, %v6545_v62, -inf }
 0x46c   :  { %665 = vadd.xlane.f32.xlu0 %v664_v0  ;;  %668 = vadd.xlane.f32.xlu1 %v667_v1  ;;  %v6552_v0 = vld [vmem:[%s8797_s14 + $0x28] sm:$0xff] }
 0x46d   :  { %v1280_v1 = vsel %vm821_vm2, %v6552_v0, -inf }
 0x4f3   :  { %v660_v14 = vpop.xlane.xlu0 %659 }
 0x4f4   :  { %v670_v15 = vmul.f32 0.03125, %v660_v14  ;;  %v6571_v14 = vsub.s32 4, %v6326_v3 }
 0x4f5   :  { %v663_v16 = vpop.xlane.xlu1 %662 }
 0x4f6   :  { %v674_v17 = vadd.f32 1e-05, %v670_v15  ;;  %v671_v18 = vmul.f32 0.03125, %v663_v16  ;;  %8853 = vst [vmem:[#allocation9_spill] sm:$0xff] %v6571_v14  ;;  %v711_v15 = vrot.slane %v6360_v11, %v6571_v14  ;;  %v81_v11 = vld [vmem:[%s8795_s1 + $0x10] sm:$0xff] }
 0x4f8   :  { %5769 = vrsqrt.f32 %v674_v17  ;;  %v675_v24 = vadd.f32 1e-05, %v671_v18 }
 0x4f9   :  { %v666_v25 = vpop.xlane.xlu0 %665  ;;  %v669_v26 = vpop.xlane.xlu1 %668 }
 0x4fa   :  { %5771 = vrsqrt.f32 %v675_v24  ;;  %v672_v27 = vmul.f32 0.03125, %v666_v25  ;;  %v673_v28 = vmul.f32 0.03125, %v669_v26 }
 0x4fc   :  { %v676_v29 = vadd.f32 1e-05, %v672_v27  ;;  %v677_v30 = vadd.f32 1e-05, %v673_v28 }
 0x4fe   :  { %5773 = vrsqrt.f32 %v676_v29 }
 0x4ff   :  { %5775 = vrsqrt.f32 %v677_v30 }
 0x502   :  { %v5770_v34 = vpop.eup %5769 }
 0x503   :  { %v682_v35 = vmul.f32 %v5770_v34, %v650_v19  ;;  %v79_v19 = vld [vmem:[%s8795_s1] sm:$0xff] }
 0x504   :  { %v5772_v12 = vpop.eup %5771  ;;  %v951_v5 = vpack.c.bf16 %v80_v56, %v79_v19  ;;  %v92_v19 = vld [vmem:[%s8795_s1 + $0x68] sm:$0xff]  ;;  %v6633_v56 = vpack.c.bf16 %v90_v4, %v89_v54 }
 0x505   :  { %v683_v37 = vmul.f32 %v5772_v12, %v651_v22  ;;  %v690_v38 = vmul.f32 %v689_v32, %v682_v35  ;;  %v6509_v22 = vld [vmem:[%s8796_s15] sm:$0xff] }
 0x506   :  { %v1236_v8 = vrot.slane %v6509_v22, %v6351_v9 }
 0x507   :  { %v691_v40 = vmul.f32 %v689_v32, %v683_v37  ;;  %v6476_v45 = vadd.f32 %v697_v39, %v690_v38  ;;  %v5710_v37 = vld [vmem:[%s8794_s10 + $0x8] sm:$0xff]   ;;  %v82_v38 = vld [vmem:[%s8795_s1 + $0x18] sm:$0xff] }
 0x508   :  { %v5774_v42 = vpop.eup %5773  ;;  %1238 = vrot.lane.b32.xlu0 %v1236_v8, %s6198_s6  ;;  %v93_v8 = vld [vmem:[%s8795_s1 + $0x70] sm:$0xff] }
 0x509   :  { %v5776_v43 = vpop.eup %5775  ;;  %v684_v44 = vmul.f32 %v5774_v42, %v652_v60  ;;  %v6478_v46 = vadd.f32 %v697_v39, %v691_v40  ;;  %v6538_v60 = vld [vmem:[%s8797_s14 + $0x18] sm:$0xff]  ;;  %v84_v40 = vld [vmem:[%s8795_s1 + $0x28] sm:$0xff]  ;;  %v6593_v42 = vpack.c.bf16 %v82_v38, %v81_v11 }
 0x50a   :  { %v685_v47 = vmul.f32 %v5776_v43, %v653_v57  ;;  %v1265_v57 = vsel %vm821_vm2, %v6516_v20, -inf  ;;  %v1274_v61 = vsel %vm821_vm2, %v6538_v60, -inf }
 0x50b   :  { %8850 = vst [vmem:[#allocation6_spill] sm:$0xff] %v6478_v46  ;;  %v692_v48 = vmul.f32 %v689_v32, %v684_v44  ;;  %v702_v49 = vpack.c.bf16 %v6478_v46, %v6476_v45  ;;  %1266 = vmax.xlane.f32.xlu1 %v1265_v57  ;;  %v85_v44 = vld [vmem:[%s8795_s1 + $0x30] sm:$0xff]  ;;  %v94_v57 = vld [vmem:[%s8795_s1 + $0x78] sm:$0xff] }
 0x50c   :  { %v693_v50 = vmul.f32 %v689_v32, %v685_v47  ;;  %v86_v47 = vld [vmem:[%s8795_s1 + $0x38] sm:$0xff] }
 0x50d   :  { %5287 = vmatprep.mubr.msk.bf16.mxu1 %vm119_vm0, %v702_v49  ;;  %v6483_v51 = vadd.f32 %v697_v39, %v692_v48  ;;  %v87_v48 = vld [vmem:[%s8795_s1 + $0x40] sm:$0xff]  ;;  %v88_v49 = vld [vmem:[%s8795_s1 + $0x48] sm:$0xff] }
 0x50e   :  { %v6485_v52 = vadd.f32 %v697_v39, %v693_v50  ;;  %v83_v39 = vld [vmem:[%s8795_s1 + $0x20] sm:$0xff]  ;;  %v6613_v50 = vpack.c.bf16 %v86_v47, %v85_v44 }
 0x50f   :  { %8851 = vst [vmem:[#allocation7_spill] sm:$0xff] %v6483_v51  ;;  %1269 = vmax.xlane.f32.xlu1 %v1268_v58  ;;  %v6595_v43 = vpack.c.bf16 %v84_v40, %v83_v39  ;;  %v6647_v58 = vpack.c.bf16 %v94_v57, %v93_v8 }
 0x510   :  { %8852 = vst [vmem:[#allocation8_spill] sm:$0xff] %v6485_v52  ;;  %v703_v53 = vpack.c.bf16 %v6485_v52, %v6483_v51 }
 0x512   :  { %5288 = vmatmul.mubr.msk.bf16.vlgmr.msra.gmra.mrb[4].mxu1 %vm119_vm0, %v703_v53  ;;  %v6615_v53 = vpack.c.bf16 %v88_v49, %v87_v48 }
 0x513   :  { %5307 = vmatprep.mubr.msk.bf16.mxu1 %vm119_vm0, %v951_v5  ;;  %1272 = vmax.xlane.f32.xlu1 %v1271_v59 }
 0x517   :  { %1275 = vmax.xlane.f32.xlu1 %v1274_v61 }
 0x51b   :  { %1278 = vmax.xlane.f32.xlu1 %v1277_v63 }
 0x51f   :  { %1281 = vmax.xlane.f32.xlu1 %v1280_v1 }
 0x523   :  { %1287 = vmax.xlane.f32.xlu1 %v1286_v7 }
 0x527   :  { %1284 = vmax.xlane.f32.xlu0 %v1283_v13 }
 0x598   :  { %v1267_v59 = vpop.xlane.xlu1 %1266 }
 0x599   :  { %v1289_v61 = vsub.f32 %v6516_v20, %v1267_v59 }
 0x59b   :  { %v1297_v63 = vmul.f32 1.442695, %v1289_v61 }
 0x59d   :  { %5777 = vpow2.f32 %v1297_v63 }
 0x5a7   :  { %v6652_v1 = vpop.eup %5777 }
 0x5e5   :  { %v5289_v16 = vpop.f32.mrb[4].mxu1 }
 0x5e6   :  { %v773_v17 = vadd.f32 %v5289_v16, %v711_v15  ;;  %v764_v18 = vpop.f32.mrb[5].mxu1 }
 0x5e7   :  { %v765_v24 = vadd.f32 %v764_v18, %v711_v15  ;;  %v5290_v25 = vpop.f32.mrb[6].mxu1 }
 0x5e8   :  { %v776_v26 = vadd.f32 %v5290_v25, %v711_v15  ;;  %v767_v27 = vpop.f32.mrb[7].mxu1  ;;  %v781_v29 = vmax.f32 %v773_v17, 0.0  ;;  %v6664_v17 = vpop.permute.xlu0 %1238  ;;  %v5711_v25 = vld [vmem:[%s8798_s9] sm:$0xff]  }
 0x5e9   :  { %v768_v28 = vadd.f32 %v767_v27, %v711_v15  ;;  %v779_v32 = vmax.f32 %v765_v24, 0.0  ;;  %v6672_v27 = vrot.slane %v6509_v22, %v6389_v21  ;;  %5303 = vmatprep.subr.bf16.mxu1 %v5711_v25 }
 0x5ea   :  { %v782_v30 = vmax.f32 %v776_v26, 0.0  ;;  %5304 = vmatpush3.bf16.msra.mxu1 %v5711_v25 }
 0x5eb   :  { %v780_v34 = vmax.f32 %v768_v28, 0.0 }
 0x5ec   :  { %v784_v35 = vpack.c.bf16 %v782_v30, %v781_v29 }
 0x5ed   :  { %v783_v12 = vpack.c.bf16 %v780_v34, %v779_v32  ;;  %v5712_v32 = vld [vmem:[%s8798_s9 + $0x8] sm:$0xff]  }
 0x5ee   :  { %5305 = vmatprep.subr.bf16.mxu1 %v5712_v32 }
 0x5ef   :  { %5299 = vmatprep.mubr.msk.bf16.mxu0 %vm821_vm2, %v783_v12  ;;  %5306 = vmatpush3.bf16.msra.mxu1 %v5712_v32 }
 0x5f0   :  { %5300 = vmatmul.mubr.msk.bf16.vlgmr.msra.gmra.mrb[16].mxu0 %vm821_vm2, %v784_v35 }
 0x5f1   :  { %5324 = vmatpush3.bf16.msra.mxu0 %v5709_v55  ;;  %5327 = vmatprep.mubr.msk.bf16.mxu0 %vm119_vm0, %v951_v5  ;;  %v91_v55 = vld [vmem:[%s8795_s1 + $0x60] sm:$0xff] }
 0x5f2   :  { %5325 = vmatprep.subr.bf16.mxu0 %v5710_v37  ;;  %v6635_v5 = vpack.c.bf16 %v92_v19, %v91_v55  ;;  %5308 = vmatmul.mubr.msk.bf16.vlgmr.msra.gmra.mrb[8].mxu1 %vm119_vm0, %v6593_v42 }
 0x5f3   :  { %5311 = vmatprep.mubr.msk.bf16.mxu1 %vm119_vm0, %v6595_v43 }
 0x5f5   :  { %5326 = vmatpush3.bf16.msra.mxu0 %v5710_v37 }
 0x5f8   :  { %5328 = vmatmul.mubr.msk.bf16.vlgmr.msra.gmra.mrb[20].mxu0 %vm119_vm0, %v6593_v42 }
 0x5f9   :  { %5331 = vmatprep.mubr.msk.bf16.mxu0 %vm119_vm0, %v6595_v43 }
 0x5fa   :  { %5312 = vmatmul.mubr.msk.bf16.gmra.mrb[12].mxu1 %vm119_vm0, %v6613_v50 }
 0x5fb   :  { %5315 = vmatprep.mubr.msk.bf16.mxu1 %vm119_vm0, %v6615_v53 }
 0x600   :  { %5332 = vmatmul.mubr.msk.bf16.gmra.mrb[24].mxu0 %vm119_vm0, %v6613_v50 }
 0x601   :  { %5335 = vmatprep.mubr.msk.bf16.mxu0 %vm119_vm0, %v6615_v53 }
 0x602   :  { %5316 = vmatmul.mubr.msk.bf16.gmra.mrb[16].mxu1 %vm119_vm0, %v6633_v56 }
 0x603   :  { %5319 = vmatprep.mubr.msk.bf16.mxu1 %vm119_vm0, %v6635_v5 }
 0x608   :  { %5336 = vmatmul.mubr.msk.bf16.gmra.mrb[28].mxu0 %vm119_vm0, %v6633_v56 }
 0x609   :  { %5339 = vmatprep.mubr.msk.bf16.mxu0 %vm119_vm0, %v6635_v5 }
 0x60a   :  { %5320 = vmatmul.mubr.msk.bf16.gmra.mrb[20].mxu1 %vm119_vm0, %v6647_v58 }
 0x60b   :  { %5359 = vmatprep.mubr.msk.f32.mxu1 %vm821_vm2, %v6652_v1 }
 0x610   :  { %5340 = vmatmul.mubr.msk.bf16.gmra.mrb[32].mxu0 %vm119_vm0, %v6647_v58 }
 0x611   :  { %5387 = vmatprep.mubr.msk.f32.mxu0 %vm821_vm2, %v6652_v1 }
 0x6c3   :  { %v6656_v7 = vpop.f32.mrb[16].mxu0 }
 0x6c4   :  { %v6658_v13 = vpop.f32.mrb[17].mxu0 }
 0x6c5   :  { %v6660_v15 = vpop.f32.mrb[18].mxu0 }
 0x6c6   :  { %8854 = vst [vmem:[#allocation10_spill] sm:$0xff] %v6660_v15  ;;  %v6662_v16 = vpop.f32.mrb[19].mxu0 }
 0x6cb   :  { %v5329_v18 = vpop.f32.mrb[20].mxu0 }
 0x6cc   :  { %v1243_v20 = vadd.f32 %v5329_v18, %v6664_v17  ;;  %v1150_v24 = vpop.f32.mrb[21].mxu0  ;;  %v6682_v34 = vadd.f32 %v5329_v18, %v6672_v27 }
 0x6cd   :  { %v5330_v26 = vpop.f32.mrb[22].mxu0  ;;  %v1241_v30 = vadd.f32 %v6664_v17, %v1150_v24  ;;  %v6687_v12 = vadd.f32 %v6672_v27, %v1150_v24 }
 0x6ce   :  { %v1244_v28 = vadd.f32 %v5330_v26, %v6664_v17  ;;  %1418 = vrot.lane.b32.xlu0 %v1243_v20, %s6199_s8  ;;  %v1153_v29 = vpop.f32.mrb[23].mxu0  ;;  %v6690_v11 = vadd.f32 %v5330_v26, %v6672_v27  ;;  %v1315_v49 = vsel %vm119_vm0, %v6682_v34, -inf }
 0x6cf   :  { %v1242_v35 = vadd.f32 %v6664_v17, %v1153_v29  ;;  %v6697_v40 = vadd.f32 %v6672_v27, %v1153_v29  ;;  %v1313_v8 = vsel %vm119_vm0, %v6687_v12, -inf }
 0x6d0   :  { %1420 = vrot.lane.b32.xlu1 %v1244_v28, %s6199_s8  ;;  %v1316_v63 = vsel %vm119_vm0, %v6690_v11, -inf }
 0x6d1   :  { %v1314_v24 = vsel %vm119_vm0, %v6697_v40, -inf }
 0x6d2   :  { %1414 = vrot.lane.b32.xlu0 %v1241_v30, %s6199_s8 }
 0x6d3   :  { %v5333_v37 = vpop.f32.mrb[24].mxu0 }
 0x6d4   :  { %v6693_v38 = vadd.f32 %v5333_v37, %v6672_v27  ;;  %1416 = vrot.lane.b32.xlu1 %v1242_v35, %s6199_s8  ;;  %v1166_v39 = vpop.f32.mrb[25].mxu0  ;;  %v1247_v54 = vadd.f32 %v5333_v37, %v6664_v17 }
 0x6d5   :  { %v6700_v44 = vadd.f32 %v6672_v27, %v1166_v39  ;;  %v1245_v47 = vadd.f32 %v6664_v17, %v1166_v39  ;;  %v5334_v48 = vpop.f32.mrb[26].mxu0 }
 0x6d6   :  { %v1321_v4 = vsel %vm119_vm0, %v6693_v38, -inf  ;;  %v6709_v55 = vadd.f32 %v5334_v48, %v6672_v27  ;;  %v1169_v19 = vpop.f32.mrb[27].mxu0  ;;  %v1248_v25 = vadd.f32 %v5334_v48, %v6664_v17 }
 0x6d7   :  { %v1322_v57 = vmax.f32 %v1315_v49, %v1321_v4  ;;  %v1317_v59 = vsel %vm119_vm0, %v6700_v44, -inf  ;;  %v6716_v61 = vadd.f32 %v6672_v27, %v1169_v19  ;;  %1422 = vrot.lane.b32.xlu0 %v1245_v47, %s6199_s8  ;;  %v1246_v43 = vadd.f32 %v6664_v17, %v1169_v19 }
 0x6d8   :  { %v1318_v18 = vmax.f32 %v1313_v8, %v1317_v59  ;;  %v1323_v20 = vsel %vm119_vm0, %v6709_v55, -inf  ;;  %1426 = vrot.lane.b32.xlu1 %v1247_v54, %s6199_s8 }
 0x6d9   :  { %v1324_v26 = vmax.f32 %v1316_v63, %v1323_v20  ;;  %v1319_v42 = vsel %vm119_vm0, %v6716_v61, -inf }
 0x6da   :  { %v1320_v28 = vmax.f32 %v1314_v24, %v1319_v42 }
 0x6db   :  { %1428 = vrot.lane.b32.xlu0 %v1248_v25, %s6199_s8  ;;  %v5337_v29 = vpop.f32.mrb[28].mxu0 }
 0x6dc   :  { %v6735_v30 = vadd.f32 %v5337_v29, %v6672_v27  ;;  %v1251_v32 = vadd.f32 %v5337_v29, %v6664_v17  ;;  %v1182_v35 = vpop.f32.mrb[29].mxu0 }
 0x6dd   :  { %v6740_v37 = vadd.f32 %v6672_v27, %v1182_v35  ;;  %v6742_v39 = vpop.f32.mrb[30].mxu0 }
 0x6de   :  { %v1329_v47 = vsel %vm119_vm0, %v6735_v30, -inf  ;;  %v6748_v48 = vadd.f32 %v6742_v39, %v6672_v27  ;;  %1434 = vrot.lane.b32.xlu1 %v1251_v32, %s6199_s8  ;;  %v1185_v49 = vpop.f32.mrb[31].mxu0 }
 0x6df   :  { %v1330_v54 = vmax.f32 %v1322_v57, %v1329_v47  ;;  %v1325_v4 = vsel %vm119_vm0, %v6740_v37, -inf  ;;  %v6754_v19 = vadd.f32 %v6672_v27, %v1185_v49  ;;  %v1250_v8 = vadd.f32 %v6664_v17, %v1185_v49  ;;  %1424 = vrot.lane.b32.xlu0 %v1246_v43, %s6199_s8 }
 0x6e0   :  { %v1326_v59 = vmax.f32 %v1318_v18, %v1325_v4  ;;  %v1331_v63 = vsel %vm119_vm0, %v6748_v48, -inf  ;;  %v1249_v57 = vadd.f32 %v6664_v17, %v1182_v35 }
 0x6e1   :  { %v1332_v20 = vmax.f32 %v1324_v26, %v1331_v63  ;;  %v1327_v24 = vsel %vm119_vm0, %v6754_v19, -inf }
 0x6e2   :  { %v1328_v25 = vmax.f32 %v1320_v28, %v1327_v24  ;;  %1432 = vrot.lane.b32.xlu1 %v1250_v8, %s6199_s8 }
 0x6e3   :  { %1430 = vrot.lane.b32.xlu0 %v1249_v57, %s6199_s8  ;;  %v6769_v42 = vpop.f32.mrb[32].mxu0 }
 0x6e4   :  { %v6773_v50 = vadd.f32 %v6769_v42, %v6672_v27  ;;  %v6775_v18 = vpop.f32.mrb[33].mxu0 }
 0x6e5   :  { %v6779_v53 = vadd.f32 %v6672_v27, %v6775_v18  ;;  %v6781_v26 = vpop.f32.mrb[34].mxu0 }
 0x6e6   :  { %v1337_v28 = vsel %vm119_vm0, %v6773_v50, -inf  ;;  %v6787_v29 = vadd.f32 %v6781_v26, %v6672_v27  ;;  %v6789_v32 = vpop.f32.mrb[35].mxu0 }
 0x6e7   :  { %v1338_v35 = vmax.f32 %v1330_v54, %v1337_v28  ;;  %v1333_v43 = vsel %vm119_vm0, %v6779_v53, -inf  ;;  %v6795_v47 = vadd.f32 %v6672_v27, %v6789_v32 }
 0x6e8   :  { %v1334_v49 = vmax.f32 %v1326_v59, %v1333_v43  ;;  %v1339_v4 = vsel %vm119_vm0, %v6787_v29, -inf }
 0x6e9   :  { %v1340_v8 = vmax.f32 %v1332_v20, %v1339_v4  ;;  %v1335_v54 = vsel %vm119_vm0, %v6795_v47, -inf }
 0x6ea   :  { %v1336_v63 = vmax.f32 %v1328_v25, %v1335_v54 }
 0x6eb   :  { %v1342_v57 = vmax.f32 %v1338_v35, %v1340_v8 }
 0x6ec   :  { %v1341_v24 = vmax.f32 %v1334_v49, %v1336_v63 }
 0x6ee   :  { %v1343_v28 = vmax.f32 %v1341_v24, %v1342_v57 }
 0x6f0   :  { %v1344_v27 = vrot.slane %v1343_v28, 4 }
 0x6f2   :  { %v1345_v56 = vmax.f32 %v1343_v28, %v1344_v27 }
 0x6f4   :  { %v1346_v59 = vrot.slane %v1345_v56, 2 }
 0x6f6   :  { %v1347_v43 = vmax.f32 %v1345_v56, %v1346_v59 }
 0x6f8   :  { %v1348_v21 = vrot.slane %v1347_v43, 1 }
 0x6fa   :  { %v6809_v5 = vmax.f32 %v1347_v43, %v1348_v21 }
 0x6fc   :  { %v1363_v20 = vsub.f32 %v6795_v47, %v6809_v5  ;;  %v1356_v25 = vsub.f32 %v6693_v38, %v6809_v5  ;;  %v1357_v35 = vsub.f32 %v6709_v55, %v6809_v5  ;;  %v1350_v58 = vsub.f32 %v6687_v12, %v6809_v5 }
 0x6fd   :  { %v1351_v1 = vsub.f32 %v6697_v40, %v6809_v5  ;;  %v1352_v49 = vsub.f32 %v6682_v34, %v6809_v5  ;;  %v1353_v21 = vsub.f32 %v6690_v11, %v6809_v5  ;;  %v1360_v47 = vsub.f32 %v6735_v30, %v6809_v5 }
 0x6fe   :  { %v1378_v4 = vmul.f32 1.442695, %v1356_v25  ;;  %v1380_v38 = vmul.f32 1.442695, %v1357_v35  ;;  %v1361_v55 = vsub.f32 %v6748_v48, %v6809_v5  ;;  %v1366_v8 = vmul.f32 1.442695, %v1350_v58 }
 0x6ff   :  { %v1354_v12 = vsub.f32 %v6700_v44, %v6809_v5  ;;  %v1368_v54 = vmul.f32 1.442695, %v1351_v1  ;;  %v1370_v40 = vmul.f32 1.442695, %v1352_v49  ;;  %v1372_v63 = vmul.f32 1.442695, %v1353_v21 }
 0x700   :  { %5779 = vpow2.f32 %v1378_v4  ;;  %v1355_v34 = vsub.f32 %v6716_v61, %v6809_v5  ;;  %v1364_v11 = vsub.f32 %v6773_v50, %v6809_v5  ;;  %v1365_v30 = vsub.f32 %v6787_v29, %v6809_v5 }
 0x701   :  { %5781 = vpow2.f32 %v1380_v38  ;;  %v1358_v48 = vsub.f32 %v6740_v37, %v6809_v5  ;;  %v1359_v44 = vsub.f32 %v6754_v19, %v6809_v5  ;;  %v1386_v57 = vmul.f32 1.442695, %v1360_v47 }
 0x702   :  { %5783 = vpow2.f32 %v1366_v8  ;;  %v1362_v24 = vsub.f32 %v6779_v53, %v6809_v5  ;;  %v1388_v61 = vmul.f32 1.442695, %v1361_v55  ;;  %v1374_v28 = vmul.f32 1.442695, %v1354_v12 }
 0x703   :  { %5785 = vpow2.f32 %v1368_v54  ;;  %v1376_v50 = vmul.f32 1.442695, %v1355_v34  ;;  %v1382_v29 = vmul.f32 1.442695, %v1358_v48  ;;  %v1384_v37 = vmul.f32 1.442695, %v1359_v44 }
 0x704   :  { %5787 = vpow2.f32 %v1370_v40  ;;  %v1394_v19 = vmul.f32 1.442695, %v1364_v11  ;;  %v1396_v59 = vmul.f32 1.442695, %v1365_v30  ;;  %v1254_v49 = vadd.f32 %v6664_v17, %v6789_v32 }
 0x705   :  { %5789 = vpow2.f32 %v1372_v63  ;;  %v1392_v55 = vmul.f32 1.442695, %v1363_v20  ;;  %v1390_v12 = vmul.f32 1.442695, %v1362_v24  ;;  %v1255_v20 = vadd.f32 %v6769_v42, %v6664_v17 }
 0x706   :  { %5791 = vpow2.f32 %v1386_v57  ;;  %v1252_v30 = vadd.f32 %v6742_v39, %v6664_v17  ;;  %v1253_v44 = vadd.f32 %v6664_v17, %v6775_v18  ;;  %v1256_v24 = vadd.f32 %v6781_v26, %v6664_v17 }
 0x707   :  { %5793 = vpow2.f32 %v1388_v61  ;;  %v1270_v61 = vpop.xlane.xlu1 %1269 }
 0x708   :  { %5795 = vpow2.f32 %v1374_v28 }
 0x709   :  { %5797 = vpow2.f32 %v1376_v50 }
 0x70a   :  { %v6843_v27 = vpop.eup %5779  ;;  %5799 = vpow2.f32 %v1382_v29 }
 0x70b   :  { %v6845_v56 = vpop.eup %5781  ;;  %5801 = vpow2.f32 %v1384_v37  ;;  %v1273_v28 = vpop.xlane.xlu1 %1272 }
 0x70c   :  { %v6847_v43 = vpop.eup %5783  ;;  %v5662_v53 = vpack.i.bf16 %v6845_v56, %v6843_v27  ;;  %5803 = vpow2.f32 %v1394_v19  ;;  %v6914_v37 = vpop.xlane.xlu0 %1284  ;;  %v1291_v14 = vsub.f32 %v6531_v6, %v1273_v28 }
 0x70d   :  { %v6851_v5 = vpop.eup %5785  ;;  %5805 = vpow2.f32 %v1396_v59 }
 0x70e   :  { %v6853_v25 = vpop.eup %5787  ;;  %5663 = vrot.lane.b32.xlu1 %v5662_v53, %s6198_s6  ;;  %v5647_v35 = vpack.i.bf16 %v6851_v5, %v6847_v43  ;;  %5807 = vpow2.f32 %v1392_v55 }
 0x70f   :  { %v6858_v58 = vpop.eup %5789  ;;  %5809 = vpow2.f32 %v1390_v12  ;;  %v1276_v50 = vpop.xlane.xlu1 %1275 }
 0x710   :  { %v6860_v1 = vpop.eup %5791  ;;  %5648 = vrot.lane.b32.xlu0 %v5647_v35, %s6198_s6  ;;  %v5652_v21 = vpack.i.bf16 %v6858_v58, %v6853_v25 }
 0x711   :  { %v6867_v47 = vpop.eup %5793 }
 0x712   :  { %v6869_v4 = vpop.eup %5795  ;;  %1440 = vrot.lane.b32.xlu1 %v1254_v49, %s6199_s8  ;;  %v5672_v8 = vpack.i.bf16 %v6867_v47, %v6860_v1 }
 0x713   :  { %v6872_v38 = vpop.eup %5797  ;;  %v1279_v29 = vpop.xlane.xlu1 %1278 }
 0x714   :  { %5653 = vrot.lane.b32.xlu0 %v5652_v21, %s6198_s6  ;;  %v5657_v32 = vpack.i.bf16 %v6872_v38, %v6869_v4  ;;  %v6879_v54 = vpop.eup %5799 }
 0x715   :  { %v6882_v40 = vpop.eup %5801 }
 0x716   :  { %5673 = vrot.lane.b32.xlu1 %v5672_v8, %s6198_s6  ;;  %v6884_v63 = vpop.eup %5803  ;;  %v5667_v34 = vpack.i.bf16 %v6882_v40, %v6879_v54 }
 0x717   :  { %v6891_v11 = vpop.eup %5805  ;;  %v6916_v18 = vpop.xlane.xlu1 %1281 }
 0x718   :  { %5658 = vrot.lane.b32.xlu0 %v5657_v32, %s6198_s6  ;;  %v5682_v48 = vpack.i.bf16 %v6891_v11, %v6884_v63  ;;  %v6901_v42 = vpop.eup %5807 }
 0x719   :  { %v6905_v57 = vpop.eup %5809 }
 0x71a   :  { %1442 = vrot.lane.b32.xlu1 %v1255_v20, %s6199_s8  ;;  %v5677_v39 = vpack.i.bf16 %v6901_v42, %v6905_v57 }
 0x71b   :  { %v6918_v59 = vpop.xlane.xlu1 %1287 }
 0x71c   :  { %1436 = vrot.lane.b32.xlu0 %v1252_v30, %s6199_s8 }
 0x71e   :  { %5683 = vrot.lane.b32.xlu1 %v5682_v48, %s6198_s6 }
 0x720   :  { %5668 = vrot.lane.b32.xlu0 %v5667_v34, %s6198_s6 }
 0x724   :  { %1438 = vrot.lane.b32.xlu0 %v1253_v44, %s6199_s8 }
 0x728   :  { %5678 = vrot.lane.b32.xlu0 %v5677_v39, %s6198_s6 }
 0x72c   :  { %1444 = vrot.lane.b32.xlu0 %v1256_v24, %s6199_s8  ;;  %v1290_v24 = vsub.f32 %v6521_v23, %v1270_v61 }
 0x740   :  { %v1419_v19 = vpop.permute.xlu0 %1418 }
 0x741   :  { %v1464_v46 = vmul.f32 %v6853_v25, %v1419_v19 }
 0x742   :  { %v1421_v35 = vpop.permute.xlu1 %1420 }
 0x743   :  { %v1465_v15 = vmul.f32 %v6858_v58, %v1421_v35 }
 0x744   :  { %v1415_v53 = vpop.permute.xlu0 %1414 }
 0x745   :  { %v1462_v30 = vmul.f32 %v6847_v43, %v1415_v53  ;;  %v1299_v53 = vmul.f32 1.442695, %v1290_v24 }
 0x746   :  { %v1417_v21 = vpop.permute.xlu1 %1416 }
 0x747   :  { %v1463_v48 = vmul.f32 %v6851_v5, %v1417_v21  ;;  %v1301_v5 = vmul.f32 1.442695, %v1291_v14  ;;  %v1292_v21 = vsub.f32 %v6538_v60, %v1276_v50  ;;  %5811 = vpow2.f32 %v1299_v53 }
 0x749   :  { %v1423_v49 = vpop.permute.xlu0 %1422  ;;  %5813 = vpow2.f32 %v1301_v5 }
 0x74a   :  { %v1427_v8 = vpop.permute.xlu1 %1426  ;;  %v1466_v25 = vmul.f32 %v6869_v4, %v1423_v49  ;;  %v1295_v4 = vsub.f32 %v6566_v10, %v6914_v37 }
 0x74d   :  { %v1429_v55 = vpop.permute.xlu0 %1428 }
 0x74e   :  { %v1469_v60 = vmul.f32 %v6845_v56, %v1429_v55 }
 0x750   :  { %v6920_v17 = vpop.permute.xlu1 %1434 }
 0x751   :  { %v1425_v26 = vpop.permute.xlu0 %1424 }
 0x752   :  { %v1467_v28 = vmul.f32 %v6872_v38, %v1425_v26 }
 0x754   :  { %v1433_v32 = vpop.permute.xlu1 %1432 }
 0x755   :  { %v1431_v12 = vpop.permute.xlu0 %1430  ;;  %v1471_v26 = vmul.f32 %v6882_v40, %v1433_v32 }
 0x780   :  { %v5664_v34 = vpop.permute.xlu1 %5663 }
 0x781   :  { %v5666_v23 = vunpack.i.h.bf16 %v5664_v34  ;;  %v5665_v6 = vunpack.i.l.bf16 %v5664_v34  ;;  %v1470_v34 = vmul.f32 %v6879_v54, %v1431_v12  ;;  %v5812_v54 = vpop.eup %5811 }
 0x782   :  { %v5649_v20 = vpop.permute.xlu0 %5648  ;;  %v5814_v53 = vpop.eup %5813 }
 0x783   :  { %v5651_v44 = vunpack.i.h.bf16 %v5649_v20  ;;  %v5650_v39 = vunpack.i.l.bf16 %v5649_v20 }
 0x784   :  { %v6931_v20 = vpop.permute.xlu1 %1440 }
 0x785   :  { %v1542_v9 = vsel %vm119_vm0, %v1462_v30, %v5650_v39  ;;  %v1543_v33 = vsel %vm119_vm0, %v1463_v48, %v5651_v44  ;;  %v1472_v39 = vmul.f32 %v6860_v1, %v6920_v17 }
 0x786   :  { %v5654_v31 = vpop.permute.xlu0 %5653  ;;  %v5595_v52 = vpack.c.bf16 %v1543_v33, %v1542_v9  ;;  %v1293_v33 = vsub.f32 %v6545_v62, %v1279_v29 }
 0x787   :  { %v5656_v51 = vunpack.i.h.bf16 %v5654_v31  ;;  %v5655_v43 = vunpack.i.l.bf16 %v5654_v31  ;;  %v1468_v31 = vmul.f32 %v6843_v27, %v1427_v8  ;;  %v1549_v27 = vsel %vm119_vm0, %v1469_v60, %v5666_v23 }
 0x788   :  { %5596 = vmatprep.subr.bf16.mxu1 %v5595_v52  ;;  %v1305_v56 = vmul.f32 1.442695, %v1293_v33  ;;  %v5674_v38 = vpop.permute.xlu1 %5673  ;;  %v1309_v8 = vmul.f32 1.442695, %v1295_v4  ;;  %v1475_v23 = vmul.f32 %v6901_v42, %v6931_v20 }
 0x789   :  { %5598 = vmatpush3.bf16.msra.mxu1 %v5595_v52  ;;  %v1544_v61 = vsel %vm119_vm0, %v1464_v46, %v5655_v43  ;;  %v1545_v9 = vsel %vm119_vm0, %v1465_v15, %v5656_v51  ;;  %v1303_v52 = vmul.f32 1.442695, %v1292_v21  ;;  %v1294_v46 = vsub.f32 %v6552_v0, %v6916_v18 }
 0x78a   :  { %v5659_v58 = vpop.permute.xlu0 %5658  ;;  %v5599_v14 = vpack.c.bf16 %v1545_v9, %v1544_v61  ;;  %v1548_v15 = vsel %vm119_vm0, %v1468_v31, %v5665_v6  ;;  %v1296_v0 = vsub.f32 %v6559_v2, %v6918_v59  ;;  %v5676_v37 = vunpack.i.h.bf16 %v5674_v38 }
 0x78b   :  { %v5661_v50 = vunpack.i.h.bf16 %v5659_v58  ;;  %v5660_v19 = vunpack.i.l.bf16 %v5659_v58  ;;  %v1307_v49 = vmul.f32 1.442695, %v1294_v46  ;;  %v5607_v18 = vpack.c.bf16 %v1549_v27, %v1548_v15 }
 0x78c   :  { %5600 = vmatprep.subr.bf16.mxu1 %v5599_v14  ;;  %5815 = vpow2.f32 %v1303_v52  ;;  %v5675_v30 = vunpack.i.l.bf16 %v5674_v38  ;;  %v1311_v2 = vmul.f32 1.442695, %v1296_v0  ;;  %v1443_v59 = vpop.permute.xlu1 %1442 }
 0x78d   :  { %5602 = vmatpush3.bf16.msra.mxu1 %v5599_v14  ;;  %v1546_v51 = vsel %vm119_vm0, %v1466_v25, %v5660_v19  ;;  %v1547_v62 = vsel %vm119_vm0, %v1467_v28, %v5661_v50  ;;  %5817 = vpow2.f32 %v1305_v56  ;;  %v1476_v42 = vmul.f32 %v6884_v63, %v1443_v59  ;;  %v5309_v63 = vpop.f32.mrb[8].mxu1 }
 0x78e   :  { %v1437_v29 = vpop.permute.xlu0 %1436  ;;  %v5603_v35 = vpack.c.bf16 %v1547_v62, %v1546_v51  ;;  %5819 = vpow2.f32 %v1307_v49  ;;  %v1552_v43 = vsel %vm119_vm0, %v1472_v39, %v5675_v30 }
 0x78f   :  { %v1473_v55 = vmul.f32 %v6867_v47, %v1437_v29  ;;  %5821 = vpow2.f32 %v1309_v8 }
 0x790   :  { %5604 = vmatprep.subr.bf16.mxu1 %v5603_v35  ;;  %5823 = vpow2.f32 %v1311_v2  ;;  %v5684_v1 = vpop.permute.xlu1 %5683 }
 0x791   :  { %5606 = vmatpush3.bf16.msra.mxu1 %v5603_v35  ;;  %v1553_v40 = vsel %vm119_vm0, %v1473_v55, %v5676_v37  ;;  %v5685_v25 = vunpack.i.l.bf16 %v5684_v1  ;;  %v5686_v20 = vunpack.i.h.bf16 %v5684_v1 }
 0x792   :  { %v5669_v10 = vpop.permute.xlu0 %5668  ;;  %5608 = vmatprep.subr.bf16.mxu1 %v5607_v18  ;;  %v5615_v5 = vpack.c.bf16 %v1553_v40, %v1552_v43 }
 0x793   :  { %v5671_v48 = vunpack.i.h.bf16 %v5669_v10  ;;  %v5670_v44 = vunpack.i.l.bf16 %v5669_v10  ;;  %v1556_v19 = vsel %vm119_vm0, %v1476_v42, %v5685_v25 }
 0x795   :  { %5610 = vmatpush3.bf16.msra.mxu1 %v5607_v18  ;;  %v1550_v47 = vsel %vm119_vm0, %v1470_v34, %v5670_v44  ;;  %v1551_v24 = vsel %vm119_vm0, %v1471_v26, %v5671_v48  ;;  %v966_v34 = vrot.slane %v6509_v22, %v6417_v41 }
 0x796   :  { %v1439_v32 = vpop.permute.xlu0 %1438  ;;  %v5611_v12 = vpack.c.bf16 %v1551_v24, %v1550_v47  ;;  %v5816_v21 = vpop.eup %5815 }
 0x797   :  { %v1474_v6 = vmul.f32 %v6905_v57, %v1439_v32  ;;  %v5818_v33 = vpop.eup %5817  ;;  %v1046_v44 = vadd.f32 %v5309_v63, %v966_v34 }
 0x798   :  { %5360 = vmatmul.mubr.msk.f32.vlgmr.msra.gmra.mrb[2].mxu1 %vm821_vm2, %v5812_v54  ;;  %5612 = vmatprep.subr.bf16.mxu0 %v5611_v12  ;;  %v5820_v14 = vpop.eup %5819 }
 0x799   :  { %5362 = vmatprep.mubr.msk.f32.mxu1 %vm821_vm2, %v5814_v53  ;;  %5614 = vmatpush3.bf16.msra.mxu0 %v5611_v12  ;;  %v5822_v50 = vpop.eup %5821  ;;  %v4941_v39 = vmul.f32 -1.442695, %v1046_v44 }
 0x79a   :  { %v5679_v17 = vpop.permute.xlu0 %5678  ;;  %5616 = vmatprep.subr.bf16.mxu0 %v5615_v5  ;;  %v5824_v51 = vpop.eup %5823 }
 0x79b   :  { %v5681_v61 = vunpack.i.h.bf16 %v5679_v17  ;;  %v5680_v9 = vunpack.i.l.bf16 %v5679_v17 }
 0x79c   :  { %5363 = vmatmul.mubr.msk.f32.gmra.mrb[24].mxu1 %vm821_vm2, %v5816_v21 }
 0x79d   :  { %5365 = vmatprep.mubr.msk.f32.mxu1 %vm821_vm2, %v5818_v33  ;;  %5618 = vmatpush3.bf16.msra.mxu0 %v5615_v5  ;;  %v1554_v31 = vsel %vm119_vm0, %v1474_v6, %v5680_v9  ;;  %v1555_v58 = vsel %vm119_vm0, %v1475_v23, %v5681_v61 }
 0x79e   :  { %v1445_v60 = vpop.permute.xlu0 %1444  ;;  %v5619_v28 = vpack.c.bf16 %v1555_v58, %v1554_v31 }
 0x79f   :  { %v1477_v57 = vmul.f32 %v6891_v11, %v1445_v60  ;;  %v1037_v11 = vpop.f32.mrb[9].mxu1 }
 0x7a0   :  { %5366 = vmatmul.mubr.msk.f32.gmra.mrb[26].mxu1 %vm821_vm2, %v5820_v14  ;;  %5620 = vmatprep.subr.bf16.mxu0 %v5619_v28  ;;  %v5310_v62 = vpop.f32.mrb[10].mxu1  ;;  %v1038_v10 = vadd.f32 %v1037_v11, %v966_v34 }
 0x7a1   :  { %5368 = vmatprep.mubr.msk.f32.mxu1 %vm821_vm2, %v5822_v50  ;;  %5622 = vmatpush3.bf16.msra.mxu0 %v5619_v28  ;;  %v1557_v52 = vsel %vm119_vm0, %v1477_v57, %v5686_v20  ;;  %v1040_v15 = vpop.f32.mrb[11].mxu1  ;;  %v1049_v2 = vadd.f32 %v5310_v62, %v966_v34 }
 0x7a2   :  { %v5623_v46 = vpack.c.bf16 %v1557_v52, %v1556_v19  ;;  %v5313_v27 = vpop.f32.mrb[12].mxu1  ;;  %v1041_v37 = vadd.f32 %v1040_v15, %v966_v34  ;;  %v4939_v30 = vmul.f32 -1.442695, %v1038_v10 }
 0x7a3   :  { %v1053_v56 = vpop.f32.mrb[13].mxu1  ;;  %v1062_v59 = vadd.f32 %v5313_v27, %v966_v34  ;;  %v4942_v47 = vmul.f32 -1.442695, %v1049_v2 }
 0x7a4   :  { %5369 = vmatmul.mubr.msk.f32.gmra.mrb[28].mxu1 %vm821_vm2, %v5824_v51  ;;  %5624 = vmatprep.subr.bf16.mxu0 %v5623_v46  ;;  %v5314_v4 = vpop.f32.mrb[14].mxu1  ;;  %v4940_v48 = vmul.f32 -1.442695, %v1041_v37  ;;  %5825 = vpow2.f32 %v4939_v30 }
 0x7a5   :  { %5626 = vmatpush3.bf16.msra.mxu0 %v5623_v46  ;;  %v1056_v38 = vpop.f32.mrb[15].mxu1  ;;  %v4945_v40 = vmul.f32 -1.442695, %v1062_v59  ;;  %v1065_v32 = vadd.f32 %v5314_v4, %v966_v34 }
 0x7a6   :  { %v5317_v29 = vpop.f32.mrb[16].mxu1  ;;  %5827 = vpow2.f32 %v4940_v48  ;;  %v1057_v24 = vadd.f32 %v1056_v38, %v966_v34 }
 0x7a7   :  { %v1069_v35 = vpop.f32.mrb[17].mxu1  ;;  %5829 = vpow2.f32 %v4941_v39  ;;  %v4946_v1 = vmul.f32 -1.442695, %v1065_v32  ;;  %v1078_v23 = vadd.f32 %v5317_v29, %v966_v34 }
 0x7a8   :  { %5388 = vmatmul.mubr.msk.f32.vlgmr.msra.gmra.mrb[10].mxu0 %vm821_vm2, %v5812_v54  ;;  %v5318_v49 = vpop.f32.mrb[18].mxu1  ;;  %v1054_v54 = vadd.f32 %v1053_v56, %v966_v34  ;;  %5831 = vpow2.f32 %v4942_v47  ;;  %v4944_v12 = vmul.f32 -1.442695, %v1057_v24  ;;  %v1070_v5 = vadd.f32 %v1069_v35, %v966_v34 }
 0x7a9   :  { %5390 = vmatprep.mubr.msk.f32.mxu0 %vm821_vm2, %v5814_v53  ;;  %v1072_v0 = vpop.f32.mrb[19].mxu1  ;;  %5833 = vpow2.f32 %v4945_v40  ;;  %v1081_v61 = vadd.f32 %v5318_v49, %v966_v34  ;;  %v4949_v31 = vmul.f32 -1.442695, %v1078_v23  ;;  %v5714_v23 = vld [vmem:[%s8799_s11 + $0x8] sm:$0xff]  }
 0x7aa   :  { %v5321_v18 = vpop.f32.mrb[20].mxu1  ;;  %v4943_v22 = vmul.f32 -1.442695, %v1054_v54  ;;  %5835 = vpow2.f32 %v4944_v12  ;;  %v1073_v17 = vadd.f32 %v1072_v0, %v966_v34  ;;  %v4947_v9 = vmul.f32 -1.442695, %v1070_v5 }
 0x7ab   :  { %v1085_v55 = vpop.f32.mrb[21].mxu1  ;;  %v1094_v46 = vadd.f32 %v5321_v18, %v966_v34 }
 0x7ac   :  { %5391 = vmatmul.mubr.msk.f32.gmra.mrb[36].mxu0 %vm821_vm2, %v5816_v21  ;;  %v5322_v8 = vpop.f32.mrb[22].mxu1  ;;  %5837 = vpow2.f32 %v4943_v22  ;;  %v1086_v28 = vadd.f32 %v1085_v55, %v966_v34  ;;  %v5713_v22 = vld [vmem:[%s8799_s11] sm:$0xff]  }
 0x7ad   :  { %5393 = vmatprep.mubr.msk.f32.mxu0 %vm821_vm2, %v5818_v33  ;;  %v1088_v26 = vpop.f32.mrb[23].mxu1  ;;  %5839 = vpow2.f32 %v4946_v1  ;;  %v4948_v33 = vmul.f32 -1.442695, %v1073_v17  ;;  %v1097_v63 = vadd.f32 %v5322_v8, %v966_v34  ;;  %v4953_v4 = vmul.f32 -1.442695, %v1094_v46  ;;  %5399 = vmatprep.subr.bf16.mxu1 %v5713_v22 }
 0x7ae   :  { %v5826_v43 = vpop.eup %5825  ;;  %v1089_v20 = vadd.f32 %v1088_v26, %v966_v34  ;;  %5400 = vmatpush3.bf16.msra.mxu1 %v5713_v22 }
 0x7af   :  { %v1840_v21 = vadd.f32 1.0, %v5826_v43  ;;  %v4954_v29 = vmul.f32 -1.442695, %v1097_v63  ;;  %5401 = vmatprep.subr.bf16.mxu1 %v5714_v23 }
 0x7b0   :  { %5394 = vmatmul.mubr.msk.f32.gmra.mrb[38].mxu0 %vm821_vm2, %v5820_v14  ;;  %v5828_v53 = vpop.eup %5827  ;;  %v4950_v14 = vmul.f32 -1.442695, %v1081_v61  ;;  %v4952_v11 = vmul.f32 -1.442695, %v1089_v20 }
 0x7b1   :  { %5396 = vmatprep.mubr.msk.f32.mxu0 %vm821_vm2, %v5822_v50  ;;  %v1841_v6 = vadd.f32 1.0, %v5828_v53  ;;  %v5830_v25 = vpop.eup %5829  ;;  %5841 = vrcp.f32 %v1840_v21 }
 0x7b2   :  { %v5832_v58 = vpop.eup %5831  ;;  %v1842_v42 = vadd.f32 1.0, %v5830_v25  ;;  %5402 = vmatpush3.bf16.msra.mxu1 %v5714_v23 }
 0x7b3   :  { %5843 = vrcp.f32 %v1841_v6  ;;  %v5834_v60 = vpop.eup %5833  ;;  %v1843_v57 = vadd.f32 1.0, %v5832_v58 }
 0x7b4   :  { %5397 = vmatmul.mubr.msk.f32.gmra.mrb[40].mxu0 %vm821_vm2, %v5824_v51  ;;  %5845 = vpow2.f32 %v4947_v9  ;;  %v5836_v50 = vpop.eup %5835  ;;  %v1846_v19 = vadd.f32 1.0, %v5834_v60  ;;  %v4951_v51 = vmul.f32 -1.442695, %v1086_v28 }
 0x7b5   :  { %5847 = vpow2.f32 %v4948_v33  ;;  %v1845_v62 = vadd.f32 1.0, %v5836_v50 }
 0x7b6   :  { %5849 = vpow2.f32 %v4949_v31  ;;  %v5838_v52 = vpop.eup %5837 }
 0x7b7   :  { %5851 = vpow2.f32 %v4950_v14  ;;  %v5840_v15 = vpop.eup %5839  ;;  %v1844_v27 = vadd.f32 1.0, %v5838_v52 }
 0x7b8   :  { %5853 = vrcp.f32 %v1842_v42  ;;  %v1847_v49 = vadd.f32 1.0, %v5840_v15 }
 0x7b9   :  { %5855 = vrcp.f32 %v1843_v57 }
 0x7ba   :  { %5857 = vrcp.f32 %v1846_v19 }
 0x7bb   :  { %v5842_v56 = vpop.eup %5841  ;;  %5859 = vpow2.f32 %v4951_v51 }
 0x7bc   :  { %5861 = vpow2.f32 %v4952_v11 }
 0x7bd   :  { %v5844_v38 = vpop.eup %5843  ;;  %5863 = vrcp.f32 %v1845_v62 }
 0x7be   :  { %v5846_v35 = vpop.eup %5845  ;;  %5865 = vrcp.f32 %v1844_v27 }
 0x7bf   :  { %v5848_v0 = vpop.eup %5847  ;;  %5867 = vpow2.f32 %v4953_v4  ;;  %v1848_v26 = vadd.f32 1.0, %v5846_v35 }
 0x7c0   :  { %v5850_v18 = vpop.eup %5849  ;;  %5869 = vpow2.f32 %v4954_v29  ;;  %v1849_v30 = vadd.f32 1.0, %v5848_v0 }
 0x7c1   :  { %v5852_v8 = vpop.eup %5851  ;;  %5871 = vrcp.f32 %v1847_v49  ;;  %v1850_v39 = vadd.f32 1.0, %v5850_v18 }
 0x7c2   :  { %v5854_v2 = vpop.eup %5853  ;;  %v1851_v47 = vadd.f32 1.0, %v5852_v8 }
 0x7c3   :  { %v5856_v59 = vpop.eup %5855 }
 0x7c4   :  { %v5858_v40 = vpop.eup %5857 }
 0x7c5   :  { %v5860_v43 = vpop.eup %5859 }
 0x7c6   :  { %v5862_v1 = vpop.eup %5861  ;;  %v1852_v61 = vadd.f32 1.0, %v5860_v43 }
 0x7c7   :  { %v5864_v17 = vpop.eup %5863  ;;  %v1853_v58 = vadd.f32 1.0, %v5862_v1 }
 0x7c8   :  { %v5866_v6 = vpop.eup %5865 }
 0x7c9   :  { %v5868_v31 = vpop.eup %5867 }
 0x7ca   :  { %v5870_v28 = vpop.eup %5869  ;;  %v1854_v50 = vadd.f32 1.0, %v5868_v31 }
 0x7cb   :  { %v5872_v42 = vpop.eup %5871  ;;  %v1855_v63 = vadd.f32 1.0, %v5870_v28 }
 0x86b   :  { %v5361_v55 = vpop.f32.mrb[2].mxu1 }
 0x86c   :  { %v6984_v34 = vmul.f32 %v5844_v38, %v5361_v55  ;;  %v1905_v10 = vadd.f32 1e-12, %v5361_v55  ;;  %v1648_v37 = vpop.f32.mrb[3].mxu1 }
 0x86d   :  { %v6986_v48 = vmul.f32 %v5842_v56, %v1648_v37  ;;  %v1904_v44 = vadd.f32 1e-12, %v1648_v37 }
 0x86e   :  { %5873 = vrcp.f32 %v1905_v10 }
 0x86f   :  { %5875 = vrcp.f32 %v1904_v44  ;;  %v5364_v24 = vpop.f32.mrb[24].mxu1 }
 0x870   :  { %5877 = vrcp.f32 %v1848_v26  ;;  %v6988_v54 = vmul.f32 %v5856_v59, %v5364_v24  ;;  %v1907_v32 = vadd.f32 1e-12, %v5364_v24  ;;  %v1658_v12 = vpop.f32.mrb[25].mxu1 }
 0x871   :  { %5879 = vrcp.f32 %v1849_v30  ;;  %v6993_v53 = vmul.f32 %v5854_v2, %v1658_v12  ;;  %v1906_v5 = vadd.f32 1e-12, %v1658_v12 }
 0x872   :  { %5881 = vrcp.f32 %v1907_v32 }
 0x873   :  { %5883 = vrcp.f32 %v1906_v5  ;;  %v5367_v21 = vpop.f32.mrb[26].mxu1 }
 0x874   :  { %5885 = vrcp.f32 %v1850_v39  ;;  %v6998_v9 = vmul.f32 %v5864_v17, %v5367_v21  ;;  %v1909_v33 = vadd.f32 1e-12, %v5367_v21  ;;  %v1668_v25 = vpop.f32.mrb[27].mxu1 }
 0x875   :  { %5887 = vrcp.f32 %v1851_v47  ;;  %v7000_v14 = vmul.f32 %v5866_v6, %v1668_v25  ;;  %v1908_v60 = vadd.f32 1e-12, %v1668_v25 }
 0x876   :  { %5889 = vrcp.f32 %v1909_v33 }
 0x877   :  { %5891 = vrcp.f32 %v1908_v60  ;;  %v5370_v20 = vpop.f32.mrb[28].mxu1 }
 0x878   :  { %v5874_v57 = vpop.eup %5873  ;;  %5893 = vrcp.f32 %v1852_v61  ;;  %v7002_v19 = vmul.f32 %v5872_v42, %v5370_v20  ;;  %v1911_v52 = vadd.f32 1e-12, %v5370_v20  ;;  %v1678_v46 = vpop.f32.mrb[29].mxu1 }
 0x879   :  { %v5876_v51 = vpop.eup %5875  ;;  %5895 = vrcp.f32 %v1853_v58  ;;  %v7004_v11 = vmul.f32 %v5858_v40, %v1678_v46  ;;  %v1910_v62 = vadd.f32 1e-12, %v1678_v46  ;;  %1954 = vrot.lane.b32.xlu1 %v5874_v57, %s6199_s8 }
 0x87a   :  { %v5878_v15 = vpop.eup %5877  ;;  %5897 = vrcp.f32 %v1911_v52  ;;  %1952 = vrot.lane.b32.xlu0 %v5876_v51, %s6199_s8 }
 0x87b   :  { %v5880_v27 = vpop.eup %5879  ;;  %5899 = vrcp.f32 %v1910_v62  ;;  %v5389_v56 = vpop.f32.mrb[10].mxu0 }
 0x87c   :  { %v5882_v4 = vpop.eup %5881  ;;  %5901 = vrcp.f32 %v1854_v50  ;;  %v7008_v38 = vmul.f32 %v5880_v27, %v5389_v56  ;;  %v1913_v29 = vadd.f32 1e-12, %v5389_v56  ;;  %v1753_v35 = vpop.f32.mrb[11].mxu0 }
 0x87d   :  { %v5884_v49 = vpop.eup %5883  ;;  %5903 = vrcp.f32 %v1855_v63  ;;  %v7010_v0 = vmul.f32 %v5878_v15, %v1753_v35  ;;  %v1912_v18 = vadd.f32 1e-12, %v1753_v35  ;;  %1958 = vrot.lane.b32.xlu1 %v5882_v4, %s6199_s8 }
 0x87e   :  { %v5886_v55 = vpop.eup %5885  ;;  %5905 = vrcp.f32 %v1913_v29  ;;  %1956 = vrot.lane.b32.xlu0 %v5884_v49, %s6199_s8 }
 0x87f   :  { %v5888_v8 = vpop.eup %5887  ;;  %5907 = vrcp.f32 %v1912_v18  ;;  %v5392_v26 = vpop.f32.mrb[36].mxu0 }
 0x880   :  { %v5890_v10 = vpop.eup %5889  ;;  %v7014_v37 = vmul.f32 %v5888_v8, %v5392_v26  ;;  %v1915_v30 = vadd.f32 1e-12, %v5392_v26  ;;  %v1763_v44 = vpop.f32.mrb[37].mxu0 }
 0x881   :  { %v5892_v2 = vpop.eup %5891  ;;  %v7016_v59 = vmul.f32 %v5886_v55, %v1763_v44  ;;  %v1914_v39 = vadd.f32 1e-12, %v1763_v44  ;;  %1962 = vrot.lane.b32.xlu1 %v5890_v10, %s6199_s8 }
 0x882   :  { %v5894_v47 = vpop.eup %5893  ;;  %5909 = vrcp.f32 %v1915_v30  ;;  %1960 = vrot.lane.b32.xlu0 %v5892_v2, %s6199_s8 }
 0x883   :  { %v5896_v24 = vpop.eup %5895  ;;  %5911 = vrcp.f32 %v1914_v39  ;;  %v5395_v40 = vpop.f32.mrb[38].mxu0 }
 0x884   :  { %v5898_v32 = vpop.eup %5897  ;;  %v7020_v12 = vmul.f32 %v5896_v24, %v5395_v40  ;;  %v1917_v22 = vadd.f32 1e-12, %v5395_v40  ;;  %v1773_v43 = vpop.f32.mrb[39].mxu0 }
 0x885   :  { %v5900_v5 = vpop.eup %5899  ;;  %v7022_v1 = vmul.f32 %v5894_v47, %v1773_v43  ;;  %v1916_v17 = vadd.f32 1e-12, %v1773_v43  ;;  %1966 = vrot.lane.b32.xlu1 %v5898_v32, %s6199_s8 }
 0x886   :  { %v5902_v21 = vpop.eup %5901  ;;  %5913 = vrcp.f32 %v1917_v22  ;;  %1964 = vrot.lane.b32.xlu0 %v5900_v5, %s6199_s8 }
 0x887   :  { %v5904_v23 = vpop.eup %5903  ;;  %5915 = vrcp.f32 %v1916_v17  ;;  %v5398_v6 = vpop.f32.mrb[40].mxu0 }
 0x888   :  { %v5906_v61 = vpop.eup %5905  ;;  %v7026_v33 = vmul.f32 %v5904_v23, %v5398_v6  ;;  %v1919_v25 = vadd.f32 1e-12, %v5398_v6  ;;  %v1783_v31 = vpop.f32.mrb[41].mxu0 }
 0x889   :  { %v5908_v58 = vpop.eup %5907  ;;  %v1902_v60 = vmul.f32 %v5902_v21, %v1783_v31  ;;  %v1918_v28 = vadd.f32 1e-12, %v1783_v31  ;;  %1970 = vrot.lane.b32.xlu1 %v5906_v61, %s6199_s8 }
 0x88a   :  { %5917 = vrcp.f32 %v1919_v25  ;;  %1968 = vrot.lane.b32.xlu0 %v5908_v58, %s6199_s8 }
 0x88b   :  { %5919 = vrcp.f32 %v1918_v28 }
 0x88c   :  { %v5910_v42 = vpop.eup %5909 }
 0x88d   :  { %v5912_v20 = vpop.eup %5911  ;;  %1974 = vrot.lane.b32.xlu1 %v5910_v42, %s6199_s8 }
 0x88e   :  { %1972 = vrot.lane.b32.xlu0 %v5912_v20, %s6199_s8 }
 0x890   :  { %v5914_v57 = vpop.eup %5913 }
 0x891   :  { %v5916_v50 = vpop.eup %5915  ;;  %1978 = vrot.lane.b32.xlu1 %v5914_v57, %s6199_s8  ;;  %v6179_v57 = vld [vmem:[%s8795_s1 + $0x8] sm:$0xff] }
 0x892   :  { %1976 = vrot.lane.b32.xlu0 %v5916_v50, %s6199_s8 }
 0x894   :  { %v5918_v52 = vpop.eup %5917 }
 0x895   :  { %v5920_v46 = vpop.eup %5919  ;;  %1982 = vrot.lane.b32.xlu1 %v5918_v52, %s6199_s8  ;;  %v6180_v52 = vld [vmem:[%s8795_s1 + $0x10] sm:$0xff] }
 0x896   :  { %1980 = vrot.lane.b32.xlu0 %v5920_v46, %s6199_s8 }
 0x8eb   :  { %v1955_v51 = vpop.permute.xlu1 %1954 }
 0x8ec   :  { %v2001_v63 = vmul.f32 %v1955_v51, %v6984_v34  ;;  %v1953_v62 = vpop.permute.xlu0 %1952 }
 0x8ed   :  { %v2000_v15 = vmul.f32 %v1953_v62, %v6986_v48 }
 0x8ef   :  { %v2016_v27 = vpack.c.bf16 %v2001_v63, %v2000_v15  ;;  %v1959_v56 = vpop.permute.xlu1 %1958 }
 0x8f0   :  { %v2003_v4 = vmul.f32 %v1959_v56, %v6988_v54  ;;  %v1957_v29 = vpop.permute.xlu0 %1956 }
 0x8f1   :  { %v2002_v35 = vmul.f32 %v1957_v29, %v6993_v53  ;;  %5403 = vmatprep.mubr.msk.bf16.mxu1 %vm119_vm0, %v2016_v27  ;;  %v6181_v29 = vld [vmem:[%s8795_s1 + $0x18] sm:$0xff] }
 0x8f3   :  { %v2017_v49 = vpack.c.bf16 %v2003_v4, %v2002_v35  ;;  %v1963_v18 = vpop.permute.xlu1 %1962 }
 0x8f4   :  { %v2005_v55 = vmul.f32 %v1963_v18, %v6998_v9  ;;  %v1961_v8 = vpop.permute.xlu0 %1960 }
 0x8f5   :  { %v2004_v26 = vmul.f32 %v1961_v8, %v7000_v14  ;;  %5404 = vmatmul.mubr.msk.bf16.vlgmr.msra.gmra.mrb[32].mxu1 %vm119_vm0, %v2017_v49 }
 0x8f7   :  { %v2018_v34 = vpack.c.bf16 %v2005_v55, %v2004_v26  ;;  %v1967_v48 = vpop.permute.xlu1 %1966  ;;  %v6182_v55 = vld [vmem:[%s8795_s1 + $0x20] sm:$0xff]  ;;  %v6183_v26 = vld [vmem:[%s8795_s1 + $0x30] sm:$0xff] }
 0x8f8   :  { %v2007_v10 = vmul.f32 %v1967_v48, %v7002_v19  ;;  %v1965_v30 = vpop.permute.xlu0 %1964 }
 0x8f9   :  { %v2006_v54 = vmul.f32 %v1965_v30, %v7004_v11  ;;  %5407 = vmatprep.mubr.msk.bf16.mxu1 %vm119_vm0, %v2018_v34 }
 0x8fb   :  { %v2019_v53 = vpack.c.bf16 %v2007_v10, %v2006_v54  ;;  %v1971_v44 = vpop.permute.xlu1 %1970  ;;  %v6184_v54 = vld [vmem:[%s8795_s1 + $0x28] sm:$0xff] }
 0x8fc   :  { %v2009_v2 = vmul.f32 %v1971_v44, %v7008_v38  ;;  %v1969_v39 = vpop.permute.xlu0 %1968 }
 0x8fd   :  { %v2008_v9 = vmul.f32 %v1969_v39, %v7010_v0  ;;  %5408 = vmatmul.mubr.msk.bf16.gmra.mrb[36].mxu1 %vm119_vm0, %v2019_v53 }
 0x8ff   :  { %v2020_v14 = vpack.c.bf16 %v2009_v2, %v2008_v9  ;;  %v1975_v47 = vpop.permute.xlu1 %1974 }
 0x900   :  { %v2011_v24 = vmul.f32 %v1975_v47, %v7014_v37  ;;  %v1973_v40 = vpop.permute.xlu0 %1972 }
 0x901   :  { %v2010_v19 = vmul.f32 %v1973_v40, %v7016_v59  ;;  %5411 = vmatprep.mubr.msk.bf16.mxu1 %vm119_vm0, %v2020_v14  ;;  %v6185_v40 = vld [vmem:[%s8795_s1 + $0x38] sm:$0xff] }
 0x903   :  { %v2021_v11 = vpack.c.bf16 %v2011_v24, %v2010_v19  ;;  %v1979_v32 = vpop.permute.xlu1 %1978 }
 0x904   :  { %v2013_v22 = vmul.f32 %v1979_v32, %v7020_v12  ;;  %v1977_v43 = vpop.permute.xlu0 %1976  ;;  %v7062_v12 = vld [vmem:[%s8796_s15] sm:$0xff] }
 0x905   :  { %v2012_v38 = vmul.f32 %v1977_v43, %v7022_v1  ;;  %5412 = vmatmul.mubr.msk.bf16.gmra.mrb[40].mxu1 %vm119_vm0, %v2021_v11  ;;  %v7066_v1 = vrot.slane %v7062_v12, %v6438_v36 }
 0x907   :  { %v2022_v0 = vpack.c.bf16 %v2013_v22, %v2012_v38  ;;  %v1983_v5 = vpop.permute.xlu1 %1982  ;;  %v6186_v22 = vld [vmem:[%s8795_s1 + $0x40] sm:$0xff] }
 0x908   :  { %v2015_v17 = vmul.f32 %v1983_v5, %v7026_v33  ;;  %v1981_v21 = vpop.permute.xlu0 %1980 }
 0x909   :  { %v2014_v37 = vmul.f32 %v1981_v21, %v1902_v60  ;;  %5415 = vmatprep.mubr.msk.bf16.mxu1 %vm119_vm0, %v2022_v0  ;;  %v6178_v60 = vld [vmem:[%s8795_s1] sm:$0xff] }
 0x90b   :  { %v2023_v59 = vpack.c.bf16 %v2015_v17, %v2014_v37  ;;  %v6187_v17 = vld [vmem:[%s8795_s1 + $0x48] sm:$0xff]  ;;  %v6188_v37 = vld [vmem:[%s8795_s1 + $0x50] sm:$0xff] }
 0x90d   :  { %5416 = vmatmul.mubr.msk.bf16.gmra.mrb[44].mxu1 %vm119_vm0, %v2023_v59 }
 0x9c8   :  { %v5405_v23 = vpop.f32.mrb[32].mxu1 }
 0x9c9   :  { %v2102_v6 = vpop.f32.mrb[33].mxu1  ;;  %v2111_v61 = vadd.f32 %v5405_v23, %v7066_v1 }
 0x9ca   :  { %v2103_v33 = vadd.f32 %v2102_v6, %v7066_v1  ;;  %v5406_v25 = vpop.f32.mrb[34].mxu1 }
 0x9cb   :  { %v2105_v31 = vpop.f32.mrb[35].mxu1  ;;  %v2114_v42 = vadd.f32 %v5406_v25, %v7066_v1  ;;  %v7087_v46 = vadd.f32 %v6180_v52, %v2111_v61  ;;  %v6189_v61 = vld [vmem:[%s8795_s1 + $0x58] sm:$0xff]  ;;  %v6190_v52 = vld [vmem:[%s8795_s1 + $0x60] sm:$0xff] }
 0x9cc   :  { %v2106_v58 = vadd.f32 %v2105_v31, %v7066_v1  ;;  %v7074_v28 = vadd.f32 %v6178_v60, %v2103_v33 }
 0x9cd   :  { %v2187_v4 = vsel %vm119_vm0, %v7087_v46, 0.0  ;;  %v7098_v35 = vadd.f32 %v6181_v29, %v2114_v42 }
 0x9ce   :  { %v2181_v20 = vsel %vm119_vm0, %v7074_v28, 0.0  ;;  %v7082_v50 = vadd.f32 %v6179_v57, %v2106_v58 }
 0x9cf   :  { %2182 = vadd.xlane.f32.xlu0 %v2181_v20  ;;  %v2190_v10 = vsel %vm119_vm0, %v7098_v35, 0.0 }
 0x9d0   :  { %v5409_v51 = vpop.f32.mrb[36].mxu1  ;;  %v2184_v63 = vsel %vm119_vm0, %v7082_v50, 0.0 }
 0x9d1   :  { %v2127_v62 = vadd.f32 %v5409_v51, %v7066_v1  ;;  %2185 = vadd.xlane.f32.xlu1 %v2184_v63  ;;  %v2118_v15 = vpop.f32.mrb[37].mxu1 }
 0x9d2   :  { %v2119_v27 = vadd.f32 %v2118_v15, %v7066_v1  ;;  %v5410_v56 = vpop.f32.mrb[38].mxu1 }
 0x9d3   :  { %2188 = vadd.xlane.f32.xlu0 %v2187_v4  ;;  %v2121_v49 = vpop.f32.mrb[39].mxu1  ;;  %v7109_v34 = vadd.f32 %v6183_v26, %v2127_v62  ;;  %v2130_v48 = vadd.f32 %v5410_v56, %v7066_v1  ;;  %v6192_v4 = vld [vmem:[%s8795_s1 + $0x70] sm:$0xff] }
 0x9d4   :  { %v2122_v18 = vadd.f32 %v2121_v49, %v7066_v1  ;;  %v7104_v8 = vadd.f32 %v6182_v55, %v2119_v27  ;;  %v6191_v27 = vld [vmem:[%s8795_s1 + $0x68] sm:$0xff] }
 0x9d5   :  { %v2199_v39 = vsel %vm119_vm0, %v7109_v34, 0.0  ;;  %v7130_v19 = vadd.f32 %v6185_v40, %v2130_v48 }
 0x9d6   :  { %v2193_v30 = vsel %vm119_vm0, %v7104_v8, 0.0  ;;  %v7119_v53 = vadd.f32 %v6184_v54, %v2122_v18  ;;  %v6193_v18 = vld [vmem:[%s8795_s1 + $0x78] sm:$0xff] }
 0x9d7   :  { %2191 = vadd.xlane.f32.xlu0 %v2190_v10  ;;  %2194 = vadd.xlane.f32.xlu1 %v2193_v30  ;;  %v2202_v0 = vsel %vm119_vm0, %v7130_v19, 0.0 }
 0x9d8   :  { %v5413_v44 = vpop.f32.mrb[40].mxu1  ;;  %v2196_v24 = vsel %vm119_vm0, %v7119_v53, 0.0 }
 0x9d9   :  { %v2134_v2 = vpop.f32.mrb[41].mxu1  ;;  %v2143_v9 = vadd.f32 %v5413_v44, %v7066_v1 }
 0x9da   :  { %v2135_v14 = vadd.f32 %v2134_v2, %v7066_v1  ;;  %v5414_v47 = vpop.f32.mrb[42].mxu1 }
 0x9db   :  { %v2137_v11 = vpop.f32.mrb[43].mxu1  ;;  %2197 = vadd.xlane.f32.xlu0 %v2196_v24  ;;  %2200 = vadd.xlane.f32.xlu1 %v2199_v39  ;;  %v2146_v38 = vadd.f32 %v5414_v47, %v7066_v1  ;;  %v7151_v59 = vadd.f32 %v6188_v37, %v2143_v9 }
 0x9dc   :  { %v2138_v32 = vadd.f32 %v2137_v11, %v7066_v1  ;;  %v7136_v43 = vadd.f32 %v6186_v22, %v2135_v14 }
 0x9dd   :  { %v7156_v33 = vadd.f32 %v6189_v61, %v2146_v38  ;;  %v2211_v42 = vsel %vm119_vm0, %v7151_v59, 0.0 }
 0x9de   :  { %v2205_v5 = vsel %vm119_vm0, %v7136_v43, 0.0  ;;  %v7146_v21 = vadd.f32 %v6187_v17, %v2138_v32 }
 0x9df   :  { %2203 = vadd.xlane.f32.xlu0 %v2202_v0  ;;  %2206 = vadd.xlane.f32.xlu1 %v2205_v5  ;;  %v2214_v63 = vsel %vm119_vm0, %v7156_v33, 0.0 }
 0x9e0   :  { %v5417_v23 = vpop.f32.mrb[44].mxu1  ;;  %v2208_v60 = vsel %vm119_vm0, %v7146_v21, 0.0 }
 0x9e1   :  { %v2150_v6 = vpop.f32.mrb[45].mxu1  ;;  %v2159_v25 = vadd.f32 %v5417_v23, %v7066_v1 }
 0x9e2   :  { %v2151_v31 = vadd.f32 %v2150_v6, %v7066_v1  ;;  %v5418_v58 = vpop.f32.mrb[46].mxu1 }
 0x9e3   :  { %v2153_v20 = vpop.f32.mrb[47].mxu1  ;;  %2209 = vadd.xlane.f32.xlu0 %v2208_v60  ;;  %2212 = vadd.xlane.f32.xlu1 %v2211_v42  ;;  %v2162_v62 = vadd.f32 %v5418_v58, %v7066_v1  ;;  %v7183_v29 = vadd.f32 %v6192_v4, %v2159_v25 }
 0x9e4   :  { %v2154_v57 = vadd.f32 %v2153_v20, %v7066_v1  ;;  %v7168_v51 = vadd.f32 %v6190_v52, %v2151_v31 }
 0x9e5   :  { %v2223_v49 = vsel %vm119_vm0, %v7183_v29, 0.0  ;;  %v7192_v55 = vadd.f32 %v6193_v18, %v2162_v62 }
 0x9e6   :  { %v2217_v15 = vsel %vm119_vm0, %v7168_v51, 0.0  ;;  %v7178_v56 = vadd.f32 %v6191_v27, %v2154_v57 }
 0x9e7   :  { %2215 = vadd.xlane.f32.xlu0 %v2214_v63  ;;  %2218 = vadd.xlane.f32.xlu1 %v2217_v15  ;;  %v2226_v26 = vsel %vm119_vm0, %v7192_v55, 0.0 }
 0x9e8   :  { %v2220_v1 = vsel %vm119_vm0, %v7178_v56, 0.0 }
 0x9eb   :  { %2221 = vadd.xlane.f32.xlu0 %v2220_v1  ;;  %2224 = vadd.xlane.f32.xlu1 %v2223_v49 }
 0x9ef   :  { %2227 = vadd.xlane.f32.xlu0 %v2226_v26  ;;  %v7249_v26 = vsub.s32 5, %v6326_v3 }
 0xa5c   :  { %v2183_v48 = vpop.xlane.xlu0 %2182 }
 0xa5d   :  { %v2229_v10 = vmul.f32 0.03125, %v2183_v48 }
 0xa5e   :  { %v2186_v30 = vpop.xlane.xlu1 %2185 }
 0xa5f   :  { %v7197_v54 = vsub.f32 %v7074_v28, %v2229_v10  ;;  %v2230_v44 = vmul.f32 0.03125, %v2186_v30 }
 0xa60   :  { %v2189_v2 = vpop.xlane.xlu0 %2188 }
 0xa61   :  { %v7200_v39 = vsub.f32 %v7082_v50, %v2230_v44  ;;  %v2231_v9 = vmul.f32 0.03125, %v2189_v2  ;;  %v2261_v14 = vmul.f32 %v7197_v54, %v7197_v54 }
 0xa63   :  { %v7205_v47 = vsub.f32 %v7087_v46, %v2231_v9  ;;  %v2277_v24 = vsel %vm119_vm0, %v2261_v14, 0.0  ;;  %v2262_v40 = vmul.f32 %v7200_v39, %v7200_v39 }
 0xa64   :  { %v2192_v11 = vpop.xlane.xlu0 %2191  ;;  %2278 = vadd.xlane.f32.xlu1 %v2277_v24  ;;  %v2195_v28 = vpop.xlane.xlu1 %2194 }
 0xa65   :  { %v2232_v32 = vmul.f32 0.03125, %v2192_v11  ;;  %v2233_v22 = vmul.f32 0.03125, %v2195_v28  ;;  %v2280_v50 = vsel %vm119_vm0, %v2262_v40, 0.0  ;;  %v2263_v38 = vmul.f32 %v7205_v47, %v7205_v47 }
 0xa66   :  { %2281 = vadd.xlane.f32.xlu0 %v2280_v50 }
 0xa67   :  { %v7214_v0 = vsub.f32 %v7098_v35, %v2232_v32  ;;  %v7217_v46 = vsub.f32 %v7104_v8, %v2233_v22  ;;  %v2283_v5 = vsel %vm119_vm0, %v2263_v38, 0.0 }
 0xa68   :  { %v2198_v17 = vpop.xlane.xlu0 %2197  ;;  %2284 = vadd.xlane.f32.xlu1 %v2283_v5  ;;  %v2201_v37 = vpop.xlane.xlu1 %2200 }
 0xa69   :  { %v2234_v23 = vmul.f32 0.03125, %v2198_v17  ;;  %v2235_v6 = vmul.f32 0.03125, %v2201_v37  ;;  %v2264_v61 = vmul.f32 %v7214_v0, %v7214_v0  ;;  %v2265_v25 = vmul.f32 %v7217_v46, %v7217_v46 }
 0xa6b   :  { %v7225_v31 = vsub.f32 %v7119_v53, %v2234_v23  ;;  %v7228_v35 = vsub.f32 %v7109_v34, %v2235_v6  ;;  %v2286_v8 = vsel %vm119_vm0, %v2264_v61, 0.0  ;;  %v2289_v58 = vsel %vm119_vm0, %v2265_v25, 0.0 }
 0xa6c   :  { %2287 = vadd.xlane.f32.xlu0 %v2286_v8  ;;  %v2204_v60 = vpop.xlane.xlu0 %2203  ;;  %2290 = vadd.xlane.f32.xlu1 %v2289_v58  ;;  %v2207_v42 = vpop.xlane.xlu1 %2206 }
 0xa6d   :  { %v2236_v20 = vmul.f32 0.03125, %v2204_v60  ;;  %v2237_v57 = vmul.f32 0.03125, %v2207_v42  ;;  %v2266_v52 = vmul.f32 %v7225_v31, %v7225_v31  ;;  %v2267_v53 = vmul.f32 %v7228_v35, %v7228_v35 }
 0xa6f   :  { %v7237_v63 = vsub.f32 %v7130_v19, %v2236_v20  ;;  %v7240_v34 = vsub.f32 %v7136_v43, %v2237_v57  ;;  %v2292_v62 = vsel %vm119_vm0, %v2266_v52, 0.0  ;;  %v2295_v15 = vsel %vm119_vm0, %v2267_v53, 0.0  ;;  %v8855_v53 = vld [vmem:[#allocation7_spill] sm:$0xff] }
 0xa70   :  { %2293 = vadd.xlane.f32.xlu0 %v2292_v62  ;;  %v2210_v27 = vpop.xlane.xlu0 %2209  ;;  %2296 = vadd.xlane.f32.xlu1 %v2295_v15  ;;  %v2213_v4 = vpop.xlane.xlu1 %2212 }
 0xa71   :  { %v2238_v1 = vmul.f32 0.03125, %v2210_v27  ;;  %v2239_v49 = vmul.f32 0.03125, %v2213_v4  ;;  %v2268_v18 = vmul.f32 %v7237_v63, %v7237_v63  ;;  %v2269_v19 = vmul.f32 %v7240_v34, %v7240_v34  ;;  %v8858_v4 = vld [vmem:[#allocation8_spill] sm:$0xff] }
 0xa73   :  { %v7252_v43 = vsub.f32 %v7146_v21, %v2238_v1  ;;  %v7255_v48 = vsub.f32 %v7151_v59, %v2239_v49  ;;  %v2298_v10 = vsel %vm119_vm0, %v2268_v18, 0.0  ;;  %v2301_v30 = vsel %vm119_vm0, %v2269_v19, 0.0  ;;  %v6194_v59 = vld [vmem:[%s8842_s4] sm:$0xff] }
 0xa74   :  { %2299 = vadd.xlane.f32.xlu0 %v2298_v10  ;;  %v2216_v44 = vpop.xlane.xlu0 %2215  ;;  %2302 = vadd.xlane.f32.xlu1 %v2301_v30  ;;  %v2219_v2 = vpop.xlane.xlu1 %2218  ;;  %v796_v24 = vrot.slane %v6194_v59, %v7249_v26  ;;  %v5715_v10 = vld [vmem:[%s8800_s12] sm:$0xff]   ;;  %v5716_v30 = vld [vmem:[%s8800_s12 + $0x8] sm:$0xff]  }
 0xa75   :  { %v2240_v9 = vmul.f32 0.03125, %v2216_v44  ;;  %v2241_v14 = vmul.f32 0.03125, %v2219_v2  ;;  %v2270_v3 = vmul.f32 %v7252_v43, %v7252_v43  ;;  %v2271_v21 = vmul.f32 %v7255_v48, %v7255_v48  ;;  %5419 = vmatprep.subr.bf16.mxu0 %v5715_v10 }
 0xa76   :  { %v863_v37 = vadd.f32 %v6658_v13, %v796_v24  ;;  %5420 = vmatpush3.bf16.msra.mxu0 %v5715_v10 }
 0xa77   :  { %v7268_v40 = vsub.f32 %v7156_v33, %v2240_v9  ;;  %v7271_v11 = vsub.f32 %v7168_v51, %v2241_v14  ;;  %v2304_v28 = vsel %vm119_vm0, %v2270_v3, 0.0  ;;  %v2307_v32 = vsel %vm119_vm0, %v2271_v21, 0.0  ;;  %5421 = vmatprep.subr.bf16.mxu0 %v5716_v30 }
 0xa78   :  { %2305 = vadd.xlane.f32.xlu0 %v2304_v28  ;;  %v2222_v22 = vpop.xlane.xlu0 %2221  ;;  %2308 = vadd.xlane.f32.xlu1 %v2307_v32  ;;  %v2225_v50 = vpop.xlane.xlu1 %2224  ;;  %v7294_v60 = vadd.f32 %v863_v37, %v6476_v45 }
 0xa79   :  { %v2242_v38 = vmul.f32 0.03125, %v2222_v22  ;;  %v2243_v5 = vmul.f32 0.03125, %v2225_v50  ;;  %v2272_v17 = vmul.f32 %v7268_v40, %v7268_v40  ;;  %v2273_v33 = vmul.f32 %v7271_v11, %v7271_v11 }
 0xa7a   :  { %5422 = vmatpush3.bf16.msra.mxu0 %v5716_v30 }
 0xa7b   :  { %v7281_v51 = vsub.f32 %v7178_v56, %v2242_v38  ;;  %v7284_v23 = vsub.f32 %v7183_v29, %v2243_v5  ;;  %v2310_v6 = vsel %vm119_vm0, %v2272_v17, 0.0  ;;  %v2313_v61 = vsel %vm119_vm0, %v2273_v33, 0.0 }
 0xa7c   :  { %2311 = vadd.xlane.f32.xlu0 %v2310_v6  ;;  %v2228_v25 = vpop.xlane.xlu0 %2227  ;;  %2314 = vadd.xlane.f32.xlu1 %v2313_v61  ;;  %v871_v56 = vadd.f32 %v6656_v7, %v796_v24  ;;  %v866_v29 = vadd.f32 %v6662_v16, %v796_v24  ;;  %v8856_v7 = vld [vmem:[#allocation10_spill] sm:$0xff]  ;;  %v881_v16 = vsel %vm119_vm0, %v7294_v60, 0.0 }
 0xa7d   :  { %v2244_v8 = vmul.f32 0.03125, %v2228_v25  ;;  %v2274_v58 = vmul.f32 %v7281_v51, %v7281_v51  ;;  %v2275_v13 = vmul.f32 %v7284_v23, %v7284_v23  ;;  %v874_v45 = vadd.f32 %v8856_v7, %v796_v24  ;;  %v8859_v25 = vld [vmem:[#allocation4_spill] sm:$0xff] }
 0xa7e   :  { %v7305_v62 = vadd.f32 %v871_v56, %v8855_v53 }
 0xa7f   :  { %v7298_v42 = vsub.f32 %v7192_v55, %v2244_v8  ;;  %v2316_v20 = vsel %vm119_vm0, %v2274_v58, 0.0  ;;  %v2319_v57 = vsel %vm119_vm0, %v2275_v13, 0.0  ;;  %v8857_v55 = vld [vmem:[#allocation6_spill] sm:$0xff]  ;;  %v7315_v1 = vadd.f32 %v874_v45, %v8858_v4  ;;  %v8860_v45 = vld [vmem:[#allocation5_spill] sm:$0xff] }
 0xa80   :  { %2317 = vadd.xlane.f32.xlu0 %v2316_v20  ;;  %2320 = vadd.xlane.f32.xlu1 %v2319_v57  ;;  %v7312_v27 = vadd.f32 %v866_v29, %v8857_v55  ;;  %v887_v18 = vsel %vm119_vm0, %v7305_v62, 0.0  ;;  %v7331_v8 = vrot.slane %v7062_v12, %v8859_v25 }
 0xa81   :  { %v2276_v52 = vmul.f32 %v7298_v42, %v7298_v42  ;;  %v890_v19 = vsel %vm119_vm0, %v7315_v1, 0.0 }
 0xa82   :  { %v884_v49 = vsel %vm119_vm0, %v7312_v27, 0.0 }
 0xa83   :  { %v2322_v15 = vsel %vm119_vm0, %v2276_v52, 0.0 }
 0xa84   :  { %2323 = vadd.xlane.f32.xlu0 %v2322_v15  ;;  %882 = vadd.xlane.f32.xlu1 %v881_v16  ;;  %v7336_v15 = vrot.slane %v7062_v12, %v8860_v45 }
 0xa88   :  { %885 = vadd.xlane.f32.xlu0 %v884_v49  ;;  %888 = vadd.xlane.f32.xlu1 %v887_v18 }
 0xa8c   :  { %891 = vadd.xlane.f32.xlu0 %v890_v19 }
 0xaf1   :  { %v2279_v44 = vpop.xlane.xlu1 %2278 }
 0xaf2   :  { %v2325_v2 = vmul.f32 0.03125, %v2279_v44 }
 0xaf3   :  { %v2282_v9 = vpop.xlane.xlu0 %2281 }
 0xaf4   :  { %v2341_v14 = vadd.f32 1e-05, %v2325_v2  ;;  %v2326_v3 = vmul.f32 0.03125, %v2282_v9 }
 0xaf5   :  { %v2285_v21 = vpop.xlane.xlu1 %2284 }
 0xaf6   :  { %5921 = vrsqrt.f32 %v2341_v14  ;;  %v2342_v59 = vadd.f32 1e-05, %v2326_v3  ;;  %v2327_v24 = vmul.f32 0.03125, %v2285_v21 }
 0xaf8   :  { %5923 = vrsqrt.f32 %v2342_v59  ;;  %v2343_v28 = vadd.f32 1e-05, %v2327_v24 }
 0xaf9   :  { %v2288_v32 = vpop.xlane.xlu0 %2287  ;;  %v2291_v22 = vpop.xlane.xlu1 %2290 }
 0xafa   :  { %5925 = vrsqrt.f32 %v2343_v28  ;;  %v2328_v50 = vmul.f32 0.03125, %v2288_v32  ;;  %v2329_v38 = vmul.f32 0.03125, %v2291_v22 }
 0xafc   :  { %v2344_v5 = vadd.f32 1e-05, %v2328_v50  ;;  %v2345_v17 = vadd.f32 1e-05, %v2329_v38 }
 0xafd   :  { %v2294_v33 = vpop.xlane.xlu0 %2293  ;;  %v2297_v37 = vpop.xlane.xlu1 %2296 }
 0xafe   :  { %5927 = vrsqrt.f32 %v2344_v5  ;;  %v2330_v6 = vmul.f32 0.03125, %v2294_v33  ;;  %v2331_v61 = vmul.f32 0.03125, %v2297_v37 }
 0xaff   :  { %5929 = vrsqrt.f32 %v2345_v17 }
 0xb00   :  { %v5922_v58 = vpop.eup %5921  ;;  %v2346_v13 = vadd.f32 1e-05, %v2330_v6  ;;  %v2347_v56 = vadd.f32 1e-05, %v2331_v61 }
 0xb01   :  { %v2300_v29 = vpop.xlane.xlu0 %2299  ;;  %v2303_v20 = vpop.xlane.xlu1 %2302  ;;  %v2373_v57 = vmul.f32 %v5922_v58, %v7197_v54 }
 0xb02   :  { %v5924_v52 = vpop.eup %5923  ;;  %5931 = vrsqrt.f32 %v2346_v13  ;;  %v2332_v53 = vmul.f32 0.03125, %v2300_v29  ;;  %v2333_v7 = vmul.f32 0.03125, %v2303_v20 }
 0xb03   :  { %5933 = vrsqrt.f32 %v2347_v56  ;;  %v2374_v16 = vmul.f32 %v5924_v52, %v7200_v39  ;;  %v2393_v55 = vmul.f32 %v7331_v8, %v2373_v57 }
 0xb04   :  { %v5926_v4 = vpop.eup %5925  ;;  %v2348_v49 = vadd.f32 1e-05, %v2332_v53  ;;  %v2349_v18 = vadd.f32 1e-05, %v2333_v7 }
 0xb05   :  { %v2375_v19 = vmul.f32 %v5926_v4, %v7205_v47  ;;  %v2306_v10 = vpop.xlane.xlu0 %2305  ;;  %v2309_v54 = vpop.xlane.xlu1 %2308  ;;  %v2394_v30 = vmul.f32 %v7331_v8, %v2374_v16  ;;  %v7343_v9 = vadd.f32 %v7336_v15, %v2393_v55 }
 0xb06   :  { %5935 = vrsqrt.f32 %v2348_v49  ;;  %v2334_v44 = vmul.f32 0.03125, %v2306_v10  ;;  %v2335_v2 = vmul.f32 0.03125, %v2309_v54 }
 0xb07   :  { %5937 = vrsqrt.f32 %v2349_v18  ;;  %v7346_v39 = vadd.f32 %v7336_v15, %v2394_v30  ;;  %v2395_v47 = vmul.f32 %v7331_v8, %v2375_v19 }
 0xb08   :  { %v5928_v14 = vpop.eup %5927  ;;  %v2350_v3 = vadd.f32 1e-05, %v2334_v44  ;;  %v2351_v21 = vadd.f32 1e-05, %v2335_v2 }
 0xb09   :  { %v5930_v59 = vpop.eup %5929  ;;  %v2376_v24 = vmul.f32 %v5928_v14, %v7214_v0  ;;  %v2312_v28 = vpop.xlane.xlu0 %2311  ;;  %v2429_v22 = vpack.c.bf16 %v7346_v39, %v7343_v9  ;;  %v7356_v0 = vadd.f32 %v7336_v15, %v2395_v47 }
 0xb0a   :  { %v2315_v32 = vpop.xlane.xlu1 %2314  ;;  %5939 = vrsqrt.f32 %v2350_v3  ;;  %v2336_v50 = vmul.f32 0.03125, %v2312_v28  ;;  %v2377_v5 = vmul.f32 %v5930_v59, %v7217_v46 }
 0xb0b   :  { %v2337_v38 = vmul.f32 0.03125, %v2315_v32  ;;  %v2396_v17 = vmul.f32 %v7331_v8, %v2376_v24  ;;  %5941 = vrsqrt.f32 %v2351_v21  ;;  %5423 = vmatprep.mubr.msk.bf16.mxu0 %vm119_vm0, %v2429_v22 }
 0xb0c   :  { %v5932_v33 = vpop.eup %5931  ;;  %v2352_v37 = vadd.f32 1e-05, %v2336_v50  ;;  %v2397_v46 = vmul.f32 %v7331_v8, %v2377_v5 }
 0xb0d   :  { %v2353_v6 = vadd.f32 1e-05, %v2337_v38  ;;  %v5934_v61 = vpop.eup %5933  ;;  %v7359_v58 = vadd.f32 %v7336_v15, %v2396_v17  ;;  %v2318_v13 = vpop.xlane.xlu0 %2317  ;;  %v2378_v29 = vmul.f32 %v5932_v33, %v7225_v31 }
 0xb0e   :  { %v2321_v56 = vpop.xlane.xlu1 %2320  ;;  %5943 = vrsqrt.f32 %v2352_v37  ;;  %v2338_v20 = vmul.f32 0.03125, %v2318_v13  ;;  %v2379_v7 = vmul.f32 %v5934_v61, %v7228_v35  ;;  %v7369_v19 = vadd.f32 %v7336_v15, %v2397_v46 }
 0xb0f   :  { %v2339_v57 = vmul.f32 0.03125, %v2321_v56  ;;  %5945 = vrsqrt.f32 %v2353_v6  ;;  %v2430_v52 = vpack.c.bf16 %v7359_v58, %v7356_v0  ;;  %v2398_v53 = vmul.f32 %v7331_v8, %v2378_v29 }
 0xb10   :  { %v5936_v16 = vpop.eup %5935  ;;  %v2354_v55 = vadd.f32 1e-05, %v2338_v20  ;;  %v2399_v30 = vmul.f32 %v7331_v8, %v2379_v7 }
 0xb11   :  { %v2355_v4 = vadd.f32 1e-05, %v2339_v57  ;;  %v5938_v49 = vpop.eup %5937  ;;  %v2324_v18 = vpop.xlane.xlu0 %2323  ;;  %5424 = vmatmul.mubr.msk.bf16.vlgmr.msra.gmra.mrb[44].mxu0 %vm119_vm0, %v2430_v52  ;;  %v7372_v10 = vadd.f32 %v7336_v15, %v2398_v53  ;;  %v2380_v54 = vmul.f32 %v5936_v16, %v7237_v63 }
 0xb12   :  { %v883_v31 = vpop.xlane.xlu1 %882  ;;  %5947 = vrsqrt.f32 %v2354_v55  ;;  %v2340_v35 = vmul.f32 0.03125, %v2324_v18  ;;  %v2381_v2 = vmul.f32 %v5938_v49, %v7240_v34  ;;  %v7386_v34 = vadd.f32 %v7336_v15, %v2399_v30 }
 0xb13   :  { %v893_v44 = vmul.f32 0.03125, %v883_v31  ;;  %5949 = vrsqrt.f32 %v2355_v4  ;;  %v2431_v14 = vpack.c.bf16 %v7372_v10, %v7369_v19  ;;  %v2400_v3 = vmul.f32 %v7331_v8, %v2380_v54 }
 0xb14   :  { %v5940_v21 = vpop.eup %5939  ;;  %v2356_v59 = vadd.f32 1e-05, %v2340_v35  ;;  %v2401_v63 = vmul.f32 %v7331_v8, %v2381_v2 }
 0xb15   :  { %v7381_v47 = vsub.f32 %v7294_v60, %v893_v44  ;;  %v5942_v24 = vpop.eup %5941  ;;  %v886_v28 = vpop.xlane.xlu0 %885  ;;  %5427 = vmatprep.mubr.msk.bf16.mxu0 %vm119_vm0, %v2431_v14  ;;  %v7389_v22 = vadd.f32 %v7336_v15, %v2400_v3  ;;  %v2382_v50 = vmul.f32 %v5940_v21, %v7252_v43 }
 0xb16   :  { %v889_v32 = vpop.xlane.xlu1 %888  ;;  %5951 = vrsqrt.f32 %v2356_v59  ;;  %v894_v38 = vmul.f32 0.03125, %v886_v28  ;;  %v2383_v37 = vmul.f32 %v5942_v24, %v7255_v48  ;;  %v7406_v56 = vadd.f32 %v7336_v15, %v2401_v63 }
 0xb17   :  { %v895_v5 = vmul.f32 0.03125, %v889_v32  ;;  %v901_v60 = vmul.f32 %v7381_v47, %v7381_v47  ;;  %v2432_v17 = vpack.c.bf16 %v7389_v22, %v7386_v34  ;;  %v2402_v33 = vmul.f32 %v7331_v8, %v2382_v50 }
 0xb18   :  { %v5944_v6 = vpop.eup %5943  ;;  %v7399_v61 = vsub.f32 %v7312_v27, %v894_v38  ;;  %v2403_v27 = vmul.f32 %v7331_v8, %v2383_v37  ;;  %v5720_v38 = vld [vmem:[%s8801_s13 + $0x18] sm:$0xff]  }
 0xb19   :  { %v7402_v13 = vsub.f32 %v7305_v62, %v895_v5  ;;  %v905_v43 = vsel %vm119_vm0, %v901_v60, 0.0  ;;  %v5946_v29 = vpop.eup %5945  ;;  %v892_v46 = vpop.xlane.xlu0 %891  ;;  %5428 = vmatmul.mubr.msk.bf16.gmra.mrb[48].mxu0 %vm119_vm0, %v2432_v17  ;;  %v7410_v20 = vadd.f32 %v7336_v15, %v2402_v33  ;;  %v2384_v48 = vmul.f32 %v5944_v6, %v7268_v40  ;;  %v5721_v5 = vld [vmem:[%s8802_s17] sm:$0xff]   ;;  %v8862_v37 = vld [vmem:[#allocation9_spill] sm:$0xff] }
 0xb1a   :  { %906 = vadd.xlane.f32.xlu1 %v905_v43  ;;  %v896_v57 = vmul.f32 0.03125, %v892_v46  ;;  %v902_v62 = vmul.f32 %v7399_v61, %v7399_v61  ;;  %v2385_v53 = vmul.f32 %v5946_v29, %v7271_v11  ;;  %v7430_v11 = vadd.f32 %v7336_v15, %v2403_v27  ;;  %v7483_v60 = vld [vmem:[%s8803_s22] sm:$0xff] }
 0xb1b   :  { %v903_v52 = vmul.f32 %v7402_v13, %v7402_v13  ;;  %v2433_v7 = vpack.c.bf16 %v7410_v20, %v7406_v56  ;;  %v2404_v16 = vmul.f32 %v7331_v8, %v2384_v48  ;;  %v8861_v17 = vld [vmem:[#allocation2_spill] sm:$0xff]  ;;  %v7490_v6 = vrot.slane %v7062_v12, %v8862_v37 }
 0xb1c   :  { %v5948_v55 = vpop.eup %5947  ;;  %v7423_v4 = vsub.f32 %v7315_v1, %v896_v57  ;;  %v908_v40 = vsel %vm119_vm0, %v902_v62, 0.0  ;;  %v2405_v18 = vmul.f32 %v7331_v8, %v2385_v53  ;;  %v3258_v33 = vrot.slane %v7483_v60, %v8861_v17 }
 0xb1d   :  { %v911_v49 = vsel %vm119_vm0, %v903_v52, 0.0  ;;  %v5950_v31 = vpop.eup %5949  ;;  %909 = vadd.xlane.f32.xlu0 %v908_v40  ;;  %5431 = vmatprep.mubr.msk.bf16.mxu0 %vm119_vm0, %v2433_v7  ;;  %v7433_v54 = vadd.f32 %v7336_v15, %v2404_v16  ;;  %v2386_v30 = vmul.f32 %v5948_v55, %v7281_v51 }
 0xb1e   :  { %912 = vadd.xlane.f32.xlu1 %v911_v49  ;;  %v904_v1 = vmul.f32 %v7423_v4, %v7423_v4  ;;  %v2387_v35 = vmul.f32 %v5950_v31, %v7284_v23  ;;  %v7444_v21 = vadd.f32 %v7336_v15, %v2405_v18 }
 0xb1f   :  { %v2434_v44 = vpack.c.bf16 %v7433_v54, %v7430_v11  ;;  %v2406_v2 = vmul.f32 %v7331_v8, %v2386_v30 }
 0xb20   :  { %v5952_v14 = vpop.eup %5951  ;;  %v914_v3 = vsel %vm119_vm0, %v904_v1, 0.0  ;;  %v2407_v23 = vmul.f32 %v7331_v8, %v2387_v35 }
 0xb21   :  { %915 = vadd.xlane.f32.xlu0 %v914_v3  ;;  %5432 = vmatmul.mubr.msk.bf16.gmra.mrb[52].mxu0 %vm119_vm0, %v2434_v44  ;;  %v7448_v51 = vadd.f32 %v7336_v15, %v2406_v2  ;;  %v2388_v59 = vmul.f32 %v5952_v14, %v7298_v42  ;;  %v5717_v42 = vld [vmem:[%s8801_s13] sm:$0xff]  }
 0xb22   :  { %v7457_v28 = vadd.f32 %v7336_v15, %v2407_v23  ;;  %5439 = vmatprep.subr.bf16.mxu1 %v5717_v42 }
 0xb23   :  { %v2435_v63 = vpack.c.bf16 %v7448_v51, %v7444_v21  ;;  %v2408_v24 = vmul.f32 %v7331_v8, %v2388_v59  ;;  %v5718_v8 = vld [vmem:[%s8801_s13 + $0x8] sm:$0xff]   ;;  %5440 = vmatpush3.bf16.msra.mxu1 %v5717_v42 }
 0xb24   :  { %5441 = vmatprep.subr.bf16.mxu1 %v5718_v8 }
 0xb25   :  { %5435 = vmatprep.mubr.msk.bf16.mxu0 %vm119_vm0, %v2435_v63  ;;  %v7460_v32 = vadd.f32 %v7336_v15, %v2408_v24  ;;  %v5719_v15 = vld [vmem:[%s8801_s13 + $0x10] sm:$0xff]   ;;  %v5722_v63 = vld [vmem:[%s8802_s17 + $0x8] sm:$0xff]  }
 0xb27   :  { %v2436_v50 = vpack.c.bf16 %v7460_v32, %v7457_v28  ;;  %5442 = vmatpush3.bf16.msra.mxu1 %v5718_v8 }
 0xb28   :  { %5443 = vmatprep.subr.bf16.mxu1 %v5719_v15 }
 0xb29   :  { %5436 = vmatmul.mubr.msk.bf16.gmra.mrb[56].mxu0 %vm119_vm0, %v2436_v50 }
 0xb2b   :  { %5444 = vmatpush3.bf16.msra.mxu1 %v5719_v15 }
 0xb2c   :  { %5445 = vmatprep.subr.bf16.mxu1 %v5720_v38 }
 0xb2f   :  { %5446 = vmatpush3.bf16.msra.mxu1 %v5720_v38  ;;  %3260 = vrot.lane.b32.xlu1 %v3258_v33, %s6198_s6 }
 0xb30   :  { %5483 = vmatprep.subr.bf16.mxu1 %v5721_v5 }
 0xba7   :  { %v907_v29 = vpop.xlane.xlu1 %906 }
 0xba8   :  { %v917_v53 = vmul.f32 0.03125, %v907_v29 }
 0xbaa   :  { %v910_v43 = vpop.xlane.xlu0 %909  ;;  %v921_v1 = vadd.f32 1e-05, %v917_v53 }
 0xbab   :  { %v918_v48 = vmul.f32 0.03125, %v910_v43  ;;  %v913_v35 = vpop.xlane.xlu1 %912 }
 0xbac   :  { %v919_v24 = vmul.f32 0.03125, %v913_v35 }
 0xbad   :  { %v922_v40 = vadd.f32 1e-05, %v918_v48 }
 0xbae   :  { %v916_v49 = vpop.xlane.xlu0 %915  ;;  %v923_v29 = vadd.f32 1e-05, %v919_v24 }
 0xbaf   :  { %v920_v2 = vmul.f32 0.03125, %v916_v49  ;;  %5953 = vrsqrt.f32 %v922_v40 }
 0xbb0   :  { %5955 = vrsqrt.f32 %v921_v1 }
 0xbb1   :  { %v924_v38 = vadd.f32 1e-05, %v920_v2 }
 0xbb3   :  { %5957 = vrsqrt.f32 %v924_v38 }
 0xbb4   :  { %5959 = vrsqrt.f32 %v923_v29 }
 0xbe4   :  { %v5425_v46 = vpop.f32.mrb[44].mxu0 }
 0xbe5   :  { %v2524_v27 = vadd.f32 %v5425_v46, %v7490_v6  ;;  %v2515_v57 = vpop.f32.mrb[45].mxu0 }
 0xbe6   :  { %v2516_v62 = vadd.f32 %v2515_v57, %v7490_v6  ;;  %v5426_v52 = vpop.f32.mrb[46].mxu0 }
 0xbe7   :  { %v2527_v7 = vadd.f32 %v5426_v52, %v7490_v6  ;;  %v2518_v16 = vpop.f32.mrb[47].mxu0  ;;  %v2580_v12 = vmax.f32 %v2524_v27, 0.0 }
 0xbe8   :  { %v2519_v55 = vadd.f32 %v2518_v16, %v7490_v6  ;;  %v2578_v31 = vmax.f32 %v2516_v62, 0.0 }
 0xbe9   :  { %v2581_v18 = vmax.f32 %v2527_v7, 0.0 }
 0xbea   :  { %v2579_v30 = vmax.f32 %v2519_v55, 0.0 }
 0xbeb   :  { %v2595_v44 = vpack.c.bf16 %v2581_v18, %v2580_v12  ;;  %v96_v18 = vld [vmem:[%s8842_s4 + $0x8] sm:$0x3] }
 0xbec   :  { %v2594_v14 = vpack.c.bf16 %v2579_v30, %v2578_v31  ;;  %v5429_v3 = vpop.f32.mrb[48].mxu0 }
 0xbed   :  { %v2540_v59 = vadd.f32 %v5429_v3, %v7490_v6  ;;  %v2531_v23 = vpop.f32.mrb[49].mxu0 }
 0xbee   :  { %v2532_v50 = vadd.f32 %v2531_v23, %v7490_v6  ;;  %v5430_v42 = vpop.f32.mrb[50].mxu0  ;;  %5447 = vmatprep.mubr.msk.bf16.mxu1 %vm821_vm2, %v2594_v14  ;;  %v936_v14 = vrot.slane %v96_v18, %v6417_v41 }
 0xbef   :  { %v2543_v8 = vadd.f32 %v5430_v42, %v7490_v6  ;;  %v2534_v15 = vpop.f32.mrb[51].mxu0  ;;  %5448 = vmatmul.mubr.msk.bf16.vlgmr.msra.gmra.mrb[48].mxu1 %vm821_vm2, %v2595_v44  ;;  %v2584_v33 = vmax.f32 %v2540_v59, 0.0 }
 0xbf0   :  { %v2535_v17 = vadd.f32 %v2534_v15, %v7490_v6  ;;  %5484 = vmatpush3.bf16.msra.mxu1 %v5721_v5  ;;  %v2582_v46 = vmax.f32 %v2532_v50, 0.0  ;;  %v5954_v5 = vpop.eup %5953 }
 0xbf1   :  { %v2585_v43 = vmax.f32 %v2543_v8, 0.0  ;;  %5485 = vmatprep.subr.bf16.mxu1 %v5722_v63  ;;  %v5956_v12 = vpop.eup %5955  ;;  %v930_v44 = vmul.f32 %v5954_v5, %v7399_v61 }
 0xbf2   :  { %v2583_v48 = vmax.f32 %v2535_v17, 0.0  ;;  %v929_v23 = vmul.f32 %v5956_v12, %v7381_v47  ;;  %v5958_v50 = vpop.eup %5957  ;;  %v8863_v47 = vld [vmem:[#allocation3_spill] sm:$0xff] }
 0xbf3   :  { %v2597_v27 = vpack.c.bf16 %v2585_v43, %v2584_v33  ;;  %v938_v15 = vmul.f32 %v936_v14, %v930_v44  ;;  %v5960_v17 = vpop.eup %5959  ;;  %v944_v29 = vrot.slane %v96_v18, %v8863_v47 }
 0xbf4   :  { %v2596_v57 = vpack.c.bf16 %v2583_v48, %v2582_v46  ;;  %v5433_v62 = vpop.f32.mrb[52].mxu0  ;;  %5486 = vmatpush3.bf16.msra.mxu1 %v5722_v63  ;;  %v937_v43 = vmul.f32 %v936_v14, %v929_v23  ;;  %v932_v46 = vmul.f32 %v5958_v50, %v7423_v4 }
 0xbf5   :  { %v2556_v52 = vadd.f32 %v5433_v62, %v7490_v6  ;;  %v2547_v53 = vpop.f32.mrb[53].mxu0 }
 0xbf6   :  { %v2548_v7 = vadd.f32 %v2547_v53, %v7490_v6  ;;  %v5434_v16 = vpop.f32.mrb[54].mxu0  ;;  %5451 = vmatprep.mubr.msk.bf16.mxu1 %vm821_vm2, %v2596_v57  ;;  %v931_v53 = vmul.f32 %v5960_v17, %v7402_v13  ;;  %v945_v5 = vadd.f32 %v944_v29, %v937_v43  ;;  %v7533_v13 = vld [vmem:[%s8804_s21] sm:$0xff] }
 0xbf7   :  { %v2559_v55 = vadd.f32 %v5434_v16, %v7490_v6  ;;  %v2550_v40 = vpop.f32.mrb[55].mxu0  ;;  %5452 = vmatmul.mubr.msk.bf16.gmra.mrb[52].mxu1 %vm821_vm2, %v2597_v27  ;;  %v2588_v31 = vmax.f32 %v2556_v52, 0.0  ;;  %v946_v52 = vadd.f32 %v944_v29, %v938_v15  ;;  %v3275_v18 = vsel %vm262_vm1, %v7533_v13, -inf }
 0xbf8   :  { %v2551_v49 = vadd.f32 %v2550_v40, %v7490_v6  ;;  %v2586_v1 = vmax.f32 %v2548_v7, 0.0  ;;  %3276 = vmax.xlane.f32.xlu1 %v3275_v18 }
 0xbf9   :  { %v2589_v30 = vmax.f32 %v2559_v55, 0.0  ;;  %v940_v55 = vmul.f32 %v936_v14, %v932_v46  ;;  %v3174_v40 = vpack.c.bf16 %v946_v52, %v945_v5 }
 0xbfa   :  { %v2587_v35 = vmax.f32 %v2551_v49, 0.0 }
 0xbfb   :  { %v2599_v2 = vpack.c.bf16 %v2589_v30, %v2588_v31  ;;  %v948_v4 = vadd.f32 %v944_v29, %v940_v55  ;;  %v6195_v31 = vld [vmem:[%s8796_s15] sm:$0xff] }
 0xbfc   :  { %v2598_v3 = vpack.c.bf16 %v2587_v35, %v2586_v1  ;;  %v5437_v59 = vpop.f32.mrb[56].mxu0  ;;  %v7541_v30 = vrot.slane %v6195_v31, %v7249_v26 }
 0xbfd   :  { %v2572_v63 = vadd.f32 %v5437_v59, %v7490_v6  ;;  %v2563_v24 = vpop.f32.mrb[57].mxu0 }
 0xbfe   :  { %v2564_v42 = vadd.f32 %v2563_v24, %v7490_v6  ;;  %v5438_v8 = vpop.f32.mrb[58].mxu0  ;;  %5455 = vmatprep.mubr.msk.bf16.mxu1 %vm821_vm2, %v2598_v3 }
 0xbff   :  { %v2575_v38 = vadd.f32 %v5438_v8, %v7490_v6  ;;  %v2566_v61 = vpop.f32.mrb[59].mxu0  ;;  %5456 = vmatmul.mubr.msk.bf16.gmra.mrb[56].mxu1 %vm821_vm2, %v2599_v2  ;;  %v2592_v48 = vmax.f32 %v2572_v63, 0.0 }
 0xc00   :  { %v2567_v33 = vadd.f32 %v2566_v61, %v7490_v6  ;;  %v2590_v57 = vmax.f32 %v2564_v42, 0.0  ;;  %v939_v6 = vmul.f32 %v936_v14, %v931_v53 }
 0xc01   :  { %v2593_v27 = vmax.f32 %v2575_v38, 0.0 }
 0xc02   :  { %v2591_v62 = vmax.f32 %v2567_v33, 0.0  ;;  %v947_v49 = vadd.f32 %v944_v29, %v939_v6 }
 0xc03   :  { %v2601_v7 = vpack.c.bf16 %v2593_v27, %v2592_v48 }
 0xc04   :  { %v2600_v16 = vpack.c.bf16 %v2591_v62, %v2590_v57  ;;  %v3175_v12 = vpack.c.bf16 %v948_v4, %v947_v49 }
 0xc06   :  { %5459 = vmatprep.mubr.msk.bf16.mxu1 %vm821_vm2, %v2600_v16 }
 0xc07   :  { %5460 = vmatmul.mubr.msk.bf16.gmra.mrb[60].mxu1 %vm821_vm2, %v2601_v7 }
 0xc08   :  { %5487 = vmatprep.mubr.msk.bf16.mxu1 %vm119_vm0, %v3174_v40 }
 0xc0f   :  { %5488 = vmatmul.mubr.msk.bf16.vlgmr.msra.gmra.mrb[64].mxu1 %vm119_vm0, %v3175_v12 }
 0xcc2   :  { %v5449_v1 = vpop.f32.mrb[48].mxu1 }
 0xcc3   :  { %v2705_v35 = vadd.f32 %v5449_v1, %v7541_v30  ;;  %v2696_v44 = vpop.f32.mrb[49].mxu1 }
 0xcc4   :  { %v2697_v2 = vadd.f32 %v2696_v44, %v7541_v30  ;;  %v5450_v14 = vpop.f32.mrb[50].mxu1 }
 0xcc5   :  { %v7546_v3 = vadd.f32 %v2705_v35, %v7356_v0  ;;  %v2708_v59 = vadd.f32 %v5450_v14, %v7541_v30  ;;  %v2699_v23 = vpop.f32.mrb[51].mxu1 }
 0xcc6   :  { %v2700_v63 = vadd.f32 %v2699_v23, %v7541_v30  ;;  %v7551_v24 = vadd.f32 %v2697_v2, %v7343_v9 }
 0xcc7   :  { %v7554_v50 = vadd.f32 %v2708_v59, %v7359_v58  ;;  %v2781_v42 = vsel %vm119_vm0, %v7546_v3, 0.0 }
 0xcc8   :  { %2782 = vadd.xlane.f32.xlu1 %v2781_v42  ;;  %v7559_v8 = vadd.f32 %v2700_v63, %v7346_v39  ;;  %v2775_v9 = vsel %vm119_vm0, %v7551_v24, 0.0 }
 0xcc9   :  { %v2784_v0 = vsel %vm119_vm0, %v7554_v50, 0.0 }
 0xcca   :  { %2785 = vadd.xlane.f32.xlu0 %v2784_v0  ;;  %v5453_v15 = vpop.f32.mrb[52].mxu1  ;;  %v2778_v29 = vsel %vm119_vm0, %v7559_v8, 0.0 }
 0xccb   :  { %v2721_v38 = vadd.f32 %v5453_v15, %v7541_v30  ;;  %v2712_v61 = vpop.f32.mrb[53].mxu1 }
 0xccc   :  { %v2713_v58 = vadd.f32 %v2712_v61, %v7541_v30  ;;  %v5454_v17 = vpop.f32.mrb[54].mxu1  ;;  %2776 = vadd.xlane.f32.xlu1 %v2775_v9 }
 0xccd   :  { %v7568_v33 = vadd.f32 %v2721_v38, %v7386_v34  ;;  %v2724_v39 = vadd.f32 %v5454_v17, %v7541_v30  ;;  %v2715_v43 = vpop.f32.mrb[55].mxu1 }
 0xcce   :  { %v2716_v46 = vadd.f32 %v2715_v43, %v7541_v30  ;;  %2779 = vadd.xlane.f32.xlu0 %v2778_v29  ;;  %v7575_v48 = vadd.f32 %v2713_v58, %v7369_v19  ;;  %v7659_v43 = vld [vmem:[%s8804_s21 + $0x8] sm:$0xff] }
 0xccf   :  { %v7578_v27 = vadd.f32 %v2724_v39, %v7389_v22  ;;  %v2793_v57 = vsel %vm119_vm0, %v7568_v33, 0.0  ;;  %v7590_v22 = vpop.permute.xlu1 %3260 }
 0xcd0   :  { %2794 = vadd.xlane.f32.xlu1 %v2793_v57  ;;  %v7583_v34 = vadd.f32 %v2716_v46, %v7372_v10  ;;  %v2787_v19 = vsel %vm119_vm0, %v7575_v48, 0.0 }
 0xcd1   :  { %v2796_v62 = vsel %vm119_vm0, %v7578_v27, 0.0 }
 0xcd2   :  { %2797 = vadd.xlane.f32.xlu0 %v2796_v62  ;;  %v5457_v52 = vpop.f32.mrb[56].mxu1  ;;  %v2790_v6 = vsel %vm119_vm0, %v7583_v34, 0.0 }
 0xcd3   :  { %v2737_v53 = vadd.f32 %v5457_v52, %v7541_v30  ;;  %v2728_v7 = vpop.f32.mrb[57].mxu1 }
 0xcd4   :  { %v2729_v16 = vadd.f32 %v2728_v7, %v7541_v30  ;;  %v5458_v5 = vpop.f32.mrb[58].mxu1  ;;  %2788 = vadd.xlane.f32.xlu1 %v2787_v19  ;;  %v7678_v7 = vld [vmem:[%s8804_s21 + $0x20] sm:$0xff] }
 0xcd5   :  { %v7594_v10 = vadd.f32 %v2737_v53, %v7430_v11  ;;  %v2740_v55 = vadd.f32 %v5458_v5, %v7541_v30  ;;  %v2731_v40 = vpop.f32.mrb[59].mxu1  ;;  %v3277_v11 = vpop.xlane.xlu1 %3276  ;;  %v3278_v5 = vsel %vm262_vm1, %v7659_v43, -inf }
 0xcd6   :  { %v2732_v4 = vadd.f32 %v2731_v40, %v7541_v30  ;;  %2791 = vadd.xlane.f32.xlu0 %v2790_v6  ;;  %v7601_v49 = vadd.f32 %v2729_v16, %v7406_v56  ;;  %v3299_v31 = vsub.f32 %v7533_v13, %v3277_v11  ;;  %v3287_v11 = vsel %vm262_vm1, %v7678_v7, -inf }
 0xcd7   :  { %v7604_v12 = vadd.f32 %v2740_v55, %v7433_v54  ;;  %v2805_v18 = vsel %vm119_vm0, %v7594_v10, 0.0 }
 0xcd8   :  { %2806 = vadd.xlane.f32.xlu1 %v2805_v18  ;;  %v7610_v1 = vadd.f32 %v2732_v4, %v7410_v20  ;;  %v3307_v56 = vmul.f32 1.442695, %v3299_v31  ;;  %v2799_v14 = vsel %vm119_vm0, %v7601_v49, 0.0  ;;  %v7695_v4 = vld [vmem:[%s8804_s21 + $0x18] sm:$0xff]  ;;  %v7702_v31 = vld [vmem:[%s8804_s21 + $0x30] sm:$0xff] }
 0xcd9   :  { %v2808_v35 = vsel %vm119_vm0, %v7604_v12, 0.0 }
 0xcda   :  { %2809 = vadd.xlane.f32.xlu0 %v2808_v35  ;;  %v5461_v44 = vpop.f32.mrb[60].mxu1  ;;  %5961 = vpow2.f32 %v3307_v56  ;;  %v2802_v42 = vsel %vm119_vm0, %v7610_v1, 0.0  ;;  %v7709_v56 = vld [vmem:[%s8804_s21 + $0x28] sm:$0xff] }
 0xcdb   :  { %v2753_v2 = vadd.f32 %v5461_v44, %v7541_v30  ;;  %v2744_v54 = vpop.f32.mrb[61].mxu1  ;;  %v3284_v44 = vsel %vm262_vm1, %v7695_v4, -inf }
 0xcdc   :  { %v2745_v59 = vadd.f32 %v2744_v54, %v7541_v30  ;;  %v5462_v23 = vpop.f32.mrb[62].mxu1  ;;  %2800 = vadd.xlane.f32.xlu1 %v2799_v14  ;;  %v3293_v54 = vsel %vm262_vm1, %v7702_v31, -inf }
 0xcdd   :  { %v7619_v20 = vadd.f32 %v2753_v2, %v7457_v28  ;;  %v2756_v13 = vadd.f32 %v5462_v23, %v7541_v30  ;;  %v2747_v63 = vpop.f32.mrb[63].mxu1  ;;  %v3250_v28 = vrot.slane %v7483_v60, %v8863_v47  ;;  %v7718_v23 = vld [vmem:[%s8804_s21 + $0x38] sm:$0xff] }
 0xcde   :  { %v2748_v0 = vadd.f32 %v2747_v63, %v7541_v30  ;;  %2803 = vadd.xlane.f32.xlu0 %v2802_v42  ;;  %v7626_v15 = vadd.f32 %v2745_v59, %v7444_v21  ;;  %v7645_v21 = vld [vmem:[%s8804_s21 + $0x10] sm:$0xff]  ;;  %v3290_v59 = vsel %vm262_vm1, %v7709_v56, -inf  ;;  %v3296_v42 = vsel %vm262_vm1, %v7718_v23, -inf }
 0xcdf   :  { %v7629_v38 = vadd.f32 %v2756_v13, %v7460_v32  ;;  %v2817_v61 = vsel %vm119_vm0, %v7619_v20, 0.0  ;;  %v3281_v62 = vsel %vm262_vm1, %v7645_v21, -inf }
 0xce0   :  { %2818 = vadd.xlane.f32.xlu1 %v2817_v61  ;;  %v7636_v9 = vadd.f32 %v2748_v0, %v7448_v51  ;;  %v2811_v60 = vsel %vm119_vm0, %v7626_v15, 0.0 }
 0xce1   :  { %v2820_v30 = vsel %vm119_vm0, %v7629_v38, 0.0 }
 0xce2   :  { %2821 = vadd.xlane.f32.xlu0 %v2820_v30  ;;  %v7640_v58 = vpop.f32.mrb[64].mxu1  ;;  %v2814_v57 = vsel %vm119_vm0, %v7636_v9, 0.0 }
 0xce3   :  { %v7648_v32 = vadd.f32 %v7640_v58, %v3250_v28  ;;  %v3232_v17 = vpop.f32.mrb[65].mxu1 }
 0xce4   :  { %v7652_v51 = vadd.f32 %v3250_v28, %v3232_v17  ;;  %2812 = vadd.xlane.f32.xlu1 %v2811_v60  ;;  %v7654_v39 = vpop.f32.mrb[66].mxu1  ;;  %v7670_v52 = vpop.eup %5961 }
 0xce5   :  { %v7662_v29 = vadd.f32 %v7654_v39, %v3250_v28  ;;  %v7664_v46 = vpop.f32.mrb[67].mxu1  ;;  %v3325_v19 = vsel %vm119_vm0, %v7648_v32, -inf  ;;  %5495 = vmatprep.mubr.msk.f32.mxu1 %vm262_vm1, %v7670_v52 }
 0xce6   :  { %v7673_v53 = vadd.f32 %v3250_v28, %v7664_v46  ;;  %2815 = vadd.xlane.f32.xlu0 %v2814_v57  ;;  %v3323_v55 = vsel %vm119_vm0, %v7652_v51, -inf }
 0xce7   :  { %v3326_v16 = vsel %vm119_vm0, %v7662_v29, -inf }
 0xce8   :  { %v3328_v40 = vmax.f32 %v3325_v19, %v3326_v16  ;;  %v3324_v6 = vsel %vm119_vm0, %v7673_v53, -inf  ;;  %3282 = vmax.xlane.f32.xlu1 %v3281_v62  ;;  %v3263_v62 = vadd.f32 %v7590_v22, %v3232_v17 }
 0xce9   :  { %v3327_v18 = vmax.f32 %v3323_v55, %v3324_v6 }
 0xcea   :  { %3279 = vmax.xlane.f32.xlu0 %v3278_v5 }
 0xceb   :  { %v3329_v35 = vmax.f32 %v3327_v18, %v3328_v40 }
 0xcec   :  { %3288 = vmax.xlane.f32.xlu1 %v3287_v11 }
 0xced   :  { %v3330_v2 = vrot.slane %v3329_v35, 4 }
 0xcee   :  { %3285 = vmax.xlane.f32.xlu0 %v3284_v44 }
 0xcef   :  { %v3331_v14 = vmax.f32 %v3329_v35, %v3330_v2 }
 0xcf0   :  { %3294 = vmax.xlane.f32.xlu1 %v3293_v54 }
 0xcf1   :  { %v3332_v13 = vrot.slane %v3331_v14, 2 }
 0xcf2   :  { %3291 = vmax.xlane.f32.xlu0 %v3290_v59 }
 0xcf3   :  { %v3333_v63 = vmax.f32 %v3331_v14, %v3332_v13 }
 0xcf5   :  { %v3334_v0 = vrot.slane %v3333_v63, 1 }
 0xcf6   :  { %3297 = vmax.xlane.f32.xlu0 %v3296_v42 }
 0xcf7   :  { %v7722_v61 = vmax.f32 %v3333_v63, %v3334_v0 }
 0xcf9   :  { %v3337_v28 = vsub.f32 %v7673_v53, %v7722_v61  ;;  %v3336_v30 = vsub.f32 %v7652_v51, %v7722_v61  ;;  %v3338_v60 = vsub.f32 %v7648_v32, %v7722_v61  ;;  %v3339_v57 = vsub.f32 %v7662_v29, %v7722_v61 }
 0xcfb   :  { %v3344_v51 = vmul.f32 1.442695, %v3338_v60 }
 0xd01   :  { %3352 = vrot.lane.b32.xlu1 %v3263_v62, %s6199_s8 }
 0xd55   :  { %v2783_v19 = vpop.xlane.xlu1 %2782 }
 0xd56   :  { %v2825_v16 = vmul.f32 0.03125, %v2783_v19 }
 0xd57   :  { %v2786_v5 = vpop.xlane.xlu0 %2785 }
 0xd58   :  { %v7735_v55 = vsub.f32 %v7546_v3, %v2825_v16  ;;  %v2826_v53 = vmul.f32 0.03125, %v2786_v5 }
 0xd59   :  { %v2777_v40 = vpop.xlane.xlu1 %2776 }
 0xd5a   :  { %v2823_v6 = vmul.f32 0.03125, %v2777_v40  ;;  %v2857_v18 = vmul.f32 %v7735_v55, %v7735_v55  ;;  %v7740_v35 = vsub.f32 %v7554_v50, %v2826_v53 }
 0xd5b   :  { %v2780_v11 = vpop.xlane.xlu0 %2779 }
 0xd5c   :  { %v7743_v17 = vsub.f32 %v7551_v24, %v2823_v6  ;;  %v2824_v44 = vmul.f32 0.03125, %v2780_v11  ;;  %v2877_v2 = vsel %vm119_vm0, %v2857_v18, 0.0  ;;  %v2858_v50 = vmul.f32 %v7740_v35, %v7740_v35 }
 0xd5d   :  { %2878 = vadd.xlane.f32.xlu0 %v2877_v2  ;;  %v2795_v54 = vpop.xlane.xlu1 %2794 }
 0xd5e   :  { %v2855_v3 = vmul.f32 %v7743_v17, %v7743_v17  ;;  %v7749_v59 = vsub.f32 %v7559_v8, %v2824_v44  ;;  %v2829_v13 = vmul.f32 0.03125, %v2795_v54  ;;  %v2880_v8 = vsel %vm119_vm0, %v2858_v50, 0.0 }
 0xd5f   :  { %v2798_v14 = vpop.xlane.xlu0 %2797 }
 0xd60   :  { %v2871_v63 = vsel %vm119_vm0, %v2855_v3, 0.0  ;;  %v2830_v0 = vmul.f32 0.03125, %v2798_v14  ;;  %v7755_v19 = vsub.f32 %v7568_v33, %v2829_v13  ;;  %v2856_v5 = vmul.f32 %v7749_v59, %v7749_v59 }
 0xd61   :  { %2872 = vadd.xlane.f32.xlu0 %v2871_v63  ;;  %v2789_v24 = vpop.xlane.xlu1 %2788 }
 0xd62   :  { %v2827_v42 = vmul.f32 0.03125, %v2789_v24  ;;  %v7766_v40 = vsub.f32 %v7578_v27, %v2830_v0  ;;  %v2874_v33 = vsel %vm119_vm0, %v2856_v5, 0.0  ;;  %v2861_v44 = vmul.f32 %v7755_v19, %v7755_v19 }
 0xd63   :  { %v2792_v62 = vpop.xlane.xlu0 %2791 }
 0xd64   :  { %v7758_v16 = vsub.f32 %v7575_v48, %v2827_v42  ;;  %v2828_v11 = vmul.f32 0.03125, %v2792_v62  ;;  %v2862_v54 = vmul.f32 %v7766_v40, %v7766_v40  ;;  %v2889_v14 = vsel %vm119_vm0, %v2861_v44, 0.0 }
 0xd65   :  { %2881 = vadd.xlane.f32.xlu0 %v2880_v8  ;;  %v2807_v6 = vpop.xlane.xlu1 %2806  ;;  %v3342_v8 = vmul.f32 1.442695, %v3337_v28 }
 0xd66   :  { %v2859_v53 = vmul.f32 %v7758_v16, %v7758_v16  ;;  %v7775_v3 = vsub.f32 %v7583_v34, %v2828_v11  ;;  %v2833_v27 = vmul.f32 0.03125, %v2807_v6  ;;  %v2892_v50 = vsel %vm119_vm0, %v2862_v54, 0.0 }
 0xd67   :  { %v2810_v18 = vpop.xlane.xlu0 %2809  ;;  %5963 = vpow2.f32 %v3342_v8 }
 0xd68   :  { %v2883_v48 = vsel %vm119_vm0, %v2859_v53, 0.0  ;;  %v7780_v24 = vsub.f32 %v7594_v10, %v2833_v27  ;;  %v2860_v62 = vmul.f32 %v7775_v3, %v7775_v3  ;;  %v2834_v5 = vmul.f32 0.03125, %v2810_v18 }
 0xd69   :  { %2875 = vadd.xlane.f32.xlu0 %v2874_v33  ;;  %2884 = vadd.xlane.f32.xlu1 %v2883_v48  ;;  %v2801_v13 = vpop.xlane.xlu1 %2800  ;;  %v3340_v33 = vmul.f32 1.442695, %v3336_v30 }
 0xd6a   :  { %v2831_v42 = vmul.f32 0.03125, %v2801_v13  ;;  %v2886_v6 = vsel %vm119_vm0, %v2860_v62, 0.0  ;;  %v2865_v11 = vmul.f32 %v7780_v24, %v7780_v24 }
 0xd6b   :  { %v2804_v2 = vpop.xlane.xlu0 %2803  ;;  %5965 = vpow2.f32 %v3340_v33 }
 0xd6c   :  { %v7788_v53 = vsub.f32 %v7601_v49, %v2831_v42  ;;  %v7800_v49 = vsub.f32 %v7604_v12, %v2834_v5  ;;  %v2832_v18 = vmul.f32 0.03125, %v2804_v2  ;;  %v2901_v48 = vsel %vm119_vm0, %v2865_v11, 0.0 }
 0xd6d   :  { %2890 = vadd.xlane.f32.xlu0 %v2889_v14  ;;  %v2819_v28 = vpop.xlane.xlu1 %2818  ;;  %v3346_v14 = vmul.f32 1.442695, %v3339_v57  ;;  %5967 = vpow2.f32 %v3344_v51 }
 0xd6e   :  { %v2863_v44 = vmul.f32 %v7788_v53, %v7788_v53  ;;  %v7809_v30 = vsub.f32 %v7610_v1, %v2832_v18  ;;  %v2837_v54 = vmul.f32 0.03125, %v2819_v28  ;;  %v2866_v12 = vmul.f32 %v7800_v49, %v7800_v49  ;;  %v5724_v28 = vld [vmem:[%s8805_s16 + $0x8] sm:$0xff]  }
 0xd6f   :  { %v2822_v63 = vpop.xlane.xlu0 %2821  ;;  %5969 = vpow2.f32 %v3346_v14  ;;  %v3264_v18 = vadd.f32 %v7590_v22, %v7664_v46 }
 0xd70   :  { %v2838_v0 = vmul.f32 0.03125, %v2822_v63  ;;  %v2895_v27 = vsel %vm119_vm0, %v2863_v44, 0.0  ;;  %v7818_v13 = vsub.f32 %v7619_v20, %v2837_v54  ;;  %v2904_v1 = vsel %vm119_vm0, %v2866_v12, 0.0 }
 0xd71   :  { %2893 = vadd.xlane.f32.xlu0 %v2892_v50  ;;  %v2813_v2 = vpop.xlane.xlu1 %2812  ;;  %v2864_v60 = vmul.f32 %v7809_v30, %v7809_v30  ;;  %v7823_v63 = vpop.eup %5963 }
 0xd72   :  { %v7785_v34 = vsub.f32 %v7629_v38, %v2838_v0  ;;  %v2835_v32 = vmul.f32 0.03125, %v2813_v2  ;;  %v2869_v57 = vmul.f32 %v7818_v13, %v7818_v13 }
 0xd73   :  { %v2816_v50 = vpop.xlane.xlu0 %2815  ;;  %v2898_v20 = vsel %vm119_vm0, %v2864_v60, 0.0 }
 0xd74   :  { %v2870_v10 = vmul.f32 %v7785_v34, %v7785_v34  ;;  %v7828_v29 = vsub.f32 %v7626_v15, %v2835_v32  ;;  %v2836_v61 = vmul.f32 0.03125, %v2816_v50  ;;  %v2913_v8 = vsel %vm119_vm0, %v2869_v57, 0.0 }
 0xd75   :  { %2887 = vadd.xlane.f32.xlu0 %v2886_v6  ;;  %v7825_v42 = vpop.eup %5965  ;;  %v3265_v6 = vadd.f32 %v7640_v58, %v7590_v22  ;;  %v5723_v58 = vld [vmem:[%s8805_s16] sm:$0xff]  }
 0xd76   :  { %v2916_v38 = vsel %vm119_vm0, %v2870_v10, 0.0  ;;  %v5687_v0 = vpack.i.bf16 %v7823_v63, %v7825_v42  ;;  %v7836_v62 = vsub.f32 %v7636_v9, %v2836_v61  ;;  %v2867_v15 = vmul.f32 %v7828_v29, %v7828_v29  ;;  %5463 = vmatprep.subr.bf16.mxu0 %v5723_v58 }
 0xd77   :  { %2917 = vadd.xlane.f32.xlu1 %v2916_v38  ;;  %v7842_v5 = vpop.eup %5967  ;;  %5464 = vmatpush3.bf16.msra.mxu0 %v5723_v58  ;;  %v7868_v44 = vpop.xlane.xlu0 %3279 }
 0xd78   :  { %v2907_v9 = vsel %vm119_vm0, %v2867_v15, 0.0  ;;  %v2868_v11 = vmul.f32 %v7836_v62, %v7836_v62  ;;  %5465 = vmatprep.subr.bf16.mxu0 %v5724_v28 }
 0xd79   :  { %2902 = vadd.xlane.f32.xlu0 %v2901_v48  ;;  %v7846_v10 = vpop.eup %5969  ;;  %v3266_v48 = vadd.f32 %v7654_v39, %v7590_v22 }
 0xd7a   :  { %v5692_v33 = vpack.i.bf16 %v7846_v10, %v7842_v5  ;;  %v2910_v38 = vsel %vm119_vm0, %v2868_v11, 0.0 }
 0xd7b   :  { %5466 = vmatpush3.bf16.msra.mxu0 %v5724_v28  ;;  %v7870_v51 = vpop.xlane.xlu0 %3285 }
 0xd7d   :  { %2896 = vadd.xlane.f32.xlu0 %v2895_v27  ;;  %v7874_v27 = vpop.xlane.xlu1 %3282 }
 0xd7f   :  { %v7872_v54 = vpop.xlane.xlu0 %3291 }
 0xd81   :  { %2905 = vadd.xlane.f32.xlu0 %v2904_v1  ;;  %v7878_v2 = vpop.xlane.xlu1 %3288 }
 0xd83   :  { %v7876_v12 = vpop.xlane.xlu0 %3297 }
 0xd85   :  { %2899 = vadd.xlane.f32.xlu0 %v2898_v20  ;;  %v7880_v14 = vpop.xlane.xlu1 %3294 }
 0xd88   :  { %5688 = vrot.lane.b32.xlu1 %v5687_v0, %s6198_s6 }
 0xd89   :  { %2914 = vadd.xlane.f32.xlu0 %v2913_v8  ;;  %v7882_v60 = vpop.permute.xlu1 %3352 }
 0xd8c   :  { %3356 = vrot.lane.b32.xlu1 %v3265_v6, %s6199_s8 }
 0xd8d   :  { %2908 = vadd.xlane.f32.xlu0 %v2907_v9 }
 0xd90   :  { %5693 = vrot.lane.b32.xlu1 %v5692_v33, %s6198_s6 }
 0xd91   :  { %2911 = vadd.xlane.f32.xlu0 %v2910_v38 }
 0xda7   :  { %3354 = vrot.lane.b32.xlu0 %v3264_v18, %s6199_s8 }
 0xdab   :  { %3358 = vrot.lane.b32.xlu0 %v3266_v48, %s6199_s8 }
 0xdea   :  { %v2879_v46 = vpop.xlane.xlu0 %2878 }
 0xdeb   :  { %v2921_v32 = vmul.f32 0.03125, %v2879_v46 }
 0xded   :  { %v2937_v50 = vadd.f32 1e-05, %v2921_v32  ;;  %v950_v32 = vld [vmem:[%s8796_s15 + $0x8] sm:$0x3] }
 0xdee   :  { %v2873_v1 = vpop.xlane.xlu0 %2872 }
 0xdef   :  { %v2919_v22 = vmul.f32 0.03125, %v2873_v1 }
 0xdf1   :  { %v2935_v39 = vadd.f32 1e-05, %v2919_v22 }
 0xdf2   :  { %v2882_v61 = vpop.xlane.xlu0 %2881 }
 0xdf3   :  { %v2922_v20 = vmul.f32 0.03125, %v2882_v61  ;;  %5971 = vrsqrt.f32 %v2935_v39 }
 0xdf4   :  { %5973 = vrsqrt.f32 %v2937_v50 }
 0xdf5   :  { %v2938_v57 = vadd.f32 1e-05, %v2922_v20  ;;  %v7890_v20 = vrot.slane %v950_v32, %v6417_v41 }
 0xdf6   :  { %v2876_v0 = vpop.xlane.xlu0 %2875  ;;  %v2885_v8 = vpop.xlane.xlu1 %2884 }
 0xdf7   :  { %5975 = vrsqrt.f32 %v2938_v57  ;;  %v2920_v15 = vmul.f32 0.03125, %v2876_v0  ;;  %v2923_v9 = vmul.f32 0.03125, %v2885_v8 }
 0xdf9   :  { %v2936_v6 = vadd.f32 1e-05, %v2920_v15  ;;  %v2939_v38 = vadd.f32 1e-05, %v2923_v9 }
 0xdfa   :  { %v2891_v11 = vpop.xlane.xlu0 %2890 }
 0xdfb   :  { %5977 = vrsqrt.f32 %v2936_v6  ;;  %v2925_v33 = vmul.f32 0.03125, %v2891_v11 }
 0xdfc   :  { %5979 = vrsqrt.f32 %v2939_v38 }
 0xdfd   :  { %v2941_v58 = vadd.f32 1e-05, %v2925_v33  ;;  %v5972_v18 = vpop.eup %5971  ;;  %v7897_v33 = vrot.slane %v950_v32, %v8863_v47 }
 0xdfe   :  { %v2894_v28 = vpop.xlane.xlu0 %2893  ;;  %v5974_v46 = vpop.eup %5973  ;;  %v2967_v61 = vmul.f32 %v5972_v18, %v7743_v17 }
 0xdff   :  { %v2926_v48 = vmul.f32 0.03125, %v2894_v28  ;;  %5981 = vrsqrt.f32 %v2941_v58  ;;  %v2969_v57 = vmul.f32 %v5974_v46, %v7735_v55 }
 0xe01   :  { %v5976_v1 = vpop.eup %5975  ;;  %v2942_v22 = vadd.f32 1e-05, %v2926_v48  ;;  %v2989_v17 = vmul.f32 %v7890_v20, %v2969_v57 }
 0xe02   :  { %v2970_v39 = vmul.f32 %v5976_v1, %v7740_v35  ;;  %v2888_v50 = vpop.xlane.xlu0 %2887  ;;  %v2987_v35 = vmul.f32 %v7890_v20, %v2967_v61 }
 0xe03   :  { %5983 = vrsqrt.f32 %v2942_v22  ;;  %v2924_v0 = vmul.f32 0.03125, %v2888_v50  ;;  %v7911_v46 = vadd.f32 %v7897_v33, %v2989_v17 }
 0xe04   :  { %v2990_v15 = vmul.f32 %v7890_v20, %v2970_v39  ;;  %v7905_v18 = vadd.f32 %v7897_v33, %v2987_v35 }
 0xe05   :  { %v5978_v8 = vpop.eup %5977  ;;  %v2940_v6 = vadd.f32 1e-05, %v2924_v0 }
 0xe06   :  { %v2903_v9 = vpop.xlane.xlu0 %2902  ;;  %v2968_v11 = vmul.f32 %v5978_v8, %v7749_v59  ;;  %v7902_v55 = vadd.f32 %v7897_v33, %v2990_v15  ;;  %v5980_v48 = vpop.eup %5979 }
 0xe07   :  { %5985 = vrsqrt.f32 %v2940_v6  ;;  %v2929_v58 = vmul.f32 0.03125, %v2903_v9  ;;  %v2971_v57 = vmul.f32 %v5980_v48, %v7758_v16 }
 0xe08   :  { %v2988_v38 = vmul.f32 %v7890_v20, %v2968_v11  ;;  %v3026_v61 = vpack.c.bf16 %v7902_v55, %v7911_v46  ;;  %v2918_v11 = vpop.xlane.xlu1 %2917 }
 0xe09   :  { %v5982_v1 = vpop.eup %5981  ;;  %v2945_v0 = vadd.f32 1e-05, %v2929_v58  ;;  %v2991_v58 = vmul.f32 %v7890_v20, %v2971_v57 }
 0xe0a   :  { %v2897_v28 = vpop.xlane.xlu0 %2896  ;;  %v7908_v59 = vadd.f32 %v7897_v33, %v2988_v38  ;;  %v2973_v9 = vmul.f32 %v5982_v1, %v7755_v19  ;;  %v3301_v19 = vsub.f32 %v7645_v21, %v7874_v27  ;;  %v3300_v21 = vsub.f32 %v7659_v43, %v7868_v44 }
 0xe0b   :  { %v2927_v32 = vmul.f32 0.03125, %v2897_v28 }
 0xe0c   :  { %v3025_v22 = vpack.c.bf16 %v7908_v59, %v7905_v18  ;;  %v3309_v44 = vmul.f32 1.442695, %v3300_v21 }
 0xe0d   :  { %v5984_v39 = vpop.eup %5983  ;;  %v2943_v50 = vadd.f32 1e-05, %v2927_v32 }
 0xe0e   :  { %5467 = vmatprep.mubr.msk.bf16.mxu0 %vm119_vm0, %v3025_v22  ;;  %v2906_v8 = vpop.xlane.xlu0 %2905  ;;  %v2974_v15 = vmul.f32 %v5984_v39, %v7766_v40  ;;  %v2993_v40 = vmul.f32 %v7890_v20, %v2973_v9  ;;  %v2934_v39 = vmul.f32 0.03125, %v2918_v11 }
 0xe0f   :  { %v2930_v6 = vmul.f32 0.03125, %v2906_v8  ;;  %5468 = vmatmul.mubr.msk.bf16.vlgmr.msra.gmra.mrb[60].mxu0 %vm119_vm0, %v3026_v61  ;;  %5987 = vrsqrt.f32 %v2943_v50  ;;  %v5689_v50 = vpop.permute.xlu1 %5688 }
 0xe10   :  { %v2994_v38 = vmul.f32 %v7890_v20, %v2974_v15  ;;  %5989 = vrsqrt.f32 %v2945_v0  ;;  %v7939_v8 = vadd.f32 %v7897_v33, %v2993_v40  ;;  %v3311_v15 = vmul.f32 1.442695, %v3301_v19 }
 0xe11   :  { %v5986_v35 = vpop.eup %5985  ;;  %v2946_v17 = vadd.f32 1e-05, %v2930_v6  ;;  %v3303_v6 = vsub.f32 %v7678_v7, %v7878_v2 }
 0xe12   :  { %v2900_v28 = vpop.xlane.xlu0 %2899  ;;  %v2972_v16 = vmul.f32 %v5986_v35, %v7775_v3  ;;  %v7930_v22 = vadd.f32 %v7897_v33, %v2994_v38  ;;  %v7933_v3 = vadd.f32 %v7897_v33, %v2991_v58  ;;  %v2950_v35 = vadd.f32 1e-05, %v2934_v39 }
 0xe13   :  { %5991 = vrsqrt.f32 %v2946_v17  ;;  %v2928_v48 = vmul.f32 0.03125, %v2900_v28  ;;  %v3357_v58 = vpop.permute.xlu1 %3356  ;;  %v3315_v2 = vmul.f32 1.442695, %v3303_v6 }
 0xe14   :  { %v2992_v32 = vmul.f32 %v7890_v20, %v2972_v16  ;;  %v3028_v11 = vpack.c.bf16 %v7930_v22, %v7939_v8  ;;  %v3302_v16 = vsub.f32 %v7695_v4, %v7870_v51  ;;  %v3304_v4 = vsub.f32 %v7709_v56, %v7872_v54 }
 0xe15   :  { %v2944_v1 = vadd.f32 1e-05, %v2928_v48 }
 0xe16   :  { %v2915_v61 = vpop.xlane.xlu0 %2914  ;;  %v7936_v57 = vadd.f32 %v7897_v33, %v2992_v32 }
 0xe17   :  { %5993 = vrsqrt.f32 %v2944_v1  ;;  %v2933_v0 = vmul.f32 0.03125, %v2915_v61  ;;  %v3313_v61 = vmul.f32 1.442695, %v3302_v16 }
 0xe18   :  { %v3027_v27 = vpack.c.bf16 %v7936_v57, %v7933_v3 }
 0xe19   :  { %v2949_v9 = vadd.f32 1e-05, %v2933_v0  ;;  %v5988_v38 = vpop.eup %5987  ;;  %v5690_v0 = vunpack.i.l.bf16 %v5689_v50 }
 0xe1a   :  { %v2909_v17 = vpop.xlane.xlu0 %2908  ;;  %5471 = vmatprep.mubr.msk.bf16.mxu0 %vm119_vm0, %v3027_v27  ;;  %v5990_v43 = vpop.eup %5989  ;;  %v2975_v40 = vmul.f32 %v5988_v38, %v7788_v53  ;;  %v3305_v53 = vsub.f32 %v7702_v31, %v7880_v14  ;;  %v3306_v31 = vsub.f32 %v7718_v23, %v7876_v12  ;;  %v3366_v12 = vmul.f32 %v7842_v5, %v3357_v58 }
 0xe1b   :  { %v2931_v28 = vmul.f32 0.03125, %v2909_v17  ;;  %5472 = vmatmul.mubr.msk.bf16.gmra.mrb[64].mxu0 %vm119_vm0, %v3028_v11  ;;  %5995 = vrsqrt.f32 %v2949_v9  ;;  %v2977_v39 = vmul.f32 %v5990_v43, %v7780_v24  ;;  %v5691_v11 = vunpack.i.h.bf16 %v5689_v50 }
 0xe1c   :  { %5997 = vpow2.f32 %v3311_v15  ;;  %v5694_v15 = vpop.permute.xlu1 %5693  ;;  %v2995_v9 = vmul.f32 %v7890_v20, %v2975_v40  ;;  %v3319_v38 = vmul.f32 1.442695, %v3305_v53  ;;  %v3321_v40 = vmul.f32 1.442695, %v3306_v31 }
 0xe1d   :  { %v5992_v7 = vpop.eup %5991  ;;  %v2947_v48 = vadd.f32 1e-05, %v2931_v28  ;;  %5999 = vrsqrt.f32 %v2950_v35  ;;  %v2997_v54 = vmul.f32 %v7890_v20, %v2977_v39  ;;  %v3317_v35 = vmul.f32 1.442695, %v3304_v4 }
 0xe1e   :  { %v2978_v32 = vmul.f32 %v5992_v7, %v7800_v49  ;;  %v2912_v19 = vpop.xlane.xlu0 %2911  ;;  %v3364_v49 = vmul.f32 %v7825_v42, %v7882_v60  ;;  %v5695_v42 = vunpack.i.l.bf16 %v5694_v15  ;;  %v7976_v43 = vadd.f32 %v7897_v33, %v2995_v9 }
 0xe1f   :  { %6001 = vrsqrt.f32 %v2947_v48  ;;  %v2932_v1 = vmul.f32 0.03125, %v2912_v19  ;;  %v5696_v16 = vunpack.i.h.bf16 %v5694_v15 }
 0xe20   :  { %6003 = vpow2.f32 %v3309_v44  ;;  %v2998_v27 = vmul.f32 %v7890_v20, %v2978_v32  ;;  %v3384_v60 = vsel %vm119_vm0, %v3364_v49, %v5690_v0  ;;  %v3386_v58 = vsel %vm119_vm0, %v3366_v12, %v5695_v42 }
 0xe21   :  { %v5994_v51 = vpop.eup %5993  ;;  %6005 = vpow2.f32 %v3315_v2  ;;  %v2948_v21 = vadd.f32 1e-05, %v2932_v1  ;;  %v7984_v2 = vadd.f32 %v7897_v33, %v2997_v54 }
 0xe22   :  { %v2976_v24 = vmul.f32 %v5994_v51, %v7809_v30  ;;  %v3355_v6 = vpop.permute.xlu0 %3354  ;;  %v7973_v17 = vadd.f32 %v7897_v33, %v2998_v27 }
 0xe23   :  { %6007 = vrsqrt.f32 %v2948_v21  ;;  %v3365_v56 = vmul.f32 %v7823_v63, %v3355_v6 }
 0xe24   :  { %6009 = vpow2.f32 %v3313_v61  ;;  %v2996_v14 = vmul.f32 %v7890_v20, %v2976_v24  ;;  %v3030_v5 = vpack.c.bf16 %v7973_v17, %v7984_v2 }
 0xe25   :  { %v3385_v30 = vsel %vm119_vm0, %v3365_v56, %v5691_v11  ;;  %v5996_v50 = vpop.eup %5995  ;;  %6011 = vpow2.f32 %v3317_v35 }
 0xe26   :  { %v3359_v63 = vpop.permute.xlu0 %3358  ;;  %v5627_v28 = vpack.c.bf16 %v3385_v30, %v3384_v60  ;;  %v7979_v44 = vadd.f32 %v7897_v33, %v2996_v14  ;;  %v5998_v23 = vpop.eup %5997  ;;  %v2981_v1 = vmul.f32 %v5996_v50, %v7818_v13  ;;  %6013 = vpow2.f32 %v3319_v38 }
 0xe27   :  { %v3367_v7 = vmul.f32 %v7846_v10, %v3359_v63  ;;  %v6000_v48 = vpop.eup %5999  ;;  %6015 = vpow2.f32 %v3321_v40 }
 0xe28   :  { %5628 = vmatprep.subr.bf16.mxu1 %v5627_v28  ;;  %v3029_v32 = vpack.c.bf16 %v7979_v44, %v7976_v43  ;;  %v2982_v0 = vmul.f32 %v6000_v48, %v7785_v34  ;;  %v3001_v21 = vmul.f32 %v7890_v20, %v2981_v1 }
 0xe29   :  { %v6002_v19 = vpop.eup %6001  ;;  %5630 = vmatpush3.bf16.msra.mxu1 %v5627_v28  ;;  %v3387_v10 = vsel %vm119_vm0, %v3367_v7, %v5696_v16 }
 0xe2a   :  { %v6004_v39 = vpop.eup %6003  ;;  %v2979_v61 = vmul.f32 %v6002_v19, %v7828_v29  ;;  %5475 = vmatprep.mubr.msk.bf16.mxu0 %vm119_vm0, %v3029_v32  ;;  %v5631_v4 = vpack.c.bf16 %v3387_v10, %v3386_v58  ;;  %v3002_v49 = vmul.f32 %v7890_v20, %v2982_v0  ;;  %v8007_v15 = vadd.f32 %v7897_v33, %v3001_v21 }
 0xe2b   :  { %v6006_v51 = vpop.eup %6005  ;;  %5476 = vmatmul.mubr.msk.bf16.gmra.mrb[68].mxu0 %vm119_vm0, %v3030_v5 }
 0xe2c   :  { %5496 = vmatmul.mubr.msk.f32.vlgmr.msra.gmra.mrb[30].mxu1 %vm262_vm1, %v6004_v39  ;;  %5632 = vmatprep.subr.bf16.mxu0 %v5631_v4  ;;  %v2999_v53 = vmul.f32 %v7890_v20, %v2979_v61 }
 0xe2d   :  { %v6008_v13 = vpop.eup %6007  ;;  %5498 = vmatprep.mubr.msk.f32.mxu1 %vm262_vm1, %v5998_v23  ;;  %5634 = vmatpush3.bf16.msra.mxu0 %v5631_v4 }
 0xe2e   :  { %v6010_v27 = vpop.eup %6009  ;;  %v2980_v29 = vmul.f32 %v6008_v13, %v7836_v62  ;;  %v8010_v6 = vadd.f32 %v7897_v33, %v2999_v53  ;;  %v8016_v62 = vadd.f32 %v7897_v33, %v3002_v49 }
 0xe2f   :  { %v6012_v24 = vpop.eup %6011 }
 0xe30   :  { %5499 = vmatmul.mubr.msk.f32.gmra.mrb[68].mxu1 %vm262_vm1, %v6010_v27  ;;  %v3000_v34 = vmul.f32 %v7890_v20, %v2980_v29  ;;  %v6014_v11 = vpop.eup %6013  ;;  %v3032_v56 = vpack.c.bf16 %v8016_v62, %v8007_v15 }
 0xe31   :  { %5501 = vmatprep.mubr.msk.f32.mxu1 %vm262_vm1, %v6006_v51  ;;  %v6016_v54 = vpop.eup %6015 }
 0xe32   :  { %v8013_v9 = vadd.f32 %v7897_v33, %v3000_v34  ;;  %v8039_v33 = vld [vmem:[%s8803_s22] sm:$0xff] }
 0xe34   :  { %5502 = vmatmul.mubr.msk.f32.gmra.mrb[70].mxu1 %vm262_vm1, %v6012_v24  ;;  %v3031_v20 = vpack.c.bf16 %v8013_v9, %v8010_v6 }
 0xe35   :  { %5504 = vmatprep.mubr.msk.f32.mxu1 %vm262_vm1, %v6014_v11 }
 0xe36   :  { %5479 = vmatprep.mubr.msk.bf16.mxu0 %vm119_vm0, %v3031_v20 }
 0xe37   :  { %5480 = vmatmul.mubr.msk.bf16.gmra.mrb[72].mxu0 %vm119_vm0, %v3032_v56 }
 0xe38   :  { %5505 = vmatmul.mubr.msk.f32.gmra.mrb[72].mxu1 %vm262_vm1, %v6016_v54  ;;  %5511 = vmatprep.mubr.msk.f32.mxu0 %vm262_vm1, %v7670_v52  ;;  %v8043_v52 = vrot.slane %v8039_v33, %v6417_v41 }
 0xe3f   :  { %5512 = vmatmul.mubr.msk.f32.vlgmr.msra.gmra.mrb[42].mxu0 %vm262_vm1, %v6004_v39 }
 0xe40   :  { %5514 = vmatprep.mubr.msk.f32.mxu0 %vm262_vm1, %v5998_v23 }
 0xe43   :  { %5515 = vmatmul.mubr.msk.f32.gmra.mrb[76].mxu0 %vm262_vm1, %v6010_v27 }
 0xe44   :  { %5517 = vmatprep.mubr.msk.f32.mxu0 %vm262_vm1, %v6006_v51 }
 0xe47   :  { %5518 = vmatmul.mubr.msk.f32.gmra.mrb[78].mxu0 %vm262_vm1, %v6012_v24 }
 0xe48   :  { %5520 = vmatprep.mubr.msk.f32.mxu0 %vm262_vm1, %v6014_v11 }
 0xe4b   :  { %5521 = vmatmul.mubr.msk.f32.gmra.mrb[80].mxu0 %vm262_vm1, %v6016_v54 }
 0xee2   :  { %v5469_v35 = vpop.f32.mrb[60].mxu0 }
 0xee3   :  { %v3120_v31 = vadd.f32 %v5469_v35, %v8043_v52  ;;  %v3111_v14 = vpop.f32.mrb[61].mxu0 }
 0xee4   :  { %v3112_v42 = vadd.f32 %v3111_v14, %v8043_v52  ;;  %v5470_v60 = vpop.f32.mrb[62].mxu0 }
 0xee5   :  { %v5019_v30 = vmul.f32 -1.442695, %v3120_v31  ;;  %v3123_v50 = vadd.f32 %v5470_v60, %v8043_v52  ;;  %v3114_v38 = vpop.f32.mrb[63].mxu0 }
 0xee6   :  { %v5017_v63 = vmul.f32 -1.442695, %v3112_v42  ;;  %v3115_v28 = vadd.f32 %v3114_v38, %v8043_v52 }
 0xee7   :  { %6017 = vpow2.f32 %v5019_v30  ;;  %v5020_v23 = vmul.f32 -1.442695, %v3123_v50 }
 0xee8   :  { %6019 = vpow2.f32 %v5017_v63  ;;  %v5018_v12 = vmul.f32 -1.442695, %v3115_v28 }
 0xee9   :  { %6021 = vpow2.f32 %v5020_v23 }
 0xeea   :  { %6023 = vpow2.f32 %v5018_v12 }
 0xeee   :  { %v5473_v16 = vpop.f32.mrb[64].mxu0 }
 0xeef   :  { %v3136_v7 = vadd.f32 %v5473_v16, %v8043_v52  ;;  %v3127_v48 = vpop.f32.mrb[65].mxu0 }
 0xef0   :  { %v3128_v40 = vadd.f32 %v3127_v48, %v8043_v52  ;;  %v5474_v32 = vpop.f32.mrb[66].mxu0 }
 0xef1   :  { %v6018_v19 = vpop.eup %6017  ;;  %v5023_v1 = vmul.f32 -1.442695, %v3136_v7  ;;  %v3139_v5 = vadd.f32 %v5474_v32, %v8043_v52  ;;  %v3130_v58 = vpop.f32.mrb[67].mxu0 }
 0xef2   :  { %v6020_v10 = vpop.eup %6019  ;;  %v3672_v39 = vadd.f32 1.0, %v6018_v19  ;;  %v3131_v61 = vadd.f32 %v3130_v58, %v8043_v52  ;;  %v5021_v21 = vmul.f32 -1.442695, %v3128_v40 }
 0xef3   :  { %v6022_v4 = vpop.eup %6021  ;;  %v3670_v51 = vadd.f32 1.0, %v6020_v10  ;;  %6025 = vpow2.f32 %v5023_v1  ;;  %v5024_v29 = vmul.f32 -1.442695, %v3139_v5 }
 0xef4   :  { %v6024_v0 = vpop.eup %6023  ;;  %6027 = vrcp.f32 %v3672_v39  ;;  %v3673_v13 = vadd.f32 1.0, %v6022_v4  ;;  %v5022_v53 = vmul.f32 -1.442695, %v3131_v61 }
 0xef5   :  { %6029 = vrcp.f32 %v3670_v51  ;;  %v3671_v27 = vadd.f32 1.0, %v6024_v0 }
 0xef6   :  { %6031 = vrcp.f32 %v3673_v13 }
 0xef7   :  { %6033 = vrcp.f32 %v3671_v27 }
 0xef8   :  { %6035 = vpow2.f32 %v5021_v21 }
 0xef9   :  { %6037 = vpow2.f32 %v5024_v29 }
 0xefa   :  { %6039 = vpow2.f32 %v5022_v53 }
 0xefd   :  { %v6026_v49 = vpop.eup %6025 }
 0xefe   :  { %v6028_v34 = vpop.eup %6027  ;;  %v3676_v24 = vadd.f32 1.0, %v6026_v49  ;;  %v5477_v11 = vpop.f32.mrb[68].mxu0 }
 0xeff   :  { %v6030_v20 = vpop.eup %6029  ;;  %v3152_v56 = vadd.f32 %v5477_v11, %v8043_v52  ;;  %v3143_v54 = vpop.f32.mrb[69].mxu0  ;;  %v5725_v11 = vld [vmem:[%s8806_s18] sm:$0xff]  }
 0xf00   :  { %v5497_v35 = vpop.f32.mrb[30].mxu1  ;;  %v6032_v31 = vpop.eup %6031  ;;  %v3144_v14 = vadd.f32 %v3143_v54, %v8043_v52  ;;  %6041 = vrcp.f32 %v3676_v24  ;;  %5523 = vmatprep.subr.bf16.mxu1 %v5725_v11 }
 0xf01   :  { %v3735_v42 = vadd.f32 1e-12, %v5497_v35  ;;  %v5478_v60 = vpop.f32.mrb[70].mxu0  ;;  %v3478_v30 = vpop.f32.mrb[31].mxu1  ;;  %v5027_v38 = vmul.f32 -1.442695, %v3152_v56  ;;  %5524 = vmatpush3.bf16.msra.mxu1 %v5725_v11 }
 0xf02   :  { %v6034_v50 = vpop.eup %6033  ;;  %v3155_v63 = vadd.f32 %v5478_v60, %v8043_v52  ;;  %v8056_v28 = vmul.f32 %v6030_v20, %v3478_v30  ;;  %v3146_v23 = vpop.f32.mrb[71].mxu0  ;;  %v5025_v16 = vmul.f32 -1.442695, %v3144_v14  ;;  %v3734_v4 = vadd.f32 1e-12, %v3478_v30 }
 0xf03   :  { %v6036_v12 = vpop.eup %6035  ;;  %v8058_v7 = vmul.f32 %v6034_v50, %v5497_v35  ;;  %6043 = vrcp.f32 %v3735_v42  ;;  %v3147_v48 = vadd.f32 %v3146_v23, %v8043_v52  ;;  %v5500_v19 = vpop.f32.mrb[68].mxu1  ;;  %v5726_v23 = vld [vmem:[%s8806_s18 + $0x8] sm:$0xff]  }
 0xf04   :  { %v6038_v40 = vpop.eup %6037  ;;  %v3674_v32 = vadd.f32 1.0, %v6036_v12  ;;  %6045 = vpow2.f32 %v5027_v38  ;;  %v5028_v58 = vmul.f32 -1.442695, %v3155_v63  ;;  %v8061_v10 = vmul.f32 %v6032_v31, %v5500_v19  ;;  %v3488_v39 = vpop.f32.mrb[69].mxu1  ;;  %5525 = vmatprep.subr.bf16.mxu1 %v5726_v23 }
 0xf05   :  { %v6040_v1 = vpop.eup %6039  ;;  %v3677_v5 = vadd.f32 1.0, %v6038_v40  ;;  %6047 = vpow2.f32 %v5025_v16  ;;  %v8063_v51 = vmul.f32 %v6028_v34, %v3488_v39  ;;  %v5026_v0 = vmul.f32 -1.442695, %v3147_v48  ;;  %5526 = vmatpush3.bf16.msra.mxu1 %v5726_v23 }
 0xf06   :  { %6049 = vrcp.f32 %v3674_v32  ;;  %v3675_v61 = vadd.f32 1.0, %v6040_v1  ;;  %v3737_v13 = vadd.f32 1e-12, %v5500_v19  ;;  %v3736_v27 = vadd.f32 1e-12, %v3488_v39 }
 0xf07   :  { %6051 = vrcp.f32 %v3677_v5  ;;  %v5503_v21 = vpop.f32.mrb[70].mxu1 }
 0xf08   :  { %6053 = vrcp.f32 %v3675_v61  ;;  %v3498_v29 = vpop.f32.mrb[71].mxu1  ;;  %v3739_v53 = vadd.f32 1e-12, %v5503_v21 }
 0xf09   :  { %6055 = vpow2.f32 %v5028_v58  ;;  %v3738_v49 = vadd.f32 1e-12, %v3498_v29 }
 0xf0a   :  { %6057 = vrcp.f32 %v3734_v4  ;;  %v5481_v24 = vpop.f32.mrb[72].mxu0  ;;  %v6042_v20 = vpop.eup %6041 }
 0xf0b   :  { %6059 = vpow2.f32 %v5026_v0  ;;  %v3168_v34 = vadd.f32 %v5481_v24, %v8043_v52  ;;  %v3159_v56 = vpop.f32.mrb[73].mxu0  ;;  %v5506_v54 = vpop.f32.mrb[72].mxu1 }
 0xf0c   :  { %6061 = vrcp.f32 %v3737_v13  ;;  %v3160_v31 = vadd.f32 %v3159_v56, %v8043_v52  ;;  %v5482_v14 = vpop.f32.mrb[74].mxu0  ;;  %v3508_v42 = vpop.f32.mrb[73].mxu1  ;;  %v3741_v19 = vadd.f32 1e-12, %v5506_v54 }
 0xf0d   :  { %v6044_v35 = vpop.eup %6043  ;;  %6063 = vrcp.f32 %v3736_v27  ;;  %v5031_v30 = vmul.f32 -1.442695, %v3168_v34  ;;  %v3171_v50 = vadd.f32 %v5482_v14, %v8043_v52  ;;  %v8071_v38 = vmul.f32 %v6042_v20, %v3508_v42  ;;  %v3162_v63 = vpop.f32.mrb[75].mxu0 }
 0xf0e   :  { %v6046_v60 = vpop.eup %6045  ;;  %6065 = vrcp.f32 %v3739_v53  ;;  %3784 = vrot.lane.b32.xlu1 %v6044_v35, %s6199_s8  ;;  %v5029_v48 = vmul.f32 -1.442695, %v3160_v31  ;;  %v3163_v39 = vadd.f32 %v3162_v63, %v8043_v52  ;;  %v3740_v27 = vadd.f32 1e-12, %v3508_v42 }
 0xf0f   :  { %v6048_v12 = vpop.eup %6047  ;;  %v3680_v16 = vadd.f32 1.0, %v6046_v60  ;;  %6067 = vrcp.f32 %v3738_v49  ;;  %v5032_v58 = vmul.f32 -1.442695, %v3171_v50 }
 0xf10   :  { %v6050_v40 = vpop.eup %6049  ;;  %v3678_v32 = vadd.f32 1.0, %v6048_v12  ;;  %6069 = vpow2.f32 %v5031_v30  ;;  %v5030_v20 = vmul.f32 -1.442695, %v3163_v39 }
 0xf11   :  { %v6052_v1 = vpop.eup %6051  ;;  %6071 = vrcp.f32 %v3680_v16  ;;  %v8077_v5 = vmul.f32 %v6050_v40, %v3498_v29 }
 0xf12   :  { %v6054_v61 = vpop.eup %6053  ;;  %6073 = vrcp.f32 %v3678_v32  ;;  %v8080_v4 = vmul.f32 %v6052_v1, %v5506_v54  ;;  %v8084_v53 = vpop.f32.mrb[42].mxu0 }
 0xf13   :  { %v6056_v0 = vpop.eup %6055  ;;  %v8082_v13 = vmul.f32 %v6054_v61, %v5503_v21  ;;  %6075 = vpow2.f32 %v5029_v48  ;;  %v3583_v29 = vpop.f32.mrb[43].mxu0  ;;  %v3743_v56 = vadd.f32 1e-12, %v8084_v53 }
 0xf14   :  { %v6058_v49 = vpop.eup %6057  ;;  %v3681_v24 = vadd.f32 1.0, %v6056_v0  ;;  %6077 = vrcp.f32 %v3741_v19  ;;  %v3742_v54 = vadd.f32 1e-12, %v3583_v29 }
 0xf15   :  { %v6060_v11 = vpop.eup %6059  ;;  %6079 = vpow2.f32 %v5032_v58  ;;  %3782 = vrot.lane.b32.xlu0 %v6058_v49, %s6199_s8 }
 0xf16   :  { %v6062_v52 = vpop.eup %6061  ;;  %6081 = vrcp.f32 %v3681_v24  ;;  %v3679_v34 = vadd.f32 1.0, %v6060_v11  ;;  %v5516_v35 = vpop.f32.mrb[76].mxu0 }
 0xf17   :  { %v6064_v21 = vpop.eup %6063  ;;  %6083 = vrcp.f32 %v3740_v27  ;;  %3788 = vrot.lane.b32.xlu1 %v6062_v52, %s6199_s8  ;;  %v3745_v14 = vadd.f32 1e-12, %v5516_v35  ;;  %v3593_v42 = vpop.f32.mrb[77].mxu0 }
 0xf18   :  { %v6066_v31 = vpop.eup %6065  ;;  %6085 = vrcp.f32 %v3679_v34  ;;  %v3744_v50 = vadd.f32 1e-12, %v3593_v42 }
 0xf19   :  { %v6068_v60 = vpop.eup %6067  ;;  %6087 = vpow2.f32 %v5030_v20  ;;  %3786 = vrot.lane.b32.xlu0 %v6064_v21, %s6199_s8 }
 0xf1a   :  { %v6070_v30 = vpop.eup %6069  ;;  %6089 = vrcp.f32 %v3743_v56  ;;  %v5519_v12 = vpop.f32.mrb[78].mxu0 }
 0xf1b   :  { %v6072_v63 = vpop.eup %6071  ;;  %v3684_v23 = vadd.f32 1.0, %v6070_v30  ;;  %6091 = vrcp.f32 %v3742_v54  ;;  %3792 = vrot.lane.b32.xlu1 %v6066_v31, %s6199_s8  ;;  %v3747_v40 = vadd.f32 1e-12, %v5519_v12  ;;  %v3603_v32 = vpop.f32.mrb[79].mxu0 }
 0xf1c   :  { %v6074_v16 = vpop.eup %6073  ;;  %6093 = vrcp.f32 %v3745_v14  ;;  %v8091_v48 = vmul.f32 %v6072_v63, %v3593_v42  ;;  %v3746_v58 = vadd.f32 1e-12, %v3603_v32 }
 0xf1d   :  { %v6076_v19 = vpop.eup %6075  ;;  %6095 = vrcp.f32 %v3684_v23  ;;  %v8093_v1 = vmul.f32 %v6074_v16, %v3583_v29  ;;  %3790 = vrot.lane.b32.xlu0 %v6068_v60, %s6199_s8 }
 0xf1e   :  { %v6078_v39 = vpop.eup %6077  ;;  %v3682_v61 = vadd.f32 1.0, %v6076_v19  ;;  %6097 = vrcp.f32 %v3744_v50  ;;  %v5522_v27 = vpop.f32.mrb[80].mxu0 }
 0xf1f   :  { %v6080_v0 = vpop.eup %6079  ;;  %3796 = vrot.lane.b32.xlu1 %v6078_v39, %s6199_s8  ;;  %6099 = vrcp.f32 %v3747_v40  ;;  %v3749_v11 = vadd.f32 1e-12, %v5522_v27  ;;  %v3613_v20 = vpop.f32.mrb[81].mxu0 }
 0xf20   :  { %v6082_v49 = vpop.eup %6081  ;;  %6101 = vrcp.f32 %v3682_v61  ;;  %v3685_v24 = vadd.f32 1.0, %v6080_v0  ;;  %v3748_v29 = vadd.f32 1e-12, %v3613_v20 }
 0xf21   :  { %v6084_v52 = vpop.eup %6083  ;;  %v8097_v34 = vmul.f32 %v6082_v49, %v5516_v35  ;;  %6103 = vrcp.f32 %v3746_v58 }
 0xf22   :  { %v6086_v56 = vpop.eup %6085  ;;  %6105 = vrcp.f32 %v3685_v24  ;;  %3794 = vrot.lane.b32.xlu0 %v6084_v52, %s6199_s8 }
 0xf23   :  { %v6088_v21 = vpop.eup %6087  ;;  %v3727_v54 = vmul.f32 %v6086_v56, %v8084_v53  ;;  %6107 = vrcp.f32 %v3749_v11 }
 0xf24   :  { %v6090_v31 = vpop.eup %6089  ;;  %v3683_v14 = vadd.f32 1.0, %v6088_v21  ;;  %6109 = vrcp.f32 %v3748_v29 }
 0xf25   :  { %v6092_v42 = vpop.eup %6091  ;;  %3800 = vrot.lane.b32.xlu1 %v6090_v31, %s6199_s8 }
 0xf26   :  { %v6094_v60 = vpop.eup %6093  ;;  %6111 = vrcp.f32 %v3683_v14  ;;  %3798 = vrot.lane.b32.xlu0 %v6092_v42, %s6199_s8 }
 0xf27   :  { %v6096_v35 = vpop.eup %6095 }
 0xf28   :  { %v6098_v30 = vpop.eup %6097  ;;  %v3732_v50 = vmul.f32 %v6096_v35, %v3613_v20 }
 0xf29   :  { %v6100_v63 = vpop.eup %6099  ;;  %3804 = vrot.lane.b32.xlu1 %v6094_v60, %s6199_s8 }
 0xf2a   :  { %v6102_v23 = vpop.eup %6101  ;;  %3802 = vrot.lane.b32.xlu0 %v6098_v30, %s6199_s8 }
 0xf2b   :  { %v6104_v53 = vpop.eup %6103  ;;  %v3730_v16 = vmul.f32 %v6102_v23, %v3603_v32 }
 0xf2c   :  { %v6106_v40 = vpop.eup %6105 }
 0xf2d   :  { %v3733_v19 = vmul.f32 %v6106_v40, %v5522_v27  ;;  %3808 = vrot.lane.b32.xlu1 %v6100_v63, %s6199_s8  ;;  %v6108_v58 = vpop.eup %6107 }
 0xf2e   :  { %3806 = vrot.lane.b32.xlu0 %v6104_v53, %s6199_s8  ;;  %v6110_v39 = vpop.eup %6109 }
 0xf30   :  { %v6112_v61 = vpop.eup %6111 }
 0xf31   :  { %v3731_v0 = vmul.f32 %v6112_v61, %v5519_v12  ;;  %3812 = vrot.lane.b32.xlu1 %v6108_v58, %s6199_s8 }
 0xf32   :  { %3810 = vrot.lane.b32.xlu0 %v6110_v39, %s6199_s8 }
 0xf80   :  { %v3785_v49 = vpop.permute.xlu1 %3784 }
 0xf81   :  { %v3831_v24 = vmul.f32 %v3785_v49, %v8058_v7 }
 0xf87   :  { %v3783_v11 = vpop.permute.xlu0 %3782 }
 0xf88   :  { %v3830_v32 = vmul.f32 %v3783_v11, %v8056_v28 }
 0xf89   :  { %v3789_v20 = vpop.permute.xlu1 %3788 }
 0xf8a   :  { %v3846_v27 = vpack.c.bf16 %v3831_v24, %v3830_v32  ;;  %v3833_v52 = vmul.f32 %v3789_v20, %v8061_v10 }
 0xf8b   :  { %v3787_v29 = vpop.permute.xlu0 %3786 }
 0xf8c   :  { %v3832_v56 = vmul.f32 %v3787_v29, %v8063_v51  ;;  %5527 = vmatprep.mubr.msk.bf16.mxu1 %vm119_vm0, %v3846_v27 }
 0xf8d   :  { %v3793_v12 = vpop.permute.xlu1 %3792 }
 0xf8e   :  { %v3847_v21 = vpack.c.bf16 %v3833_v52, %v3832_v56  ;;  %v3835_v31 = vmul.f32 %v3793_v12, %v8082_v13 }
 0xf8f   :  { %v3791_v14 = vpop.permute.xlu0 %3790 }
 0xf90   :  { %v3834_v42 = vmul.f32 %v3791_v14, %v8077_v5  ;;  %5528 = vmatmul.mubr.msk.bf16.vlgmr.msra.gmra.mrb[76].mxu1 %vm119_vm0, %v3847_v21 }
 0xf91   :  { %v3797_v7 = vpop.permute.xlu1 %3796 }
 0xf92   :  { %v3848_v28 = vpack.c.bf16 %v3835_v31, %v3834_v42  ;;  %v3837_v60 = vmul.f32 %v3797_v7, %v8080_v4 }
 0xf94   :  { %v3795_v35 = vpop.permute.xlu0 %3794  ;;  %5531 = vmatprep.mubr.msk.bf16.mxu1 %vm119_vm0, %v3848_v28 }
 0xf95   :  { %v3836_v10 = vmul.f32 %v3795_v35, %v8071_v38 }
 0xf97   :  { %v3849_v51 = vpack.c.bf16 %v3837_v60, %v3836_v10  ;;  %v3801_v30 = vpop.permute.xlu1 %3800 }
 0xf98   :  { %v3839_v63 = vmul.f32 %v3801_v30, %v3727_v54  ;;  %v3799_v23 = vpop.permute.xlu0 %3798 }
 0xf99   :  { %5532 = vmatmul.mubr.msk.bf16.gmra.mrb[80].mxu1 %vm119_vm0, %v3849_v51  ;;  %v3838_v13 = vmul.f32 %v3799_v23, %v8093_v1 }
 0xf9b   :  { %v3850_v5 = vpack.c.bf16 %v3839_v63, %v3838_v13  ;;  %v3805_v53 = vpop.permute.xlu1 %3804 }
 0xf9c   :  { %v3841_v40 = vmul.f32 %v3805_v53, %v8097_v34  ;;  %v3803_v58 = vpop.permute.xlu0 %3802 }
 0xf9d   :  { %v3840_v4 = vmul.f32 %v3803_v58, %v8091_v48  ;;  %5535 = vmatprep.mubr.msk.bf16.mxu1 %vm119_vm0, %v3850_v5  ;;  %v8130_v48 = vrot.slane %v8039_v33, %v6438_v36 }
 0xf9f   :  { %v3851_v39 = vpack.c.bf16 %v3841_v40, %v3840_v4  ;;  %v3809_v61 = vpop.permute.xlu1 %3808 }
 0xfa0   :  { %v3843_v38 = vmul.f32 %v3809_v61, %v3731_v0  ;;  %v3807_v49 = vpop.permute.xlu0 %3806 }
 0xfa1   :  { %v3842_v24 = vmul.f32 %v3807_v49, %v3730_v16  ;;  %5536 = vmatmul.mubr.msk.bf16.gmra.mrb[84].mxu1 %vm119_vm0, %v3851_v39 }
 0xfa3   :  { %v3852_v54 = vpack.c.bf16 %v3843_v38, %v3842_v24  ;;  %v3813_v11 = vpop.permute.xlu1 %3812 }
 0xfa4   :  { %v3845_v32 = vmul.f32 %v3813_v11, %v3733_v19  ;;  %v3811_v1 = vpop.permute.xlu0 %3810 }
 0xfa5   :  { %v3844_v20 = vmul.f32 %v3811_v1, %v3732_v50  ;;  %5539 = vmatprep.mubr.msk.bf16.mxu1 %vm119_vm0, %v3852_v54 }
 0xfa7   :  { %v3853_v34 = vpack.c.bf16 %v3845_v32, %v3844_v20 }
 0xfa9   :  { %5540 = vmatmul.mubr.msk.bf16.gmra.mrb[88].mxu1 %vm119_vm0, %v3853_v34 }
0x1063   :  { %v5529_v27 = vpop.f32.mrb[76].mxu1 }
0x1064   :  { %v3932_v0 = vpop.f32.mrb[77].mxu1  ;;  %v3941_v16 = vadd.f32 %v5529_v27, %v8130_v48 }
0x1065   :  { %v3933_v52 = vadd.f32 %v3932_v0, %v8130_v48  ;;  %v5530_v29 = vpop.f32.mrb[78].mxu1 }
0x1066   :  { %v3935_v56 = vpop.f32.mrb[79].mxu1  ;;  %v8139_v12 = vadd.f32 %v3941_v16, %v7911_v46  ;;  %v3944_v21 = vadd.f32 %v5530_v29, %v8130_v48 }
0x1067   :  { %v8135_v19 = vadd.f32 %v3933_v52, %v7905_v18  ;;  %v3936_v50 = vadd.f32 %v3935_v56, %v8130_v48 }
0x1068   :  { %v8150_v18 = vadd.f32 %v3944_v21, %v7902_v55  ;;  %v4017_v46 = vsel %vm119_vm0, %v8139_v12, 0.0 }
0x1069   :  { %v8143_v36 = vadd.f32 %v3936_v50, %v7908_v59  ;;  %v4011_v31 = vsel %vm119_vm0, %v8135_v19, 0.0 }
0x106a   :  { %4012 = vadd.xlane.f32.xlu0 %v4011_v31  ;;  %v4020_v55 = vsel %vm119_vm0, %v8150_v18, 0.0 }
0x106b   :  { %v4014_v14 = vsel %vm119_vm0, %v8143_v36, 0.0 }
0x106c   :  { %v5533_v42 = vpop.f32.mrb[80].mxu1  ;;  %4015 = vadd.xlane.f32.xlu1 %v4014_v14 }
0x106d   :  { %v3948_v7 = vpop.f32.mrb[81].mxu1  ;;  %v3957_v28 = vadd.f32 %v5533_v42, %v8130_v48 }
0x106e   :  { %v3949_v59 = vadd.f32 %v3948_v7, %v8130_v48  ;;  %v5534_v60 = vpop.f32.mrb[82].mxu1  ;;  %4018 = vadd.xlane.f32.xlu0 %v4017_v46 }
0x106f   :  { %v3951_v35 = vpop.f32.mrb[83].mxu1  ;;  %v3960_v30 = vadd.f32 %v5534_v60, %v8130_v48  ;;  %v8164_v63 = vadd.f32 %v3957_v28, %v7939_v8 }
0x1070   :  { %v8157_v10 = vadd.f32 %v3949_v59, %v7933_v3  ;;  %v3952_v51 = vadd.f32 %v3951_v35, %v8130_v48 }
0x1071   :  { %v8172_v5 = vadd.f32 %v3960_v30, %v7930_v22 }
0x1072   :  { %v8167_v23 = vadd.f32 %v3952_v51, %v7936_v57  ;;  %4021 = vadd.xlane.f32.xlu0 %v4020_v55  ;;  %v4023_v13 = vsel %vm119_vm0, %v8157_v10, 0.0  ;;  %v4029_v57 = vsel %vm119_vm0, %v8164_v63, 0.0 }
0x1073   :  { %4024 = vadd.xlane.f32.xlu1 %v4023_v13  ;;  %v4032_v49 = vsel %vm119_vm0, %v8172_v5, 0.0 }
0x1074   :  { %v5537_v3 = vpop.f32.mrb[84].mxu1  ;;  %v4026_v53 = vsel %vm119_vm0, %v8167_v23, 0.0 }
0x1075   :  { %v3964_v40 = vpop.f32.mrb[85].mxu1  ;;  %v3973_v58 = vadd.f32 %v5537_v3, %v8130_v48 }
0x1076   :  { %4027 = vadd.xlane.f32.xlu0 %v4026_v53  ;;  %v3965_v8 = vadd.f32 %v3964_v40, %v8130_v48  ;;  %v5538_v4 = vpop.f32.mrb[86].mxu1 }
0x1077   :  { %4030 = vadd.xlane.f32.xlu1 %v4029_v57  ;;  %v3967_v39 = vpop.f32.mrb[87].mxu1  ;;  %v3976_v38 = vadd.f32 %v5538_v4, %v8130_v48  ;;  %v8188_v24 = vadd.f32 %v3973_v58, %v7984_v2 }
0x1078   :  { %v8181_v61 = vadd.f32 %v3965_v8, %v7976_v43  ;;  %v3968_v22 = vadd.f32 %v3967_v39, %v8130_v48 }
0x1079   :  { %v8198_v1 = vadd.f32 %v3976_v38, %v7973_v17  ;;  %v4041_v27 = vsel %vm119_vm0, %v8188_v24, 0.0 }
0x107a   :  { %v8191_v54 = vadd.f32 %v3968_v22, %v7979_v44  ;;  %4033 = vadd.xlane.f32.xlu0 %v4032_v49  ;;  %v4035_v11 = vsel %vm119_vm0, %v8181_v61, 0.0 }
0x107b   :  { %4036 = vadd.xlane.f32.xlu1 %v4035_v11  ;;  %v4044_v29 = vsel %vm119_vm0, %v8198_v1, 0.0 }
0x107c   :  { %v5541_v43 = vpop.f32.mrb[88].mxu1  ;;  %v4038_v32 = vsel %vm119_vm0, %v8191_v54, 0.0 }
0x107d   :  { %v3980_v20 = vpop.f32.mrb[89].mxu1  ;;  %v3989_v34 = vadd.f32 %v5541_v43, %v8130_v48 }
0x107e   :  { %v3981_v2 = vadd.f32 %v3980_v20, %v8130_v48  ;;  %4039 = vadd.xlane.f32.xlu0 %v4038_v32  ;;  %v5542_v44 = vpop.f32.mrb[90].mxu1 }
0x107f   :  { %v3983_v0 = vpop.f32.mrb[91].mxu1  ;;  %4042 = vadd.xlane.f32.xlu1 %v4041_v27  ;;  %v3992_v17 = vadd.f32 %v5542_v44, %v8130_v48  ;;  %v8212_v56 = vadd.f32 %v3989_v34, %v8007_v15 }
0x1080   :  { %v8205_v16 = vadd.f32 %v3981_v2, %v8010_v6  ;;  %v3984_v52 = vadd.f32 %v3983_v0, %v8130_v48 }
0x1081   :  { %v8222_v31 = vadd.f32 %v3992_v17, %v8016_v62  ;;  %v4053_v48 = vsel %vm119_vm0, %v8212_v56, 0.0 }
0x1082   :  { %v8215_v50 = vadd.f32 %v3984_v52, %v8013_v9  ;;  %4045 = vadd.xlane.f32.xlu0 %v4044_v29  ;;  %v4047_v21 = vsel %vm119_vm0, %v8205_v16, 0.0 }
0x1083   :  { %4048 = vadd.xlane.f32.xlu1 %v4047_v21  ;;  %v4056_v15 = vsel %vm119_vm0, %v8222_v31, 0.0 }
0x1084   :  { %v4050_v6 = vsel %vm119_vm0, %v8215_v50, 0.0 }
0x1086   :  { %4051 = vadd.xlane.f32.xlu0 %v4050_v6 }
0x1087   :  { %4054 = vadd.xlane.f32.xlu1 %v4053_v48 }
0x108a   :  { %4057 = vadd.xlane.f32.xlu0 %v4056_v15 }
0x10f7   :  { %v4013_v9 = vpop.xlane.xlu0 %4012 }
0x10f8   :  { %v4059_v14 = vmul.f32 0.03125, %v4013_v9 }
0x10f9   :  { %v4016_v42 = vpop.xlane.xlu1 %4015 }
0x10fa   :  { %v8229_v7 = vsub.f32 %v8135_v19, %v4059_v14  ;;  %v4060_v46 = vmul.f32 0.03125, %v4016_v42 }
0x10fb   :  { %v4019_v28 = vpop.xlane.xlu0 %4018 }
0x10fc   :  { %v8232_v62 = vsub.f32 %v8143_v36, %v4060_v46  ;;  %v4061_v59 = vmul.f32 0.03125, %v4019_v28  ;;  %v4091_v60 = vmul.f32 %v8229_v7, %v8229_v7 }
0x10fe   :  { %v8237_v35 = vsub.f32 %v8139_v12, %v4061_v59  ;;  %v4107_v51 = vsel %vm119_vm0, %v4091_v60, 0.0  ;;  %v4092_v30 = vmul.f32 %v8232_v62, %v8232_v62 }
0x10ff   :  { %v4022_v55 = vpop.xlane.xlu0 %4021  ;;  %4108 = vadd.xlane.f32.xlu1 %v4107_v51 }
0x1100   :  { %v4062_v19 = vmul.f32 0.03125, %v4022_v55  ;;  %v4025_v13 = vpop.xlane.xlu1 %4024  ;;  %v4110_v3 = vsel %vm119_vm0, %v4092_v30, 0.0  ;;  %v4093_v36 = vmul.f32 %v8237_v35, %v8237_v35 }
0x1101   :  { %v4063_v53 = vmul.f32 0.03125, %v4025_v13  ;;  %4111 = vadd.xlane.f32.xlu0 %v4110_v3 }
0x1102   :  { %v8246_v40 = vsub.f32 %v8150_v18, %v4062_v19  ;;  %v4113_v12 = vsel %vm119_vm0, %v4093_v36, 0.0 }
0x1103   :  { %v8250_v58 = vsub.f32 %v8157_v10, %v4063_v53  ;;  %v4028_v57 = vpop.xlane.xlu0 %4027  ;;  %4114 = vadd.xlane.f32.xlu1 %v4113_v12 }
0x1104   :  { %v4064_v8 = vmul.f32 0.03125, %v4028_v57  ;;  %v4031_v4 = vpop.xlane.xlu1 %4030  ;;  %v4094_v39 = vmul.f32 %v8246_v40, %v8246_v40 }
0x1105   :  { %v4065_v22 = vmul.f32 0.03125, %v4031_v4  ;;  %v4095_v38 = vmul.f32 %v8250_v58, %v8250_v58 }
0x1106   :  { %v8257_v49 = vsub.f32 %v8167_v23, %v4064_v8  ;;  %v4116_v18 = vsel %vm119_vm0, %v4094_v39, 0.0 }
0x1107   :  { %v8261_v11 = vsub.f32 %v8164_v63, %v4065_v22  ;;  %4117 = vadd.xlane.f32.xlu0 %v4116_v18  ;;  %v4034_v10 = vpop.xlane.xlu0 %4033  ;;  %v4119_v43 = vsel %vm119_vm0, %v4095_v38, 0.0 }
0x1108   :  { %v4066_v32 = vmul.f32 0.03125, %v4034_v10  ;;  %4120 = vadd.xlane.f32.xlu1 %v4119_v43  ;;  %v4037_v20 = vpop.xlane.xlu1 %4036  ;;  %v4096_v34 = vmul.f32 %v8257_v49, %v8257_v49  ;;  %v5727_v43 = vld [vmem:[%s8807_s19] sm:$0xff]  }
0x1109   :  { %v4067_v2 = vmul.f32 0.03125, %v4037_v20  ;;  %v4097_v23 = vmul.f32 %v8261_v11, %v8261_v11  ;;  %5543 = vmatprep.subr.bf16.mxu0 %v5727_v43  ;;  %v5730_v20 = vld [vmem:[%s8808_s20 + $0x8] sm:$0xff]  }
0x110a   :  { %v8269_v44 = vsub.f32 %v8172_v5, %v4066_v32  ;;  %v4122_v63 = vsel %vm119_vm0, %v4096_v34, 0.0  ;;  %5544 = vmatpush3.bf16.msra.mxu0 %v5727_v43  ;;  %v5729_v32 = vld [vmem:[%s8808_s20] sm:$0xff]  }
0x110b   :  { %v8273_v27 = vsub.f32 %v8181_v61, %v4067_v2  ;;  %4123 = vadd.xlane.f32.xlu0 %v4122_v63  ;;  %v4125_v0 = vsel %vm119_vm0, %v4097_v23, 0.0  ;;  %v4040_v52 = vpop.xlane.xlu0 %4039  ;;  %5563 = vmatprep.subr.bf16.mxu1 %v5729_v32 }
0x110c   :  { %4126 = vadd.xlane.f32.xlu1 %v4125_v0  ;;  %v4068_v17 = vmul.f32 0.03125, %v4040_v52  ;;  %v4043_v29 = vpop.xlane.xlu1 %4042  ;;  %v4098_v21 = vmul.f32 %v8269_v44, %v8269_v44  ;;  %5564 = vmatpush3.bf16.msra.mxu1 %v5729_v32 }
0x110d   :  { %v4069_v6 = vmul.f32 0.03125, %v4043_v29  ;;  %v4099_v5 = vmul.f32 %v8273_v27, %v8273_v27  ;;  %5565 = vmatprep.subr.bf16.mxu1 %v5730_v20 }
0x110e   :  { %v8281_v48 = vsub.f32 %v8191_v54, %v4068_v17  ;;  %v4128_v61 = vsel %vm119_vm0, %v4098_v21, 0.0 }
0x110f   :  { %v8285_v15 = vsub.f32 %v8188_v24, %v4069_v6  ;;  %4129 = vadd.xlane.f32.xlu0 %v4128_v61  ;;  %v4046_v9 = vpop.xlane.xlu0 %4045  ;;  %v4131_v14 = vsel %vm119_vm0, %v4099_v5, 0.0 }
0x1110   :  { %v4070_v42 = vmul.f32 0.03125, %v4046_v9  ;;  %4132 = vadd.xlane.f32.xlu1 %v4131_v14  ;;  %v4049_v46 = vpop.xlane.xlu1 %4048  ;;  %v4100_v28 = vmul.f32 %v8281_v48, %v8281_v48  ;;  %5566 = vmatpush3.bf16.msra.mxu1 %v5730_v20 }
0x1111   :  { %v4071_v59 = vmul.f32 0.03125, %v4049_v46  ;;  %v4101_v54 = vmul.f32 %v8285_v15, %v8285_v15 }
0x1112   :  { %v8293_v60 = vsub.f32 %v8198_v1, %v4070_v42  ;;  %v4134_v24 = vsel %vm119_vm0, %v4100_v28, 0.0 }
0x1113   :  { %v8297_v51 = vsub.f32 %v8205_v16, %v4071_v59  ;;  %4135 = vadd.xlane.f32.xlu0 %v4134_v24  ;;  %v4052_v30 = vpop.xlane.xlu0 %4051  ;;  %v4137_v55 = vsel %vm119_vm0, %v4101_v54, 0.0  ;;  %v8338_v54 = vrot.slane %v8039_v33, %v8859_v25 }
0x1114   :  { %v4072_v19 = vmul.f32 0.03125, %v4052_v30  ;;  %4138 = vadd.xlane.f32.xlu1 %v4137_v55  ;;  %v4055_v13 = vpop.xlane.xlu1 %4054  ;;  %v4102_v3 = vmul.f32 %v8293_v60, %v8293_v60 }
0x1115   :  { %v4073_v36 = vmul.f32 0.03125, %v4055_v13  ;;  %v4103_v1 = vmul.f32 %v8297_v51, %v8297_v51 }
0x1116   :  { %v8305_v53 = vsub.f32 %v8215_v50, %v4072_v19  ;;  %v4140_v16 = vsel %vm119_vm0, %v4102_v3, 0.0 }
0x1117   :  { %v8309_v12 = vsub.f32 %v8212_v56, %v4073_v36  ;;  %4141 = vadd.xlane.f32.xlu0 %v4140_v16  ;;  %v4058_v57 = vpop.xlane.xlu0 %4057  ;;  %v4143_v8 = vsel %vm119_vm0, %v4103_v1, 0.0  ;;  %v8344_v1 = vld [vmem:[%s8803_s22] sm:$0xff] }
0x1118   :  { %v4074_v4 = vmul.f32 0.03125, %v4058_v57  ;;  %4144 = vadd.xlane.f32.xlu1 %v4143_v8  ;;  %v4104_v39 = vmul.f32 %v8305_v53, %v8305_v53  ;;  %v8348_v16 = vrot.slane %v8344_v1, %v8860_v45 }
0x1119   :  { %v4105_v22 = vmul.f32 %v8309_v12, %v8309_v12 }
0x111a   :  { %v8317_v50 = vsub.f32 %v8222_v31, %v4074_v4  ;;  %v4146_v38 = vsel %vm119_vm0, %v4104_v39, 0.0  ;;  %v5728_v31 = vld [vmem:[%s8807_s19 + $0x8] sm:$0xff]  }
0x111b   :  { %4147 = vadd.xlane.f32.xlu0 %v4146_v38  ;;  %v4149_v56 = vsel %vm119_vm0, %v4105_v22, 0.0  ;;  %5545 = vmatprep.subr.bf16.mxu0 %v5728_v31 }
0x111c   :  { %4150 = vadd.xlane.f32.xlu1 %v4149_v56  ;;  %v4106_v18 = vmul.f32 %v8317_v50, %v8317_v50  ;;  %5546 = vmatpush3.bf16.msra.mxu0 %v5728_v31 }
0x111e   :  { %v4152_v10 = vsel %vm119_vm0, %v4106_v18, 0.0 }
0x111f   :  { %4153 = vadd.xlane.f32.xlu0 %v4152_v10 }
0x118c   :  { %v4109_v34 = vpop.xlane.xlu1 %4108 }
0x118d   :  { %v4155_v2 = vmul.f32 0.03125, %v4109_v34 }
0x118e   :  { %v4112_v23 = vpop.xlane.xlu0 %4111 }
0x118f   :  { %v4171_v63 = vadd.f32 1e-05, %v4155_v2  ;;  %v4156_v0 = vmul.f32 0.03125, %v4112_v23 }
0x1190   :  { %v4115_v52 = vpop.xlane.xlu1 %4114 }
0x1191   :  { %6113 = vrsqrt.f32 %v4171_v63  ;;  %v4172_v17 = vadd.f32 1e-05, %v4156_v0  ;;  %v4157_v29 = vmul.f32 0.03125, %v4115_v52 }
0x1193   :  { %6115 = vrsqrt.f32 %v4172_v17  ;;  %v4173_v21 = vadd.f32 1e-05, %v4157_v29 }
0x1194   :  { %v4118_v6 = vpop.xlane.xlu0 %4117 }
0x1195   :  { %6117 = vrsqrt.f32 %v4173_v21  ;;  %v4158_v5 = vmul.f32 0.03125, %v4118_v6  ;;  %v4121_v61 = vpop.xlane.xlu1 %4120 }
0x1196   :  { %v4159_v9 = vmul.f32 0.03125, %v4121_v61 }
0x1197   :  { %v4174_v14 = vadd.f32 1e-05, %v4158_v5 }
0x1198   :  { %v4175_v42 = vadd.f32 1e-05, %v4159_v9  ;;  %v4124_v46 = vpop.xlane.xlu0 %4123 }
0x1199   :  { %6119 = vrsqrt.f32 %v4174_v14  ;;  %v4160_v28 = vmul.f32 0.03125, %v4124_v46  ;;  %v4127_v59 = vpop.xlane.xlu1 %4126 }
0x119a   :  { %6121 = vrsqrt.f32 %v4175_v42  ;;  %v4161_v24 = vmul.f32 0.03125, %v4127_v59 }
0x119b   :  { %v6114_v30 = vpop.eup %6113  ;;  %v4176_v55 = vadd.f32 1e-05, %v4160_v28 }
0x119c   :  { %v4203_v19 = vmul.f32 %v6114_v30, %v8229_v7  ;;  %v4177_v13 = vadd.f32 1e-05, %v4161_v24  ;;  %v4130_v3 = vpop.xlane.xlu0 %4129 }
0x119d   :  { %v6116_v36 = vpop.eup %6115  ;;  %6123 = vrsqrt.f32 %v4176_v55  ;;  %v4162_v25 = vmul.f32 0.03125, %v4130_v3  ;;  %v4133_v33 = vpop.xlane.xlu1 %4132 }
0x119e   :  { %v4204_v57 = vmul.f32 %v6116_v36, %v8232_v62  ;;  %6125 = vrsqrt.f32 %v4177_v13  ;;  %v4163_v8 = vmul.f32 0.03125, %v4133_v33  ;;  %v4223_v7 = vmul.f32 %v8338_v54, %v4203_v19 }
0x119f   :  { %v6118_v4 = vpop.eup %6117  ;;  %v4178_v39 = vadd.f32 1e-05, %v4162_v25 }
0x11a0   :  { %v4205_v22 = vmul.f32 %v6118_v4, %v8237_v35  ;;  %v4179_v38 = vadd.f32 1e-05, %v4163_v8  ;;  %v4136_v56 = vpop.xlane.xlu0 %4135  ;;  %v4224_v18 = vmul.f32 %v8338_v54, %v4204_v57  ;;  %v8355_v31 = vadd.f32 %v8348_v16, %v4223_v7 }
0x11a1   :  { %6127 = vrsqrt.f32 %v4178_v39  ;;  %v4164_v45 = vmul.f32 0.03125, %v4136_v56  ;;  %v4139_v10 = vpop.xlane.xlu1 %4138 }
0x11a2   :  { %6129 = vrsqrt.f32 %v4179_v38  ;;  %v4165_v43 = vmul.f32 0.03125, %v4139_v10  ;;  %v8358_v62 = vadd.f32 %v8348_v16, %v4224_v18  ;;  %v4225_v35 = vmul.f32 %v8338_v54, %v4205_v22 }
0x11a3   :  { %v6120_v32 = vpop.eup %6119  ;;  %v4180_v20 = vadd.f32 1e-05, %v4164_v45 }
0x11a4   :  { %v6122_v34 = vpop.eup %6121  ;;  %v4206_v2 = vmul.f32 %v6120_v32, %v8246_v40  ;;  %v4181_v23 = vadd.f32 1e-05, %v4165_v43  ;;  %v4142_v63 = vpop.xlane.xlu0 %4141  ;;  %v4259_v0 = vpack.c.bf16 %v8358_v62, %v8355_v31  ;;  %v8369_v14 = vadd.f32 %v8348_v16, %v4225_v35 }
0x11a5   :  { %v4207_v52 = vmul.f32 %v6122_v34, %v8250_v58  ;;  %6131 = vrsqrt.f32 %v4180_v20  ;;  %v4166_v17 = vmul.f32 0.03125, %v4142_v63  ;;  %v4145_v29 = vpop.xlane.xlu1 %4144 }
0x11a6   :  { %v4226_v21 = vmul.f32 %v8338_v54, %v4206_v2  ;;  %6133 = vrsqrt.f32 %v4181_v23  ;;  %5547 = vmatprep.mubr.msk.bf16.mxu0 %vm119_vm0, %v4259_v0  ;;  %v4167_v6 = vmul.f32 0.03125, %v4145_v29 }
0x11a7   :  { %v6124_v5 = vpop.eup %6123  ;;  %v4182_v61 = vadd.f32 1e-05, %v4166_v17  ;;  %v4227_v40 = vmul.f32 %v8338_v54, %v4207_v52 }
0x11a8   :  { %v6126_v9 = vpop.eup %6125  ;;  %v8372_v42 = vadd.f32 %v8348_v16, %v4226_v21  ;;  %v4208_v58 = vmul.f32 %v6124_v5, %v8257_v49  ;;  %v4183_v46 = vadd.f32 1e-05, %v4167_v6  ;;  %v4148_v28 = vpop.xlane.xlu0 %4147 }
0x11a9   :  { %v4209_v59 = vmul.f32 %v6126_v9, %v8261_v11  ;;  %6135 = vrsqrt.f32 %v4182_v61  ;;  %v4168_v24 = vmul.f32 0.03125, %v4148_v28  ;;  %v4151_v30 = vpop.xlane.xlu1 %4150  ;;  %v8380_v25 = vadd.f32 %v8348_v16, %v4227_v40 }
0x11aa   :  { %6137 = vrsqrt.f32 %v4183_v46  ;;  %v4169_v55 = vmul.f32 0.03125, %v4151_v30  ;;  %v4260_v19 = vpack.c.bf16 %v8372_v42, %v8369_v14  ;;  %v4228_v13 = vmul.f32 %v8338_v54, %v4208_v58 }
0x11ab   :  { %v6128_v3 = vpop.eup %6127  ;;  %v4184_v36 = vadd.f32 1e-05, %v4168_v24  ;;  %v4229_v7 = vmul.f32 %v8338_v54, %v4209_v59 }
0x11ac   :  { %v6130_v49 = vpop.eup %6129  ;;  %v4210_v33 = vmul.f32 %v6128_v3, %v8269_v44  ;;  %v4185_v57 = vadd.f32 1e-05, %v4169_v55  ;;  %5548 = vmatmul.mubr.msk.bf16.vlgmr.msra.gmra.mrb[84].mxu0 %vm119_vm0, %v4260_v19  ;;  %v4154_v11 = vpop.xlane.xlu0 %4153  ;;  %v8385_v8 = vadd.f32 %v8348_v16, %v4228_v13  ;;  %v5731_v19 = vld [vmem:[%s8808_s20 + $0x10] sm:$0xff]  }
0x11ad   :  { %v4211_v4 = vmul.f32 %v6130_v49, %v8273_v27  ;;  %6139 = vrsqrt.f32 %v4184_v36  ;;  %v4170_v39 = vmul.f32 0.03125, %v4154_v11  ;;  %v8395_v10 = vadd.f32 %v8348_v16, %v4229_v7  ;;  %5567 = vmatprep.subr.bf16.mxu1 %v5731_v19 }
0x11ae   :  { %6141 = vrsqrt.f32 %v4185_v57  ;;  %v4261_v22 = vpack.c.bf16 %v8385_v8, %v8380_v25  ;;  %v4230_v38 = vmul.f32 %v8338_v54, %v4210_v33  ;;  %5568 = vmatpush3.bf16.msra.mxu1 %v5731_v19 }
0x11af   :  { %v6132_v44 = vpop.eup %6131  ;;  %v4186_v56 = vadd.f32 1e-05, %v4170_v39  ;;  %v4231_v43 = vmul.f32 %v8338_v54, %v4211_v4 }
0x11b0   :  { %v6134_v18 = vpop.eup %6133  ;;  %v4212_v45 = vmul.f32 %v6132_v44, %v8281_v48  ;;  %5551 = vmatprep.mubr.msk.bf16.mxu0 %vm119_vm0, %v4261_v22  ;;  %v8398_v27 = vadd.f32 %v8348_v16, %v4230_v38 }
0x11b1   :  { %v4213_v32 = vmul.f32 %v6134_v18, %v8285_v15  ;;  %6143 = vrsqrt.f32 %v4186_v56  ;;  %v8408_v23 = vadd.f32 %v8348_v16, %v4231_v43 }
0x11b2   :  { %v4262_v20 = vpack.c.bf16 %v8398_v27, %v8395_v10  ;;  %v4232_v34 = vmul.f32 %v8338_v54, %v4212_v45 }
0x11b3   :  { %v6136_v35 = vpop.eup %6135  ;;  %v4233_v15 = vmul.f32 %v8338_v54, %v4213_v32 }
0x11b4   :  { %v6138_v48 = vpop.eup %6137  ;;  %v4214_v2 = vmul.f32 %v6136_v35, %v8293_v60  ;;  %5552 = vmatmul.mubr.msk.bf16.gmra.mrb[88].mxu0 %vm119_vm0, %v4262_v20  ;;  %v8411_v63 = vadd.f32 %v8348_v16, %v4232_v34 }
0x11b5   :  { %v4215_v0 = vmul.f32 %v6138_v48, %v8297_v51  ;;  %v8421_v6 = vadd.f32 %v8348_v16, %v4233_v15 }
0x11b6   :  { %v4263_v52 = vpack.c.bf16 %v8411_v63, %v8408_v23  ;;  %v4234_v17 = vmul.f32 %v8338_v54, %v4214_v2 }
0x11b7   :  { %v6140_v29 = vpop.eup %6139  ;;  %v4235_v61 = vmul.f32 %v8338_v54, %v4215_v0 }
0x11b8   :  { %v6142_v21 = vpop.eup %6141  ;;  %v4216_v60 = vmul.f32 %v6140_v29, %v8305_v53  ;;  %5555 = vmatprep.mubr.msk.bf16.mxu0 %vm119_vm0, %v4263_v52  ;;  %v8424_v5 = vadd.f32 %v8348_v16, %v4234_v17 }
0x11b9   :  { %v4217_v51 = vmul.f32 %v6142_v21, %v8309_v12  ;;  %v8434_v46 = vadd.f32 %v8348_v16, %v4235_v61 }
0x11ba   :  { %v4264_v40 = vpack.c.bf16 %v8424_v5, %v8421_v6  ;;  %v4236_v9 = vmul.f32 %v8338_v54, %v4216_v60 }
0x11bb   :  { %v6144_v58 = vpop.eup %6143  ;;  %v4237_v59 = vmul.f32 %v8338_v54, %v4217_v51 }
0x11bc   :  { %v4218_v53 = vmul.f32 %v6144_v58, %v8317_v50  ;;  %5556 = vmatmul.mubr.msk.bf16.gmra.mrb[92].mxu0 %vm119_vm0, %v4264_v40  ;;  %v8437_v28 = vadd.f32 %v8348_v16, %v4236_v9 }
0x11bd   :  { %v8445_v30 = vadd.f32 %v8348_v16, %v4237_v59 }
0x11be   :  { %v4265_v12 = vpack.c.bf16 %v8437_v28, %v8434_v46  ;;  %v4238_v24 = vmul.f32 %v8338_v54, %v4218_v53  ;;  %v5732_v54 = vld [vmem:[%s8808_s20 + $0x18] sm:$0xff]  }
0x11bf   :  { %5569 = vmatprep.subr.bf16.mxu1 %v5732_v54 }
0x11c0   :  { %5559 = vmatprep.mubr.msk.bf16.mxu0 %vm119_vm0, %v4265_v12  ;;  %v8448_v50 = vadd.f32 %v8348_v16, %v4238_v24  ;;  %5570 = vmatpush3.bf16.msra.mxu1 %v5732_v54  ;;  %v4274_v16 = vrot.slane %v8344_v1, %v8862_v37 }
0x11c2   :  { %v4266_v55 = vpack.c.bf16 %v8448_v50, %v8445_v30 }
0x11c4   :  { %5560 = vmatmul.mubr.msk.bf16.gmra.mrb[96].mxu0 %vm119_vm0, %v4266_v55 }
0x127f   :  { %v5549_v13 = vpop.f32.mrb[84].mxu0 }
0x1280   :  { %v4354_v3 = vadd.f32 %v5549_v13, %v4274_v16  ;;  %v4345_v36 = vpop.f32.mrb[85].mxu0 }
0x1281   :  { %v4346_v49 = vadd.f32 %v4345_v36, %v4274_v16  ;;  %v5550_v33 = vpop.f32.mrb[86].mxu0 }
0x1282   :  { %v4357_v57 = vadd.f32 %v5550_v33, %v4274_v16  ;;  %v4348_v11 = vpop.f32.mrb[87].mxu0  ;;  %v4410_v4 = vmax.f32 %v4354_v3, 0.0 }
0x1283   :  { %v4349_v7 = vadd.f32 %v4348_v11, %v4274_v16  ;;  %v4408_v22 = vmax.f32 %v4346_v49, 0.0 }
0x1284   :  { %v4411_v39 = vmax.f32 %v4357_v57, 0.0 }
0x1285   :  { %v4409_v38 = vmax.f32 %v4349_v7, 0.0 }
0x1286   :  { %v4425_v44 = vpack.c.bf16 %v4411_v39, %v4410_v4 }
0x1287   :  { %v4424_v56 = vpack.c.bf16 %v4409_v38, %v4408_v22  ;;  %v5553_v18 = vpop.f32.mrb[88].mxu0 }
0x1288   :  { %v4370_v45 = vadd.f32 %v5553_v18, %v4274_v16  ;;  %v4361_v43 = vpop.f32.mrb[89].mxu0 }
0x1289   :  { %v4362_v32 = vadd.f32 %v4361_v43, %v4274_v16  ;;  %v5554_v20 = vpop.f32.mrb[90].mxu0  ;;  %5571 = vmatprep.mubr.msk.bf16.mxu1 %vm821_vm2, %v4424_v56  ;;  %v8471_v56 = vrot.slane %v8344_v1, %v7249_v26 }
0x128a   :  { %v4373_v37 = vadd.f32 %v5554_v20, %v4274_v16  ;;  %v4364_v34 = vpop.f32.mrb[91].mxu0  ;;  %5572 = vmatmul.mubr.msk.bf16.vlgmr.msra.gmra.mrb[92].mxu1 %vm821_vm2, %v4425_v44  ;;  %v4414_v48 = vmax.f32 %v4370_v45, 0.0 }
0x128b   :  { %v4365_v35 = vadd.f32 %v4364_v34, %v4274_v16  ;;  %v4412_v15 = vmax.f32 %v4362_v32, 0.0 }
0x128c   :  { %v4415_v2 = vmax.f32 %v4373_v37, 0.0 }
0x128d   :  { %v4413_v0 = vmax.f32 %v4365_v35, 0.0 }
0x128e   :  { %v4427_v52 = vpack.c.bf16 %v4415_v2, %v4414_v48 }
0x128f   :  { %v4426_v17 = vpack.c.bf16 %v4413_v0, %v4412_v15  ;;  %v5557_v29 = vpop.f32.mrb[92].mxu0 }
0x1290   :  { %v4386_v21 = vadd.f32 %v5557_v29, %v4274_v16  ;;  %v4377_v60 = vpop.f32.mrb[93].mxu0 }
0x1291   :  { %v4378_v61 = vadd.f32 %v4377_v60, %v4274_v16  ;;  %5575 = vmatprep.mubr.msk.bf16.mxu1 %vm821_vm2, %v4426_v17  ;;  %v5558_v51 = vpop.f32.mrb[94].mxu0 }
0x1292   :  { %v4389_v40 = vadd.f32 %v5558_v51, %v4274_v16  ;;  %5576 = vmatmul.mubr.msk.bf16.gmra.mrb[96].mxu1 %vm821_vm2, %v4427_v52  ;;  %v4380_v9 = vpop.f32.mrb[95].mxu0  ;;  %v4418_v53 = vmax.f32 %v4386_v21, 0.0 }
0x1293   :  { %v4381_v58 = vadd.f32 %v4380_v9, %v4274_v16  ;;  %v4416_v12 = vmax.f32 %v4378_v61, 0.0 }
0x1294   :  { %v4419_v59 = vmax.f32 %v4389_v40, 0.0 }
0x1295   :  { %v4417_v24 = vmax.f32 %v4381_v58, 0.0 }
0x1296   :  { %v4429_v55 = vpack.c.bf16 %v4419_v59, %v4418_v53 }
0x1297   :  { %v4428_v19 = vpack.c.bf16 %v4417_v24, %v4416_v12  ;;  %v5561_v54 = vpop.f32.mrb[96].mxu0 }
0x1298   :  { %v4402_v13 = vadd.f32 %v5561_v54, %v4274_v16  ;;  %v4393_v3 = vpop.f32.mrb[97].mxu0 }
0x1299   :  { %v4394_v36 = vadd.f32 %v4393_v3, %v4274_v16  ;;  %v5562_v49 = vpop.f32.mrb[98].mxu0  ;;  %5579 = vmatprep.mubr.msk.bf16.mxu1 %vm821_vm2, %v4428_v19 }
0x129a   :  { %v4405_v33 = vadd.f32 %v5562_v49, %v4274_v16  ;;  %v4396_v57 = vpop.f32.mrb[99].mxu0  ;;  %5580 = vmatmul.mubr.msk.bf16.gmra.mrb[100].mxu1 %vm821_vm2, %v4429_v55  ;;  %v4422_v7 = vmax.f32 %v4402_v13, 0.0 }
0x129b   :  { %v4397_v11 = vadd.f32 %v4396_v57, %v4274_v16  ;;  %v4420_v39 = vmax.f32 %v4394_v36, 0.0 }
0x129c   :  { %v4423_v4 = vmax.f32 %v4405_v33, 0.0 }
0x129d   :  { %v4421_v22 = vmax.f32 %v4397_v11, 0.0 }
0x129e   :  { %v4431_v38 = vpack.c.bf16 %v4423_v4, %v4422_v7 }
0x129f   :  { %v4430_v44 = vpack.c.bf16 %v4421_v22, %v4420_v39 }
0x12a1   :  { %5583 = vmatprep.mubr.msk.bf16.mxu1 %vm821_vm2, %v4430_v44 }
0x12a2   :  { %5584 = vmatmul.mubr.msk.bf16.gmra.mrb[104].mxu1 %vm821_vm2, %v4431_v38 }
0x135d   :  { %v5573_v18 = vpop.f32.mrb[92].mxu1 }
0x135e   :  { %v4535_v45 = vadd.f32 %v5573_v18, %v8471_v56  ;;  %v4526_v43 = vpop.f32.mrb[93].mxu1 }
0x135f   :  { %v4527_v16 = vadd.f32 %v4526_v43, %v8471_v56  ;;  %v5574_v32 = vpop.f32.mrb[94].mxu1 }
0x1360   :  { %v8476_v20 = vadd.f32 %v4535_v45, %v8369_v14  ;;  %v4538_v37 = vadd.f32 %v5574_v32, %v8471_v56  ;;  %v4529_v34 = vpop.f32.mrb[95].mxu1 }
0x1361   :  { %v4530_v35 = vadd.f32 %v4529_v34, %v8471_v56  ;;  %v8481_v48 = vadd.f32 %v4527_v16, %v8355_v31 }
0x1362   :  { %v8484_v26 = vadd.f32 %v4538_v37, %v8372_v42  ;;  %v4611_v1 = vsel %vm119_vm0, %v8476_v20, 0.0 }
0x1363   :  { %4612 = vadd.xlane.f32.xlu1 %v4611_v1  ;;  %v8489_v2 = vadd.f32 %v4530_v35, %v8358_v62  ;;  %v4605_v31 = vsel %vm119_vm0, %v8481_v48, 0.0 }
0x1364   :  { %v4614_v14 = vsel %vm119_vm0, %v8484_v26, 0.0 }
0x1365   :  { %4615 = vadd.xlane.f32.xlu0 %v4614_v14  ;;  %v5577_v15 = vpop.f32.mrb[96].mxu1  ;;  %v4608_v60 = vsel %vm119_vm0, %v8489_v2, 0.0 }
0x1366   :  { %v4551_v0 = vadd.f32 %v5577_v15, %v8471_v56  ;;  %v4542_v52 = vpop.f32.mrb[97].mxu1 }
0x1367   :  { %v4543_v42 = vadd.f32 %v4542_v52, %v8471_v56  ;;  %4606 = vadd.xlane.f32.xlu1 %v4605_v31  ;;  %v5578_v17 = vpop.f32.mrb[98].mxu1 }
0x1368   :  { %v8498_v29 = vadd.f32 %v4551_v0, %v8395_v10  ;;  %v4554_v62 = vadd.f32 %v5578_v17, %v8471_v56  ;;  %v4545_v21 = vpop.f32.mrb[99].mxu1 }
0x1369   :  { %v4546_v61 = vadd.f32 %v4545_v21, %v8471_v56  ;;  %4609 = vadd.xlane.f32.xlu0 %v4608_v60  ;;  %v8505_v51 = vadd.f32 %v4543_v42, %v8380_v25 }
0x136a   :  { %v8508_v40 = vadd.f32 %v4554_v62, %v8398_v27  ;;  %v4623_v9 = vsel %vm119_vm0, %v8498_v29, 0.0 }
0x136b   :  { %4624 = vadd.xlane.f32.xlu1 %v4623_v9  ;;  %v8513_v10 = vadd.f32 %v4546_v61, %v8385_v8  ;;  %v4617_v25 = vsel %vm119_vm0, %v8505_v51, 0.0 }
0x136c   :  { %v4626_v58 = vsel %vm119_vm0, %v8508_v40, 0.0 }
0x136d   :  { %4627 = vadd.xlane.f32.xlu0 %v4626_v58  ;;  %v5581_v53 = vpop.f32.mrb[100].mxu1  ;;  %v4620_v19 = vsel %vm119_vm0, %v8513_v10, 0.0 }
0x136e   :  { %v4567_v59 = vadd.f32 %v5581_v53, %v8471_v56  ;;  %v4558_v12 = vpop.f32.mrb[101].mxu1 }
0x136f   :  { %4618 = vadd.xlane.f32.xlu1 %v4617_v25  ;;  %v4559_v27 = vadd.f32 %v4558_v12, %v8471_v56  ;;  %v5582_v24 = vpop.f32.mrb[102].mxu1 }
0x1370   :  { %v8522_v55 = vadd.f32 %v4567_v59, %v8421_v6  ;;  %v4570_v8 = vadd.f32 %v5582_v24, %v8471_v56  ;;  %v4561_v54 = vpop.f32.mrb[103].mxu1 }
0x1371   :  { %4621 = vadd.xlane.f32.xlu0 %v4620_v19  ;;  %v4562_v13 = vadd.f32 %v4561_v54, %v8471_v56  ;;  %v8529_v3 = vadd.f32 %v4559_v27, %v8408_v23 }
0x1372   :  { %v8532_v36 = vadd.f32 %v4570_v8, %v8424_v5  ;;  %v4635_v49 = vsel %vm119_vm0, %v8522_v55, 0.0 }
0x1373   :  { %4636 = vadd.xlane.f32.xlu1 %v4635_v49  ;;  %v8537_v6 = vadd.f32 %v4562_v13, %v8411_v63  ;;  %v4629_v23 = vsel %vm119_vm0, %v8529_v3, 0.0 }
0x1374   :  { %v4638_v33 = vsel %vm119_vm0, %v8532_v36, 0.0 }
0x1375   :  { %4639 = vadd.xlane.f32.xlu0 %v4638_v33  ;;  %v5585_v57 = vpop.f32.mrb[104].mxu1  ;;  %v4632_v63 = vsel %vm119_vm0, %v8537_v6, 0.0 }
0x1376   :  { %v4574_v11 = vpop.f32.mrb[105].mxu1  ;;  %v4583_v7 = vadd.f32 %v5585_v57, %v8471_v56 }
0x1377   :  { %v4575_v5 = vadd.f32 %v4574_v11, %v8471_v56  ;;  %4630 = vadd.xlane.f32.xlu1 %v4629_v23  ;;  %v5586_v4 = vpop.f32.mrb[106].mxu1 }
0x1378   :  { %v4577_v39 = vpop.f32.mrb[107].mxu1  ;;  %v4586_v38 = vadd.f32 %v5586_v4, %v8471_v56  ;;  %v8553_v18 = vadd.f32 %v4583_v7, %v8445_v30 }
0x1379   :  { %v8548_v22 = vadd.f32 %v4575_v5, %v8434_v46  ;;  %v4578_v44 = vadd.f32 %v4577_v39, %v8471_v56  ;;  %4633 = vadd.xlane.f32.xlu0 %v4632_v63 }
0x137a   :  { %v8561_v16 = vadd.f32 %v4586_v38, %v8448_v50  ;;  %v4647_v56 = vsel %vm119_vm0, %v8553_v18, 0.0 }
0x137b   :  { %v8556_v45 = vadd.f32 %v4578_v44, %v8437_v28  ;;  %v4641_v43 = vsel %vm119_vm0, %v8548_v22, 0.0 }
0x137c   :  { %4642 = vadd.xlane.f32.xlu1 %v4641_v43  ;;  %v4650_v30 = vsel %vm119_vm0, %v8561_v16, 0.0 }
0x137d   :  { %v4644_v46 = vsel %vm119_vm0, %v8556_v45, 0.0 }
0x137e   :  { %4645 = vadd.xlane.f32.xlu0 %v4644_v46 }
0x1380   :  { %4648 = vadd.xlane.f32.xlu1 %v4647_v56 }
0x1382   :  { %4651 = vadd.xlane.f32.xlu0 %v4650_v30 }
0x13f0   :  { %v4613_v28 = vpop.xlane.xlu1 %4612 }
0x13f1   :  { %v4655_v32 = vmul.f32 0.03125, %v4613_v28 }
0x13f2   :  { %v4616_v37 = vpop.xlane.xlu0 %4615 }
0x13f3   :  { %v8570_v34 = vsub.f32 %v8476_v20, %v4655_v32  ;;  %v4656_v50 = vmul.f32 0.03125, %v4616_v37 }
0x13f4   :  { %v4607_v35 = vpop.xlane.xlu1 %4606 }
0x13f5   :  { %v8573_v1 = vsub.f32 %v8484_v26, %v4656_v50  ;;  %v4653_v14 = vmul.f32 0.03125, %v4607_v35  ;;  %v4687_v15 = vmul.f32 %v8570_v34, %v8570_v34 }
0x13f6   :  { %v4610_v0 = vpop.xlane.xlu0 %4609 }
0x13f7   :  { %v8578_v52 = vsub.f32 %v8481_v48, %v4653_v14  ;;  %v4654_v31 = vmul.f32 0.03125, %v4610_v0  ;;  %v4707_v42 = vsel %vm119_vm0, %v4687_v15, 0.0  ;;  %v4688_v20 = vmul.f32 %v8573_v1, %v8573_v1 }
0x13f8   :  { %4708 = vadd.xlane.f32.xlu1 %v4707_v42  ;;  %v4625_v17 = vpop.xlane.xlu1 %4624 }
0x13f9   :  { %v8584_v62 = vsub.f32 %v8489_v2, %v4654_v31  ;;  %v4659_v26 = vmul.f32 0.03125, %v4625_v17  ;;  %v4710_v21 = vsel %vm119_vm0, %v4688_v20, 0.0  ;;  %v4685_v60 = vmul.f32 %v8578_v52, %v8578_v52 }
0x13fa   :  { %v4628_v61 = vpop.xlane.xlu0 %4627  ;;  %4711 = vadd.xlane.f32.xlu0 %v4710_v21 }
0x13fb   :  { %v8590_v48 = vsub.f32 %v8498_v29, %v4659_v26  ;;  %v4660_v9 = vmul.f32 0.03125, %v4628_v61  ;;  %v4701_v58 = vsel %vm119_vm0, %v4685_v60, 0.0  ;;  %v4686_v53 = vmul.f32 %v8584_v62, %v8584_v62 }
0x13fc   :  { %4702 = vadd.xlane.f32.xlu1 %v4701_v58  ;;  %v4619_v2 = vpop.xlane.xlu1 %4618 }
0x13fd   :  { %v8596_v59 = vsub.f32 %v8508_v40, %v4660_v9  ;;  %v4657_v25 = vmul.f32 0.03125, %v4619_v2  ;;  %v4704_v12 = vsel %vm119_vm0, %v4686_v53, 0.0  ;;  %v4691_v27 = vmul.f32 %v8590_v48, %v8590_v48 }
0x13fe   :  { %v4622_v24 = vpop.xlane.xlu0 %4621  ;;  %4705 = vadd.xlane.f32.xlu0 %v4704_v12 }
0x13ff   :  { %v8602_v29 = vsub.f32 %v8505_v51, %v4657_v25  ;;  %v4658_v8 = vmul.f32 0.03125, %v4622_v24  ;;  %v4719_v19 = vsel %vm119_vm0, %v4691_v27, 0.0  ;;  %v4692_v54 = vmul.f32 %v8596_v59, %v8596_v59 }
0x1400   :  { %4720 = vadd.xlane.f32.xlu1 %v4719_v19  ;;  %v4637_v40 = vpop.xlane.xlu1 %4636 }
0x1401   :  { %v8608_v13 = vsub.f32 %v8513_v10, %v4658_v8  ;;  %v4663_v49 = vmul.f32 0.03125, %v4637_v40  ;;  %v4722_v33 = vsel %vm119_vm0, %v4692_v54, 0.0  ;;  %v4689_v57 = vmul.f32 %v8602_v29, %v8602_v29 }
0x1402   :  { %4723 = vadd.xlane.f32.xlu0 %v4722_v33  ;;  %v4640_v51 = vpop.xlane.xlu0 %4639 }
0x1403   :  { %v8614_v11 = vsub.f32 %v8522_v55, %v4663_v49  ;;  %v4664_v23 = vmul.f32 0.03125, %v4640_v51  ;;  %v4713_v7 = vsel %vm119_vm0, %v4689_v57, 0.0  ;;  %v4690_v5 = vmul.f32 %v8608_v13, %v8608_v13 }
0x1404   :  { %4714 = vadd.xlane.f32.xlu1 %v4713_v7  ;;  %v4631_v10 = vpop.xlane.xlu1 %4630  ;;  %v3024_v7 = vld [vmem:[%s8803_s22 + $0x8] sm:$0x3] }
0x1405   :  { %v8620_v4 = vsub.f32 %v8532_v36, %v4664_v23  ;;  %v4661_v39 = vmul.f32 0.03125, %v4631_v10  ;;  %v4716_v63 = vsel %vm119_vm0, %v4690_v5, 0.0  ;;  %v4695_v38 = vmul.f32 %v8614_v11, %v8614_v11 }
0x1406   :  { %4717 = vadd.xlane.f32.xlu0 %v4716_v63  ;;  %v4634_v55 = vpop.xlane.xlu0 %4633 }
0x1407   :  { %v8626_v44 = vsub.f32 %v8529_v3, %v4661_v39  ;;  %v4662_v43 = vmul.f32 0.03125, %v4634_v55  ;;  %v4731_v46 = vsel %vm119_vm0, %v4695_v38, 0.0  ;;  %v4696_v56 = vmul.f32 %v8620_v4, %v8620_v4 }
0x1408   :  { %4732 = vadd.xlane.f32.xlu1 %v4731_v46  ;;  %v8669_v55 = vrot.slane %v3024_v7, %v6417_v41 }
0x1409   :  { %v8632_v36 = vsub.f32 %v8537_v6, %v4662_v43  ;;  %v4643_v30 = vpop.xlane.xlu1 %4642  ;;  %v4734_v28 = vsel %vm119_vm0, %v4696_v56, 0.0  ;;  %v4693_v32 = vmul.f32 %v8626_v44, %v8626_v44 }
0x140a   :  { %v4665_v37 = vmul.f32 0.03125, %v4643_v30  ;;  %4735 = vadd.xlane.f32.xlu0 %v4734_v28  ;;  %v8672_v28 = vrot.slane %v3024_v7, %v8863_v47 }
0x140b   :  { %v4646_v3 = vpop.xlane.xlu0 %4645  ;;  %v4725_v50 = vsel %vm119_vm0, %v4693_v32, 0.0  ;;  %v4694_v35 = vmul.f32 %v8632_v36, %v8632_v36 }
0x140c   :  { %v8641_v14 = vsub.f32 %v8548_v22, %v4665_v37  ;;  %v4666_v15 = vmul.f32 0.03125, %v4646_v3  ;;  %4726 = vadd.xlane.f32.xlu1 %v4725_v50 }
0x140d   :  { %v4649_v6 = vpop.xlane.xlu1 %4648  ;;  %v4728_v0 = vsel %vm119_vm0, %v4694_v35, 0.0 }
0x140e   :  { %v8645_v31 = vsub.f32 %v8556_v45, %v4666_v15  ;;  %v4667_v42 = vmul.f32 0.03125, %v4649_v6  ;;  %4729 = vadd.xlane.f32.xlu0 %v4728_v0  ;;  %v4697_v20 = vmul.f32 %v8641_v14, %v8641_v14 }
0x140f   :  { %v4652_v17 = vpop.xlane.xlu0 %4651 }
0x1410   :  { %v8650_v26 = vsub.f32 %v8553_v18, %v4667_v42  ;;  %v4668_v21 = vmul.f32 0.03125, %v4652_v17  ;;  %v4737_v22 = vsel %vm119_vm0, %v4697_v20, 0.0  ;;  %v4698_v60 = vmul.f32 %v8645_v31, %v8645_v31 }
0x1411   :  { %4738 = vadd.xlane.f32.xlu1 %v4737_v22 }
0x1412   :  { %v8656_v61 = vsub.f32 %v8561_v16, %v4668_v21  ;;  %v4740_v45 = vsel %vm119_vm0, %v4698_v60, 0.0  ;;  %v4699_v9 = vmul.f32 %v8650_v26, %v8650_v26 }
0x1413   :  { %4741 = vadd.xlane.f32.xlu0 %v4740_v45 }
0x1414   :  { %v4743_v58 = vsel %vm119_vm0, %v4699_v9, 0.0  ;;  %v4700_v18 = vmul.f32 %v8656_v61, %v8656_v61 }
0x1415   :  { %4744 = vadd.xlane.f32.xlu1 %v4743_v58 }
0x1416   :  { %v4746_v53 = vsel %vm119_vm0, %v4700_v18, 0.0 }
0x1417   :  { %4747 = vadd.xlane.f32.xlu0 %v4746_v53 }
0x1485   :  { %v4709_v2 = vpop.xlane.xlu1 %4708 }
0x1486   :  { %v4751_v25 = vmul.f32 0.03125, %v4709_v2 }
0x1487   :  { %v4712_v12 = vpop.xlane.xlu0 %4711 }
0x1488   :  { %v4767_v16 = vadd.f32 1e-05, %v4751_v25  ;;  %v4752_v27 = vmul.f32 0.03125, %v4712_v12 }
0x1489   :  { %v4703_v24 = vpop.xlane.xlu1 %4702 }
0x148a   :  { %6145 = vrsqrt.f32 %v4767_v16  ;;  %v4768_v8 = vadd.f32 1e-05, %v4752_v27  ;;  %v4749_v19 = vmul.f32 0.03125, %v4703_v24 }
0x148b   :  { %v4706_v54 = vpop.xlane.xlu0 %4705 }
0x148c   :  { %6147 = vrsqrt.f32 %v4768_v8  ;;  %v4765_v40 = vadd.f32 1e-05, %v4749_v19  ;;  %v4750_v49 = vmul.f32 0.03125, %v4706_v54 }
0x148d   :  { %v4721_v33 = vpop.xlane.xlu1 %4720 }
0x148e   :  { %6149 = vrsqrt.f32 %v4765_v40  ;;  %v4766_v57 = vadd.f32 1e-05, %v4750_v49  ;;  %v4755_v51 = vmul.f32 0.03125, %v4721_v33 }
0x148f   :  { %v4724_v23 = vpop.xlane.xlu0 %4723 }
0x1490   :  { %6151 = vrsqrt.f32 %v4766_v57  ;;  %v4771_v5 = vadd.f32 1e-05, %v4755_v51  ;;  %v4756_v10 = vmul.f32 0.03125, %v4724_v23 }
0x1491   :  { %v4715_v39 = vpop.xlane.xlu1 %4714 }
0x1492   :  { %6153 = vrsqrt.f32 %v4771_v5  ;;  %v4772_v63 = vadd.f32 1e-05, %v4756_v10  ;;  %v4753_v38 = vmul.f32 0.03125, %v4715_v39 }
0x1493   :  { %v4718_v43 = vpop.xlane.xlu0 %4717 }
0x1494   :  { %v6146_v46 = vpop.eup %6145  ;;  %6155 = vrsqrt.f32 %v4772_v63  ;;  %v4769_v56 = vadd.f32 1e-05, %v4753_v38  ;;  %v4754_v30 = vmul.f32 0.03125, %v4718_v43 }
0x1495   :  { %v4799_v32 = vmul.f32 %v6146_v46, %v8570_v34  ;;  %v4733_v37 = vpop.xlane.xlu1 %4732 }
0x1496   :  { %v6148_v3 = vpop.eup %6147  ;;  %6157 = vrsqrt.f32 %v4769_v56  ;;  %v4770_v50 = vadd.f32 1e-05, %v4754_v30  ;;  %v4759_v35 = vmul.f32 0.03125, %v4733_v37 }
0x1497   :  { %v4819_v15 = vmul.f32 %v8669_v55, %v4799_v32  ;;  %v4800_v41 = vmul.f32 %v6148_v3, %v8573_v1  ;;  %v4736_v6 = vpop.xlane.xlu0 %4735 }
0x1498   :  { %v6150_v0 = vpop.eup %6149  ;;  %6159 = vrsqrt.f32 %v4770_v50  ;;  %v4775_v42 = vadd.f32 1e-05, %v4759_v35  ;;  %v4760_v20 = vmul.f32 0.03125, %v4736_v6 }
0x1499   :  { %v4839_v17 = vadd.f32 %v8672_v28, %v4819_v15  ;;  %v4820_v47 = vmul.f32 %v8669_v55, %v4800_v41  ;;  %v4797_v34 = vmul.f32 %v6150_v0, %v8578_v52  ;;  %v4727_v21 = vpop.xlane.xlu1 %4726 }
0x149a   :  { %v6152_v22 = vpop.eup %6151  ;;  %6161 = vrsqrt.f32 %v4775_v42  ;;  %v4776_v60 = vadd.f32 1e-05, %v4760_v20  ;;  %v4757_v45 = vmul.f32 0.03125, %v4727_v21 }
0x149b   :  { %4855 = vst.msk [vmem:[%s8809_s23 + $0x10] sm:$0xff] %vm119_vm0, %v4839_v17  ;;  %v4840_v1 = vadd.f32 %v8672_v28, %v4820_v47  ;;  %v4817_v9 = vmul.f32 %v8669_v55, %v4797_v34  ;;  %v4798_v58 = vmul.f32 %v6152_v22, %v8584_v62  ;;  %v4730_v18 = vpop.xlane.xlu0 %4729 }
0x149c   :  { %v6154_v53 = vpop.eup %6153  ;;  %6163 = vrsqrt.f32 %v4776_v60  ;;  %v4773_v52 = vadd.f32 1e-05, %v4757_v45  ;;  %v4758_v2 = vmul.f32 0.03125, %v4730_v18 }
0x149d   :  { %4856 = vst.msk [vmem:[%s8809_s23 + $0x18] sm:$0xff] %vm119_vm0, %v4840_v1  ;;  %v4837_v25 = vadd.f32 %v8672_v28, %v4817_v9  ;;  %v4818_v12 = vmul.f32 %v8669_v55, %v4798_v58  ;;  %v4803_v16 = vmul.f32 %v6154_v53, %v8590_v48 }
0x149e   :  { %v6156_v27 = vpop.eup %6155  ;;  %6165 = vrsqrt.f32 %v4773_v52  ;;  %v4774_v24 = vadd.f32 1e-05, %v4758_v2  ;;  %v4739_v62 = vpop.xlane.xlu1 %4738 }
0x149f   :  { %4853 = vst.msk [vmem:[%s8809_s23] sm:$0xff] %vm119_vm0, %v4837_v25  ;;  %v4838_v8 = vadd.f32 %v8672_v28, %v4818_v12  ;;  %v4823_v19 = vmul.f32 %v8669_v55, %v4803_v16  ;;  %v4804_v54 = vmul.f32 %v6156_v27, %v8596_v59  ;;  %v4761_v40 = vmul.f32 0.03125, %v4739_v62 }
0x14a0   :  { %v6158_v49 = vpop.eup %6157  ;;  %6167 = vrsqrt.f32 %v4774_v24  ;;  %v4742_v33 = vpop.xlane.xlu0 %4741 }
0x14a1   :  { %4854 = vst.msk [vmem:[%s8809_s23 + $0x8] sm:$0xff] %vm119_vm0, %v4838_v8  ;;  %v4843_v48 = vadd.f32 %v8672_v28, %v4823_v19  ;;  %v4824_v57 = vmul.f32 %v8669_v55, %v4804_v54  ;;  %v4801_v51 = vmul.f32 %v6158_v49, %v8602_v29  ;;  %v4777_v23 = vadd.f32 1e-05, %v4761_v40 }
0x14a2   :  { %v6160_v7 = vpop.eup %6159  ;;  %v4762_v5 = vmul.f32 0.03125, %v4742_v33  ;;  %v4745_v10 = vpop.xlane.xlu1 %4744 }
0x14a3   :  { %4859 = vst.msk [vmem:[%s8809_s23 + $0x30] sm:$0xff] %vm119_vm0, %v4843_v48  ;;  %v4844_v59 = vadd.f32 %v8672_v28, %v4824_v57  ;;  %v4821_v39 = vmul.f32 %v8669_v55, %v4801_v51  ;;  %v4802_v63 = vmul.f32 %v6160_v7, %v8608_v13  ;;  %6169 = vrsqrt.f32 %v4777_v23 }
0x14a4   :  { %v6162_v38 = vpop.eup %6161  ;;  %v4778_v43 = vadd.f32 1e-05, %v4762_v5  ;;  %v4763_v46 = vmul.f32 0.03125, %v4745_v10  ;;  %v4748_v29 = vpop.xlane.xlu0 %4747 }
0x14a5   :  { %4860 = vst.msk [vmem:[%s8809_s23 + $0x38] sm:$0xff] %vm119_vm0, %v4844_v59  ;;  %v4841_v56 = vadd.f32 %v8672_v28, %v4821_v39  ;;  %v4822_v30 = vmul.f32 %v8669_v55, %v4802_v63  ;;  %v4807_v32 = vmul.f32 %v6162_v38, %v8614_v11  ;;  %v4764_v37 = vmul.f32 0.03125, %v4748_v29 }
0x14a6   :  { %v6164_v3 = vpop.eup %6163  ;;  %6171 = vrsqrt.f32 %v4778_v43  ;;  %v4779_v13 = vadd.f32 1e-05, %v4763_v46 }
0x14a7   :  { %4857 = vst.msk [vmem:[%s8809_s23 + $0x20] sm:$0xff] %vm119_vm0, %v4841_v56  ;;  %v4842_v50 = vadd.f32 %v8672_v28, %v4822_v30  ;;  %v4827_v35 = vmul.f32 %v8669_v55, %v4807_v32  ;;  %v4808_v15 = vmul.f32 %v6164_v3, %v8620_v4  ;;  %v4780_v41 = vadd.f32 1e-05, %v4764_v37 }
0x14a8   :  { %v6166_v6 = vpop.eup %6165  ;;  %6173 = vrsqrt.f32 %v4779_v13 }
0x14a9   :  { %4858 = vst.msk [vmem:[%s8809_s23 + $0x28] sm:$0xff] %vm119_vm0, %v4842_v50  ;;  %v4847_v11 = vadd.f32 %v8672_v28, %v4827_v35  ;;  %v4828_v0 = vmul.f32 %v8669_v55, %v4808_v15  ;;  %v4805_v42 = vmul.f32 %v6166_v6, %v8626_v44  ;;  %6175 = vrsqrt.f32 %v4780_v41 }
0x14aa   :  { %v6168_v20 = vpop.eup %6167 }
0x14ab   :  { %4863 = vst.msk [vmem:[%s8809_s23 + $0x50] sm:$0xff] %vm119_vm0, %v4847_v11  ;;  %v4848_v4 = vadd.f32 %v8672_v28, %v4828_v0  ;;  %v4825_v17 = vmul.f32 %v8669_v55, %v4805_v42  ;;  %v4806_v47 = vmul.f32 %v6168_v20, %v8632_v36 }
0x14ad   :  { %v6170_v34 = vpop.eup %6169  ;;  %4864 = vst.msk [vmem:[%s8809_s23 + $0x58] sm:$0xff] %vm119_vm0, %v4848_v4  ;;  %v4845_v44 = vadd.f32 %v8672_v28, %v4825_v17  ;;  %v4826_v21 = vmul.f32 %v8669_v55, %v4806_v47 }
0x14ae   :  { %v4809_v22 = vmul.f32 %v6170_v34, %v8641_v14 }
0x14af   :  { %4861 = vst.msk [vmem:[%s8809_s23 + $0x40] sm:$0xff] %vm119_vm0, %v4845_v44  ;;  %v4846_v60 = vadd.f32 %v8672_v28, %v4826_v21 }
0x14b0   :  { %v6172_v36 = vpop.eup %6171  ;;  %v4829_v45 = vmul.f32 %v8669_v55, %v4809_v22 }
0x14b1   :  { %4862 = vst.msk [vmem:[%s8809_s23 + $0x48] sm:$0xff] %vm119_vm0, %v4846_v60  ;;  %v4810_v1 = vmul.f32 %v6172_v36, %v8645_v31 }
0x14b2   :  { %v6174_v9 = vpop.eup %6173  ;;  %v4849_v14 = vadd.f32 %v8672_v28, %v4829_v45 }
0x14b3   :  { %v6176_v58 = vpop.eup %6175  ;;  %v4830_v18 = vmul.f32 %v8669_v55, %v4810_v1  ;;  %v4811_v53 = vmul.f32 %v6174_v9, %v8650_v26 }
0x14b4   :  { %4865 = vst.msk [vmem:[%s8809_s23 + $0x60] sm:$0xff] %vm119_vm0, %v4849_v14  ;;  %v4812_v52 = vmul.f32 %v6176_v58, %v8656_v61 }
0x14b5   :  { %v4850_v2 = vadd.f32 %v8672_v28, %v4830_v18  ;;  %v4831_v25 = vmul.f32 %v8669_v55, %v4811_v53 }
0x14b6   :  { %v4832_v31 = vmul.f32 %v8669_v55, %v4812_v52 }
0x14b7   :  { %4866 = vst.msk [vmem:[%s8809_s23 + $0x68] sm:$0xff] %vm119_vm0, %v4850_v2  ;;  %v4851_v26 = vadd.f32 %v8672_v28, %v4831_v25 }
0x14b8   :  { %v4852_v12 = vadd.f32 %v8672_v28, %v4832_v31 }
0x14b9   :  { %4867 = vst.msk [vmem:[%s8809_s23 + $0x70] sm:$0xff] %vm119_vm0, %v4851_v26 }
0x14ba   :  { %4868 = vst.msk [vmem:[%s8809_s23 + $0x78] sm:$0xff] %vm119_vm0, %v4852_v12 }

</bundles_post_ra>
